<compile_context>
chip_gen: v5e
topology: v5e:2x2
jax: 0.10.0
libtpu: 0.0.40
codegen_flags: <defaults>
</compile_context>

<pallas_src>
import math

import jax
import jax.numpy as jnp
from jax.experimental import pallas as pl
from jax.experimental.pallas import tpu as pltpu


def _round_up(n: int, m: int) -> int:
    return ((n + m - 1) // m) * m


def _choose_batch_tile(B: int, max_tb: int = 2048, min_blocks: int = 2):
    """Pick a lane tile (multiple of 128) dividing the padded batch.

    Prefers the largest tile <= max_tb that still leaves >= min_blocks grid
    steps (keeps both v7x TensorCores busy); falls back gracefully for tiny
    batches.  max_tb caps the (d, d, TB) sparsemax temporaries so they stay
    well under v5e's 16 MiB default scoped VMEM.
    """
    B_pad = _round_up(B, 128)
    divisors = [t for t in range(128, B_pad + 1, 128) if B_pad % t == 0]
    good = [t for t in divisors if t <= max_tb and B_pad // t >= min_blocks]
    if good:
        tb = max(good)
    else:
        capped = [t for t in divisors if t <= max_tb]
        tb = max(capped) if capped else 128
    return tb, B_pad


def _make_hsic_sparsemax_kernel(num_layers, out_dims, bias_offsets):
    """Builds a kernel with refs = (x, w0, ..., w_{L-1}, bias_packed, out)."""

    def kernel(*refs):
        x_ref = refs[0]
        w_refs = refs[1:1 + num_layers]
        bias_ref = refs[1 + num_layers]
        out_ref = refs[-1]

        # --- MLP (feature-major): h is (features, TB), batch on lanes ------
        h = x_ref[...]                                          # (d_in, TB) f32
        for li in range(num_layers):
            w = w_refs[li][...]                                 # (out, in) f32
            off, od = bias_offsets[li], out_dims[li]
            b = bias_ref[off:off + od, :]                       # (out, 1) f32
            z = jnp.dot(w, h,
                        preferred_element_type=jnp.float32,
                        precision=jax.lax.Precision.HIGHEST) + b
            if li < num_layers - 1:
                h = 1.0 / (1.0 + jnp.exp(-z))                   # exact sigmoid
            else:
                h = z                                           # logits

        # --- Sparsemax over features (axis 0); lane-dense over the batch ---
        # Shift by per-column max for numerical stability (output unchanged).
        z = h - jnp.max(h, axis=0, keepdims=True)               # (d, TB)

        # ge[i, j, b] = (z[j, b] >= z[i, b]); kept as a bool mask.
        ge = z[None, :, :] >= z[:, None, :]                     # (d, d, TB)
        rank = jnp.sum(jnp.where(ge, 1.0, 0.0), axis=1)         # #{j: z_j>=z_i}
        s_ge = jnp.sum(jnp.where(ge, z[None, :, :], 0.0), axis=1)

        # Feature i is in the support iff 1 + rank_i * z_i > S_i.
        supported = (1.0 + rank * z) > s_ge                     # (d, TB) bool
        k = jnp.max(jnp.where(supported, rank, 0.0),
                    axis=0, keepdims=True)                      # k(z) >= 1
        ssum = jnp.sum(jnp.where(supported, z, 0.0),
                       axis=0, keepdims=True)
        tau = (ssum - 1.0) / k                                  # exact divide
        out_ref[...] = jnp.maximum(z - tau, 0.0)                # (d_out, TB)

    return kernel


def hsic_sparsemax_forward(x, weights, biases, sigmas, sigma_y, *,
                           max_block_cols: int = 2048):
    """JAX wrapper mirroring HSICNetSparsemax.forward.

    x:        (batch, input_dim) f32
    weights:  list of (out, in) matrices (same layout as torch.nn.Linear.weight)
    biases:   list of (out,) vectors
    Returns (importance_weights, sigmas, sigma_y).
    """
    B, d_in = x.shape
    num_layers = len(weights)
    out_dims = [int(w.shape[0]) for w in weights]
    d_out = out_dims[-1]

    TB, B_pad = _choose_batch_tile(B, max_tb=max_block_cols)

    # Feature-major input: (d_in, B_pad), batch on the lane axis.
    x_t = jnp.transpose(x.astype(jnp.float32))
    if B_pad != B:
        x_t = jnp.pad(x_t, ((0, 0), (0, B_pad - B)))

    # Pack all biases into one sublane-aligned column vector (single DMA).
    bias_offsets = []
    total = 0
    for od in out_dims:
        bias_offsets.append(total)
        total += _round_up(od, 8)
    bias_packed = jnp.zeros((max(total, 8), 1), jnp.float32)
    for off, b in zip(bias_offsets, biases):
        bias_packed = bias_packed.at[off:off + b.shape[0], 0].set(
            b.astype(jnp.float32))

    args = [x_t]
    in_specs = [pl.BlockSpec((d_in, TB), lambda i: (0, i))]
    for w in weights:
        w_f32 = w.astype(jnp.float32)                   # (out, in)
        args.append(w_f32)
        # Full-array block, constant index_map -> VMEM-resident across tiles.
        in_specs.append(pl.BlockSpec(w_f32.shape, lambda i: (0, 0)))
    args.append(bias_packed)
    in_specs.append(pl.BlockSpec(bias_packed.shape, lambda i: (0, 0)))

    out_spec = pl.BlockSpec((d_out, TB), lambda i: (0, i))

    kernel = _make_hsic_sparsemax_kernel(
        num_layers, tuple(out_dims), tuple(bias_offsets))

    iw_t = pl.pallas_call(
        kernel,
        out_shape=jax.ShapeDtypeStruct((d_out, B_pad), jnp.float32),
        grid=(B_pad // TB,),
        in_specs=in_specs,
        out_specs=out_spec,
        compiler_params=pltpu.CompilerParams(
            dimension_semantics=("parallel",)),
    )(*args)

    importance_weights = jnp.transpose(iw_t[:, :B])      # back to (B, d_out)
    return importance_weights, sigmas, sigma_y


# ----------------------- pure-JAX reference (for checking) -----------------
def _sparsemax_ref(logits):
    d = logits.shape[-1]
    z = -jnp.sort(-logits, axis=-1)                      # descending
    k = jnp.arange(1, d + 1, dtype=logits.dtype)
    z_cumsum = jnp.cumsum(z, axis=-1)
    support = 1.0 + k * z > z_cumsum
    k_z = jnp.sum(support, axis=-1, keepdims=True).astype(logits.dtype)
    tau = (jnp.sum(jnp.where(support, z, 0.0), axis=-1, keepdims=True)
           - 1.0) / k_z
    return jnp.maximum(logits - tau, 0.0)


def _forward_ref(x, weights, biases):
    h = x
    for i, (w, b) in enumerate(zip(weights, biases)):
        h = jnp.dot(h, w.T, precision=jax.lax.Precision.HIGHEST) + b
        if i < len(weights) - 1:
            h = jax.nn.sigmoid(h)
    return _sparsemax_ref(h)


def init_params(key, input_dim, layers):
    """PyTorch-Linear-style init: W, b ~ U(-1/sqrt(fan_in), +1/sqrt(fan_in)).
    Weights are stored (out, in), matching torch.nn.Linear.weight."""
    dims = [input_dim] + list(layers) + [input_dim]
    weights, biases = [], []
    for i in range(len(dims) - 1):
        key, kw, kb = jax.random.split(key, 3)
        bound = 1.0 / math.sqrt(dims[i])
        W = jax.random.uniform(kw, (dims[i + 1], dims[i]), jnp.float32,
                               minval=-bound, maxval=bound)
        b = jax.random.uniform(kb, (dims[i + 1],), jnp.float32,
                               minval=-bound, maxval=bound)
        weights.append(W)
        biases.append(b)
    return key, weights, biases


if __name__ == "__main__":
    input_dim = 16
    hidden_layers = [32, 16]
    batch = 512           # -> B_pad = 512, TB = 256, 2 grid blocks

    key = jax.random.PRNGKey(0)
    key, weights, biases = init_params(key, input_dim, hidden_layers)

    # sigma parameters (as in the module __init__: sigma_init_X, sigma_init_Y)
    sigmas = jnp.ones((input_dim,), jnp.float32)
    sigma_y = jnp.float32(1.0)

    key, kx = jax.random.split(key)
    x = jax.random.normal(kx, (batch, input_dim), jnp.float32)

    iw, out_sigmas, out_sigma_y = hsic_sparsemax_forward(
        x, weights, biases, sigmas, sigma_y)
    iw = jax.block_until_ready(iw)

    # Correctness: compare against a plain-JAX MLP + sort-based sparsemax.
    iw_ref = _forward_ref(x, weights, biases)
    max_err = float(jnp.max(jnp.abs(iw - iw_ref)))

    # Sparsemax sanity checks: non-negative rows summing to 1.
    row_sums = jnp.sum(iw, axis=-1)
    assert iw.shape == (batch, input_dim)
    assert bool(jnp.all(iw >= 0.0))
    assert bool(jnp.all(jnp.abs(row_sums - 1.0) < 1e-4))
    assert max_err < 2e-3, f"max abs err vs reference = {max_err}"

    print("KERNEL_OK")
</pallas_src>

<mosaic_0001>
module attributes {stable_mosaic.version = 11 : i64} {
  func.func @kernel(%arg0: i32, %arg1: memref<16x256xf32, #tpu.memory_space<vmem>>, %arg2: memref<32x16xf32, #tpu.memory_space<vmem>>, %arg3: memref<16x32xf32, #tpu.memory_space<vmem>>, %arg4: memref<16x16xf32, #tpu.memory_space<vmem>>, %arg5: memref<64x1xf32, #tpu.memory_space<vmem>>, %arg6: memref<16x256xf32, #tpu.memory_space<vmem>>) attributes {dimension_semantics = [#tpu.dimension_semantics<parallel>], iteration_bounds = array<i64: 2>, scalar_prefetch = 0 : i64, scratch_operands = 0 : i64, tpu.core_type = #tpu.core_type<tc>, window_params = [{transform_indices = @transform_0, window_bounds = array<i64: 16, 256>}, {pipeline_mode = #tpu.pipeline_mode<synchronous>, transform_indices = @transform_1, window_bounds = array<i64: 32, 16>}, {pipeline_mode = #tpu.pipeline_mode<synchronous>, transform_indices = @transform_2, window_bounds = array<i64: 16, 32>}, {pipeline_mode = #tpu.pipeline_mode<synchronous>, transform_indices = @transform_3, window_bounds = array<i64: 16, 16>}, {pipeline_mode = #tpu.pipeline_mode<synchronous>, transform_indices = @transform_4, window_bounds = array<i64: 64, 1>}, {transform_indices = @transform_5, window_bounds = array<i64: 16, 256>}]} {
    %c0 = arith.constant 0 : index
    %c0_0 = arith.constant 0 : index
    %0 = vector.load %arg1[%c0, %c0_0] : memref<16x256xf32, #tpu.memory_space<vmem>>, vector<16x256xf32>
    %c0_1 = arith.constant 0 : index
    %c0_2 = arith.constant 0 : index
    %1 = vector.load %arg2[%c0_1, %c0_2] : memref<32x16xf32, #tpu.memory_space<vmem>>, vector<32x16xf32>
    %c0_3 = arith.constant 0 : index
    %c0_4 = arith.constant 0 : index
    %2 = vector.load %arg5[%c0_3, %c0_4] : memref<64x1xf32, #tpu.memory_space<vmem>>, vector<32x1xf32>
    %cst = arith.constant dense<0.000000e+00> : vector<32x256xf32>
    %3 = tpu.matmul %1, %0, %cst {dimension_numbers = #tpu.dot_dimension_numbers<[1], [0], [0], [1], [0, 0, 1, 1], [], []>, precision = #tpu.contract_precision<fp32>} : vector<32x16xf32>, vector<16x256xf32>, vector<32x256xf32> -> vector<32x256xf32>
    %4 = vector.broadcast %2 : vector<32x1xf32> to vector<32x256xf32>
    %5 = arith.addf %3, %4 : vector<32x256xf32>
    %cst_5 = arith.constant 0.000000e+00 : f32
    %6 = vector.broadcast %cst_5 : f32 to vector<32x256xf32>
    %7 = arith.subf %6, %5 : vector<32x256xf32>
    %8 = math.exp %7 : vector<32x256xf32>
    %cst_6 = arith.constant 1.000000e+00 : f32
    %9 = vector.broadcast %cst_6 : f32 to vector<32x256xf32>
    %10 = arith.addf %9, %8 : vector<32x256xf32>
    %cst_7 = arith.constant 1.000000e+00 : f32
    %11 = vector.broadcast %cst_7 : f32 to vector<32x256xf32>
    %12 = arith.divf %11, %10 : vector<32x256xf32>
    %c0_8 = arith.constant 0 : index
    %c0_9 = arith.constant 0 : index
    %13 = vector.load %arg3[%c0_8, %c0_9] : memref<16x32xf32, #tpu.memory_space<vmem>>, vector<16x32xf32>
    %c32 = arith.constant 32 : index
    %c0_10 = arith.constant 0 : index
    %14 = vector.load %arg5[%c32, %c0_10] : memref<64x1xf32, #tpu.memory_space<vmem>>, vector<16x1xf32>
    %cst_11 = arith.constant dense<0.000000e+00> : vector<16x256xf32>
    %15 = tpu.matmul %13, %12, %cst_11 {dimension_numbers = #tpu.dot_dimension_numbers<[1], [0], [0], [1], [0, 0, 1, 1], [], []>, precision = #tpu.contract_precision<fp32>} : vector<16x32xf32>, vector<32x256xf32>, vector<16x256xf32> -> vector<16x256xf32>
    %16 = vector.broadcast %14 : vector<16x1xf32> to vector<16x256xf32>
    %17 = arith.addf %15, %16 : vector<16x256xf32>
    %cst_12 = arith.constant 0.000000e+00 : f32
    %18 = vector.broadcast %cst_12 : f32 to vector<16x256xf32>
    %19 = arith.subf %18, %17 : vector<16x256xf32>
    %20 = math.exp %19 : vector<16x256xf32>
    %cst_13 = arith.constant 1.000000e+00 : f32
    %21 = vector.broadcast %cst_13 : f32 to vector<16x256xf32>
    %22 = arith.addf %21, %20 : vector<16x256xf32>
    %cst_14 = arith.constant 1.000000e+00 : f32
    %23 = vector.broadcast %cst_14 : f32 to vector<16x256xf32>
    %24 = arith.divf %23, %22 : vector<16x256xf32>
    %c0_15 = arith.constant 0 : index
    %c0_16 = arith.constant 0 : index
    %25 = vector.load %arg4[%c0_15, %c0_16] : memref<16x16xf32, #tpu.memory_space<vmem>>, vector<16x16xf32>
    %c48 = arith.constant 48 : index
    %c0_17 = arith.constant 0 : index
    %26 = vector.load %arg5[%c48, %c0_17] : memref<64x1xf32, #tpu.memory_space<vmem>>, vector<16x1xf32>
    %cst_18 = arith.constant dense<0.000000e+00> : vector<16x256xf32>
    %27 = tpu.matmul %25, %24, %cst_18 {dimension_numbers = #tpu.dot_dimension_numbers<[1], [0], [0], [1], [0, 0, 1, 1], [], []>, precision = #tpu.contract_precision<fp32>} : vector<16x16xf32>, vector<16x256xf32>, vector<16x256xf32> -> vector<16x256xf32>
    %28 = vector.broadcast %26 : vector<16x1xf32> to vector<16x256xf32>
    %29 = arith.addf %27, %28 : vector<16x256xf32>
    %cst_19 = arith.constant dense<0xFF800000> : vector<256xf32>
    %30 = vector.multi_reduction <maximumf>, %29, %cst_19 [0] : vector<16x256xf32> to vector<256xf32>
    %31 = vector.shape_cast %30 : vector<256xf32> to vector<1x256xf32>
    %32 = vector.broadcast %31 : vector<1x256xf32> to vector<16x256xf32>
    %33 = arith.subf %29, %32 : vector<16x256xf32>
    %34 = vector.shape_cast %33 : vector<16x256xf32> to vector<1x16x256xf32>
    %35 = vector.shape_cast %33 : vector<16x256xf32> to vector<16x1x256xf32>
    %36 = vector.broadcast %34 : vector<1x16x256xf32> to vector<16x16x256xf32>
    %37 = vector.broadcast %35 : vector<16x1x256xf32> to vector<16x16x256xf32>
    %38 = arith.cmpf oge, %36, %37 : vector<16x16x256xf32>
    %cst_20 = arith.constant 1.000000e+00 : f32
    %cst_21 = arith.constant 0.000000e+00 : f32
    %39 = vector.broadcast %cst_20 : f32 to vector<16x16x256xf32>
    %40 = vector.broadcast %cst_21 : f32 to vector<16x16x256xf32>
    %41 = arith.select %38, %39, %40 : vector<16x16x256xi1>, vector<16x16x256xf32>
    %cst_22 = arith.constant dense<0.000000e+00> : vector<16x256xf32>
    %42 = vector.multi_reduction <add>, %41, %cst_22 [1] : vector<16x16x256xf32> to vector<16x256xf32>
    %43 = vector.shape_cast %33 : vector<16x256xf32> to vector<1x16x256xf32>
    %cst_23 = arith.constant 0.000000e+00 : f32
    %44 = vector.shape_cast %43 : vector<1x16x256xf32> to vector<1x16x256xf32>
    %45 = vector.broadcast %44 : vector<1x16x256xf32> to vector<16x16x256xf32>
    %46 = vector.broadcast %cst_23 : f32 to vector<16x16x256xf32>
    %47 = arith.select %38, %45, %46 : vector<16x16x256xi1>, vector<16x16x256xf32>
    %cst_24 = arith.constant dense<0.000000e+00> : vector<16x256xf32>
    %48 = vector.multi_reduction <add>, %47, %cst_24 [1] : vector<16x16x256xf32> to vector<16x256xf32>
    %49 = arith.mulf %42, %33 : vector<16x256xf32>
    %cst_25 = arith.constant 1.000000e+00 : f32
    %50 = vector.broadcast %cst_25 : f32 to vector<16x256xf32>
    %51 = arith.addf %50, %49 : vector<16x256xf32>
    %52 = arith.cmpf ogt, %51, %48 : vector<16x256xf32>
    %cst_26 = arith.constant 0.000000e+00 : f32
    %53 = vector.broadcast %cst_26 : f32 to vector<16x256xf32>
    %54 = arith.select %52, %42, %53 : vector<16x256xi1>, vector<16x256xf32>
    %cst_27 = arith.constant dense<0xFF800000> : vector<256xf32>
    %55 = vector.multi_reduction <maximumf>, %54, %cst_27 [0] : vector<16x256xf32> to vector<256xf32>
    %56 = vector.shape_cast %55 : vector<256xf32> to vector<1x256xf32>
    %cst_28 = arith.constant 0.000000e+00 : f32
    %57 = vector.broadcast %cst_28 : f32 to vector<16x256xf32>
    %58 = arith.select %52, %33, %57 : vector<16x256xi1>, vector<16x256xf32>
    %cst_29 = arith.constant dense<0.000000e+00> : vector<256xf32>
    %59 = vector.multi_reduction <add>, %58, %cst_29 [0] : vector<16x256xf32> to vector<256xf32>
    %60 = vector.shape_cast %59 : vector<256xf32> to vector<1x256xf32>
    %cst_30 = arith.constant 1.000000e+00 : f32
    %61 = vector.broadcast %cst_30 : f32 to vector<1x256xf32>
    %62 = arith.subf %60, %61 : vector<1x256xf32>
    %63 = arith.divf %62, %56 : vector<1x256xf32>
    %64 = vector.broadcast %63 : vector<1x256xf32> to vector<16x256xf32>
    %65 = arith.subf %33, %64 : vector<16x256xf32>
    %cst_31 = arith.constant 0.000000e+00 : f32
    %66 = vector.broadcast %cst_31 : f32 to vector<16x256xf32>
    %67 = arith.maximumf %65, %66 : vector<16x256xf32>
    %c0_32 = arith.constant 0 : index
    %c0_33 = arith.constant 0 : index
    %68 = vector.load %arg6[%c0_32, %c0_33] : memref<16x256xf32, #tpu.memory_space<vmem>>, vector<16x256xf32>
    tpu.vector_store %arg6[%c0_32, %c0_33], %67 {strides = array<i32>} : memref<16x256xf32, #tpu.memory_space<vmem>>, vector<16x256xf32>,
    return
  }
  func.func @transform_0(%arg0: i32) -> (i32, i32) {
    %c0_i32 = arith.constant 0 : i32
    %c0_i32_0 = arith.constant 0 : i32
    return %c0_i32, %arg0 : i32, i32
  }
  func.func @transform_1(%arg0: i32) -> (i32, i32) {
    %c0_i32 = arith.constant 0 : i32
    %c0_i32_0 = arith.constant 0 : i32
    %c0_i32_1 = arith.constant 0 : i32
    return %c0_i32, %c0_i32_0 : i32, i32
  }
  func.func @transform_2(%arg0: i32) -> (i32, i32) {
    %c0_i32 = arith.constant 0 : i32
    %c0_i32_0 = arith.constant 0 : i32
    %c0_i32_1 = arith.constant 0 : i32
    return %c0_i32, %c0_i32_0 : i32, i32
  }
  func.func @transform_3(%arg0: i32) -> (i32, i32) {
    %c0_i32 = arith.constant 0 : i32
    %c0_i32_0 = arith.constant 0 : i32
    %c0_i32_1 = arith.constant 0 : i32
    return %c0_i32, %c0_i32_0 : i32, i32
  }
  func.func @transform_4(%arg0: i32) -> (i32, i32) {
    %c0_i32 = arith.constant 0 : i32
    %c0_i32_0 = arith.constant 0 : i32
    %c0_i32_1 = arith.constant 0 : i32
    return %c0_i32, %c0_i32_0 : i32, i32
  }
  func.func @transform_5(%arg0: i32) -> (i32, i32) {
    %c0_i32 = arith.constant 0 : i32
    %c0_i32_0 = arith.constant 0 : i32
    return %c0_i32, %arg0 : i32, i32
  }
}

</mosaic_0001>

<bundles_post_ra>
// kernel: tpu_custom_call.1
= control target key start
LH: loop header
LB: loop body
LE: loop exit
PB: predicated region body
PF: predicated region fallthrough
CT: control target
= control target key end

     0   :  { %10 = vsyncpa [#allocation4], 0  ;;  %s5814_s0 = inlined_call_operand.vmem [shape: f32[16,512], index: 0, kind: input, shape index: {}]   ;;  %s5815_s1 = inlined_call_operand.vmem [shape: f32[32,16], index: 1, kind: input, shape index: {}]   ;;  %s5816_s2 = inlined_call_operand.vmem [shape: f32[16,32], index: 2, kind: input, shape index: {}]   ;;  %s5817_s3 = inlined_call_operand.vmem [shape: f32[16,16], index: 3, kind: input, shape index: {}]   ;;  %s5818_s4 = inlined_call_operand.vmem [shape: f32[64,1], index: 4, kind: input, shape index: {}]   ;;  %s5819_s5 = inlined_call_operand.hbm [shape: f32[16,512], index: 5, kind: output, shape index: {}]  }
   0x1   :  { %12 = vsyncpa [#allocation4 + $0x1], 0  ;;  %s3380_s18 = smov 0   ;;  %s3382_s19 = smov 0  }
   0x2   :  { %s3384_s20 = smov 0   ;;  %s3386_s21 = smov 0  }
   0x3 LB: > { %s3163_s22 = sadd.s32 4294967295, %s3343_s21   ;;  %s3164_s23 = sadd.s32 4294967294, %s3343_s21   ;;  %s3343_s21 = sphi %s3386_s21, %s6663_s21   ;;  %s3339_s20 = sphi %s3384_s20, %s6662_s20   ;;  %s3335_s19 = sphi %s3382_s19, %s6661_s19   ;;  %s3331_s18 = sphi %s3380_s18, %s6660_s18  }
   0x4   : > { %s3403_s24 = sadd.s32 1, %s3343_s21   ;;  %s25_s25 = sadd.s32 1, %s3339_s20 }
   0x5   : > { %s22_s26 = ssub.s32 %s3343_s21, %s3403_s24  ;;  %p32_p0 = scmp.ne.s32.totalorder %s3339_s20, %s3335_s19 }
   0x6   : > { %p23_p1 = scmp.eq.s32.totalorder %s22_s26, 0  ;;  %p33_p2 = scmp.eq.s32.totalorder %s3343_s21, 0 }
   0x7   : > { %p146_p3 = scmp.eq.s32.totalorder %s3163_s22, 1  ;;  %p151_p4 = scmp.ne.s32.totalorder %s3335_s19, %s3331_s18 }
   0x8   : > { %s3416_s27 = scalar_select %p23_p1, %s3339_s20, %s25_s25  }
   0x9   : > { %p34_p5 = por %p33_p2, %p32_p0  ;;  %p3418_p6 = por %p146_p3, %p32_p0 }
   0xa   : > { %p152_p7 = scmp.eq.s32.totalorder %s3164_s23, 1  ;;  %p3166_p9 = scmp.ge.s32.totalorder %s3343_s21, 2 }
   0xc   : > { %p3422_p8 = por %p152_p7, %p151_p4  ;;  %180 = sbr.rel (%p3166_p9) target bundleno = 25 (0x19), region = 32 }
  0x11   : > { %183 = sbr.rel (!%p34_p5) target bundleno = 25 (0x19), region = 36  ;;  %s185_s30 = sand.u32 (%p34_p5), 1, %s3339_s20  }
  0x12   : > { %s3180_s6 = sshll.u32 (%p34_p5), %s3343_s21, 4  ;;  %s3167_s7 = sshll.u32 (%p34_p5), %s185_s30, 5 }
  0x13   : > { %s190_s10 = scalar_lea.vmem (%p34_p5), %s5814_s0, %s3180_s6  ;;  %s187_s11 = scalar_lea.vmem (%p34_p5), [#allocation2], %s3167_s7 }
  0x14   : > { %v203_v0 = vld [vmem:[%s190_s10] sm:$0xff] (%p34_p5)  ;;  %v205_v1 = vld [vmem:[%s190_s10 + $0x8] sm:$0xff] (%p34_p5) }
  0x15   : > { %v207_v2 = vld [vmem:[%s190_s10 + $0x20] sm:$0xff] (%p34_p5)  ;;  %204 = vst [vmem:[%s187_s11] sm:$0xff] (%p34_p5), %v203_v0  ;;  %v209_v3 = vld [vmem:[%s190_s10 + $0x28] sm:$0xff] (%p34_p5) }
  0x16   : > { %206 = vst [vmem:[%s187_s11 + $0x8] sm:$0xff] %v205_v1 }
  0x17   : > { %208 = vst [vmem:[%s187_s11 + $0x10] sm:$0xff] %v207_v2 }
  0x18   : > { %210 = vst [vmem:[%s187_s11 + $0x18] sm:$0xff] %v209_v3 }
  0x19 PF: > { %p3170_p10 = scmp.ge.s32.totalorder %s3343_s21, 1  ;;  %p215_p11 = scmp.lt.s32.totalorder %s3343_s21, 3 }
  0x1b   : > { %p216_p12 = pnand %p3170_p10, %p215_p11 }
  0x1d   : > { %219 = sbr.rel (%p216_p12) target bundleno = 1042 (0x412), region = 59 }
  0x22   : > { %s222_s12 = sand.u32 1, %s3335_s19   ;;  %v255_v4 = vld [vmem:[%s5815_s1] sm:$0xff]  ;;  %vm283_vm0 = vcmask 130048   ;;  %v3345_v8 = vmov 0   ;;  %v260_v9 = vld [vmem:[%s5818_s4 + $0x8] sm:$0xff]  ;;  %v257_v17 = vld [vmem:[%s5815_s1 + $0x10] sm:$0xff] }
  0x23   : > { %s3442_s15 = sshll.u32 %s222_s12, 5  ;;  %v285_v7 = vsel %vm283_vm0, %v255_v4, 0  ;;  %3227 = vset.pattern.permute.xlu1 %v3345_v8  ;;  %3226 = vset.pattern.permute.xlu0 %v3345_v8  ;;  %v256_v13 = vld [vmem:[%s5815_s1 + $0x8] sm:$0xff]  ;;  %v262_v18 = vld [vmem:[%s5818_s4 + $0x18] sm:$0xff]  ;;  %v291_v24 = vsel %vm283_vm0, %v257_v17, 0  ;;  %v259_v31 = vld [vmem:[%s5818_s4] sm:$0xff] }
  0x24   : > { %s224_s16 = scalar_lea.vmem [#allocation2], %s3442_s15  ;;  %v3453_v12 = vand.u32 4294901760, %v285_v7  ;;  %270 = vperm.xlu1 %3227, %v260_v9   ;;  %3228 = vset.pattern.permute.xlu2 %v3345_v8  ;;  %v288_v15 = vsel %vm283_vm0, %v256_v13, 0  ;;  %v3489_v32 = vand.u32 4294901760, %v291_v24  ;;  %v258_v44 = vld [vmem:[%s5815_s1 + $0x18] sm:$0xff]  ;;  %v261_v45 = vld [vmem:[%s5818_s4 + $0x10] sm:$0xff] }
  0x25   : > { %v253_v5 = vld [vmem:[%s224_s16 + $0x10] sm:$0xff]  ;;  %v251_v6 = vld [vmem:[%s224_s16] sm:$0xff]  ;;  %v254_v14 = vld [vmem:[%s224_s16 + $0x18] sm:$0xff]  ;;  %v3474_v22 = vand.u32 4294901760, %v288_v15  ;;  %280 = vperm.xlu0 %3226, %v262_v18   ;;  %v294_v50 = vsel %vm283_vm0, %v258_v44, 0  ;;  %vm966_vm4 = vcmask 261120  }
  0x26   : > { %v3449_v10 = vand.u32 4294901760, %v253_v5  ;;  %v3451_v11 = vand.u32 4294901760, %v251_v6  ;;  %v3459_v16 = vand.u32 4294901760, %v254_v14  ;;  %v3472_v21 = vsub.f32 %v285_v7, %v3453_v12  ;;  %v252_v23 = vld [vmem:[%s224_s16 + $0x8] sm:$0xff]  ;;  %v1483_v61 = vld [vmem:[%s5818_s4 + $0x30] sm:$0xff]  ;;  %v1484_v62 = vld [vmem:[%s5818_s4 + $0x38] sm:$0xff] }
  0x27   : > { %v564_v26 = vand.u32 4294901760, %v252_v23  ;;  %v3483_v30 = vsub.f32 %v288_v15, %v3474_v22  ;;  %v3508_v49 = vsub.f32 %v291_v24, %v3489_v32  ;;  %v338_v54 = vand.u32 4294901760, %v294_v50  ;;  %s3181_s25 = sshll.u32 %s3163_s22, 4  ;;  %s248_s7 = scalar_lea.vmem [#allocation3], %s3442_s15 }
  0x28   : > { %v362_v19 = vsub.f32 %v253_v5, %v3449_v10  ;;  %311 = vmatpush.msra.mxu0 %v3449_v10  ;;  %v368_v20 = vsub.f32 %v251_v6, %v3451_v11  ;;  %446 = vmatpush.msra.mxu3 %v3449_v10  ;;  %v614_v25 = vsub.f32 %v254_v14, %v3459_v16  ;;  %v3480_v27 = vand.u32 4294901760, %v3472_v21  ;;  %s3092_s6 = scalar_lea.hbm %s5819_s5, %s3181_s25  ;;  %s3093_s8 = sshll.u32 %s248_s7, 4  ;;  %s3094_s8 = int_to_ptr.vmem [resolvable:$true] %s3093_s8 }
  0x29   : > { %v620_v34 = vsub.f32 %v252_v23, %v564_v26  ;;  %v3495_v38 = vand.u32 4294901760, %v3483_v30  ;;  %v332_v53 = vand.u32 4294901760, %v3508_v49  ;;  %v339_v56 = vsub.f32 %v294_v50, %v338_v54  ;;  %s5781_s22 = sshll.u32 %s3092_s6, 4  ;;  %s3081_s15 = scalar_lea.sflag [#allocation4], %s222_s12  ;;  %s3096_s22 = int_to_ptr.hbm [resolvable:$true] %s5781_s22 }
  0x2a   : > { %406 = vmatpush.msra.mxu2 %v362_v19  ;;  %313 = vmatpush.msra.mxu0 %v3451_v11  ;;  %v363_v28 = vand.u32 4294901760, %v362_v19  ;;  %v369_v29 = vand.u32 4294901760, %v368_v20  ;;  %v615_v33 = vand.u32 4294901760, %v614_v25  ;;  %v317_v35 = vsub.f32 %v3472_v21, %v3480_v27  ;;  %s3295_s9 = sshra.s32 %s3096_s22, 4  ;;  %s3301_s14 = scalar_lea.hbm %s5819_s5, 64  ;;  %s3296_s9 = int_to_ptr.hbm [resolvable:$true] %s3295_s9 }
  0x2b   : > { %448 = vmatpush.msra.mxu3 %v3451_v11  ;;  %v621_v40 = vand.u32 4294901760, %v620_v34  ;;  %v325_v48 = vsub.f32 %v3483_v30, %v3495_v38  ;;  %v333_v55 = vsub.f32 %v3508_v49, %v332_v53  ;;  %v340_v58 = vand.u32 4294901760, %v339_v56  ;;  %s3297_s10 = scalar_lea.hbm %s3296_s9, 32  ;;  %p3302_p2 = scmp.lt.s32.totalorder %s3296_s9, %s5819_s5 }
  0x2c   : > { %409 = vmatpush.msra.mxu2 %v368_v20  ;;  %452 = vmatmul.f32.vlgmr.msra.gmra.mxu3 %v3480_v27  ;;  %v364_v36 = vsub.f32 %v362_v19, %v363_v28  ;;  %v370_v37 = vsub.f32 %v368_v20, %v369_v29  ;;  %v616_v39 = vsub.f32 %v614_v25, %v615_v33  ;;  %v318_v41 = vand.u32 4294901760, %v317_v35  ;;  %p3298_p13 = scmp.ne.s32.totalorder %s3296_s9, %s3297_s10  ;;  %p3303_p3 = scmp.lt.s32.totalorder %s3301_s14, %s3297_s10 }
  0x2d   : > { %412 = vmatmul.f32.vlgmr.msra.gmra.mxu2 %v3472_v21  ;;  %491 = vmatpush.msrb.mxu0 %v363_v28  ;;  %v622_v47 = vsub.f32 %v620_v34, %v621_v40  ;;  %v326_v52 = vand.u32 4294901760, %v325_v48  ;;  %v334_v57 = vand.u32 4294901760, %v333_v55  ;;  %v341_v59 = vsub.f32 %v339_v56, %v340_v58 }
  0x2e   : > { %v365_v42 = vand.u32 4294901760, %v364_v36  ;;  %v371_v43 = vand.u32 4294901760, %v370_v37  ;;  %265 = vperm.xlu1 %3227, %v259_v31   ;;  %563 = vmatpush.msrb.mxu2 %v3459_v16  ;;  %v617_v46 = vand.u32 4294901760, %v616_v39  ;;  %p3299_p0 = pnand %p3298_p13, %p3418_p6  ;;  %p3304_p4 = por %p3303_p3, %p3302_p2 }
  0x2f   : > { %495 = vmatpush.msrb.mxu0 %v369_v29  ;;  %275 = vperm.xlu0 %3226, %v261_v45   ;;  %v623_v51 = vand.u32 4294901760, %v622_v47  ;;  %v342_v60 = vand.u32 4294901760, %v341_v59 }
  0x30   : > { %319 = vmatmul.f32.vlgmr.msra.gmra.mxu0 %v318_v41  ;;  %366 = vmatpush.msra.mxu1 %v365_v42  ;;  %p3300_p1 = pneg %p3299_p0 }
  0x31   : > { %618 = vmatpush.msrb.mxu3 %v617_v46  ;;  %565 = vmatpush.msrb.mxu2 %v564_v26 }
  0x32   : > { %372 = vmatpush.msra.mxu1 %v371_v43  ;;  %658 = vmatpush.msra.mxu0 %v614_v25  ;;  %p3305_p5 = pnand %p3304_p4, %p3300_p1 }
  0x33   : > { %374 = vmatmul.f32.vlgmr.msra.gmra.mxu1 %v3453_v12  ;;  %624 = vmatpush.msrb.mxu3 %v623_v51 }
  0x34   : > { %458 = vmatmul.f32.gmra.mxu3 %v3495_v38  ;;  %528 = vmatpush.msrb.mxu1 %v3449_v10 }
  0x35   : > { %417 = vmatmul.f32.gmra.mxu2 %v3483_v30  ;;  %780 = vmatpush.msra.mxu3 %v3459_v16 }
  0x36   : > { %530 = vmatpush.msrb.mxu1 %v3451_v11  ;;  %743 = vmatpush.msra.mxu2 %v615_v33 }
  0x37   : > { %661 = vmatpush.msra.mxu0 %v620_v34  ;;  %782 = vmatpush.msra.mxu3 %v564_v26 }
  0x38   : > { %698 = vmatpush.msra.mxu1 %v3459_v16  ;;  %327 = vmatmul.f32.gmra.mxu0 %v326_v52 }
  0x39   : > { %747 = vmatpush.msra.mxu2 %v621_v40  ;;  %1487 = vperm.xlu0 %3226, %v1483_v61  }
  0x3a   : > { %700 = vmatpush.msra.mxu1 %v564_v26  ;;  %1492 = vperm.xlu1 %3227, %v1484_v62  }
  0x3b   : > { %378 = vmatmul.f32.gmra.mxu1 %v3474_v22 }
  0x3c   : > { %464 = vmatmul.f32.gmra.mxu3 %v332_v53 }
  0x3d   : > { %422 = vmatmul.f32.gmra.mxu2 %v3508_v49 }
  0x40   : > { %335 = vmatmul.f32.gmra.mxu0 %v334_v57 }
  0x43   : > { %382 = vmatmul.f32.gmra.mxu1 %v3489_v32 }
  0x44   : > { %470 = vmatmul.f32.gmra.mxu3 %v340_v58 }
  0x45   : > { %427 = vmatmul.f32.gmra.mxu2 %v339_v56 }
  0x48   : > { %343 = vmatmul.f32.gmra.mxu0 %v342_v60 }
  0x4b   : > { %386 = vmatmul.f32.gmra.mxu1 %v338_v54 }
  0x4c   : > { %626 = vmatmul.f32.vlgmr.msrb.gmra.mxu3 %v3453_v12 }
  0x4d   : > { %571 = vmatmul.f32.vlgmr.msrb.gmra.mxu2 %v318_v41 }
  0x50   : > { %497 = vmatmul.f32.vlgmr.msrb.gmra.mxu0 %v3453_v12 }
  0x53   : > { %532 = vmatmul.f32.vlgmr.msrb.gmra.mxu1 %v3453_v12 }
  0x54   : > { %630 = vmatmul.f32.gmra.mxu3 %v3474_v22 }
  0x55   : > { %579 = vmatmul.f32.gmra.mxu2 %v326_v52 }
  0x58   : > { %501 = vmatmul.f32.gmra.mxu0 %v3474_v22 }
  0x5b   : > { %536 = vmatmul.f32.gmra.mxu1 %v3474_v22 }
  0x5c   : > { %634 = vmatmul.f32.gmra.mxu3 %v3489_v32 }
  0x5d   : > { %587 = vmatmul.f32.gmra.mxu2 %v334_v57 }
  0x60   : > { %505 = vmatmul.f32.gmra.mxu0 %v3489_v32 }
  0x63   : > { %540 = vmatmul.f32.gmra.mxu1 %v3489_v32 }
  0x64   : > { %638 = vmatmul.f32.gmra.mxu3 %v338_v54 }
  0x65   : > { %595 = vmatmul.f32.gmra.mxu2 %v342_v60 }
  0x68   : > { %509 = vmatmul.f32.gmra.mxu0 %v338_v54 }
  0x6b   : > { %544 = vmatmul.f32.gmra.mxu1 %v338_v54 }
  0x6c   : > { %784 = vmatmul.f32.vlgmr.msra.gmra.mxu3 %v3453_v12 }
  0x6d   : > { %749 = vmatmul.f32.vlgmr.msra.gmra.mxu2 %v3453_v12 }
  0x70   : > { %664 = vmatmul.f32.vlgmr.msra.gmra.mxu0 %v3472_v21 }
  0x73   : > { %704 = vmatmul.f32.vlgmr.msra.gmra.mxu1 %v3480_v27 }
  0x74   : > { %788 = vmatmul.f32.gmra.mxu3 %v3474_v22 }
  0x75   : > { %753 = vmatmul.f32.gmra.mxu2 %v3474_v22 }
  0x78   : > { %669 = vmatmul.f32.gmra.mxu0 %v3483_v30 }
  0x7b   : > { %710 = vmatmul.f32.gmra.mxu1 %v3495_v38 }
  0x7c   : > { %792 = vmatmul.f32.gmra.mxu3 %v3489_v32 }
  0x7d   : > { %757 = vmatmul.f32.gmra.mxu2 %v3489_v32 }
  0x80   : > { %674 = vmatmul.f32.gmra.mxu0 %v3508_v49 }
  0x83   : > { %716 = vmatmul.f32.gmra.mxu1 %v332_v53 }
  0x84   : > { %796 = vmatmul.f32.gmra.mxu3 %v338_v54 }
  0x85   : > { %761 = vmatmul.f32.gmra.mxu2 %v338_v54 }
  0x88   : > { %679 = vmatmul.f32.gmra.mxu0 %v339_v56 }
  0x8b   : > { %722 = vmatmul.f32.gmra.mxu1 %v340_v58 }
  0x96   : > { %v3549_v3 = vpop.permute.xlu1 %270 }
  0x97   : > { %v3554_v14 = vpop.permute.xlu0 %280 }
  0xa0   : > { %v3551_v9 = vpop.permute.xlu1 %265 }
  0xa1   : > { %v3557_v25 = vpop.permute.xlu0 %275 }
  0xad   : > { %v320_v63 = vpop.f32.mrf.mxu0 }
  0xae   : > { %v321_v13 = vadd.f32 %v320_v63, %v3551_v9 }
  0xaf   : > { %v453_v0 = vpop.f32.mrf.mxu3 }
  0xb0   : > { %v375_v1 = vpop.f32.mrf.mxu1  ;;  %v413_v2 = vpop.f32.mrf.mxu2 }
  0xb1   : > { %v376_v15 = vadd.f32 %v375_v1, %v321_v13 }
  0xb3   : > { %v414_v20 = vadd.f32 %v413_v2, %v376_v15 }
  0xb5   : > { %v328_v4 = vpop.f32.mrf.mxu0  ;;  %v454_v22 = vadd.f32 %v453_v0, %v414_v20 }
  0xb6   : > { %v329_v21 = vadd.f32 %v328_v4, %v3549_v3 }
  0xb7   : > { %v459_v5 = vpop.f32.mrf.mxu3 }
  0xb8   : > { %v379_v6 = vpop.f32.mrf.mxu1  ;;  %v418_v7 = vpop.f32.mrf.mxu2 }
  0xb9   : > { %v380_v23 = vadd.f32 %v379_v6, %v329_v21 }
  0xbb   : > { %v419_v30 = vadd.f32 %v418_v7, %v380_v23 }
  0xbd   : > { %v336_v8 = vpop.f32.mrf.mxu0  ;;  %v460_v34 = vadd.f32 %v459_v5, %v419_v30 }
  0xbe   : > { %v337_v31 = vadd.f32 %v336_v8, %v3557_v25 }
  0xbf   : > { %v465_v10 = vpop.f32.mrf.mxu3 }
  0xc0   : > { %v383_v11 = vpop.f32.mrf.mxu1  ;;  %v423_v12 = vpop.f32.mrf.mxu2 }
  0xc1   : > { %v384_v35 = vadd.f32 %v383_v11, %v337_v31 }
  0xc3   : > { %v424_v42 = vadd.f32 %v423_v12, %v384_v35 }
  0xc5   : > { %v344_v16 = vpop.f32.mrf.mxu0  ;;  %v466_v47 = vadd.f32 %v465_v10, %v424_v42 }
  0xc6   : > { %v345_v43 = vadd.f32 %v344_v16, %v3554_v14 }
  0xc7   : > { %v471_v17 = vpop.f32.mrf.mxu3 }
  0xc8   : > { %v387_v18 = vpop.f32.mrf.mxu1  ;;  %v428_v19 = vpop.f32.mrf.mxu2 }
  0xc9   : > { %v388_v48 = vadd.f32 %v387_v18, %v345_v43 }
  0xcb   : > { %v429_v56 = vadd.f32 %v428_v19, %v388_v48 }
  0xcd   : > { %v498_v24 = vpop.f32.mrf.mxu0  ;;  %v472_v60 = vadd.f32 %v471_v17, %v429_v56 }
  0xce   : > { %v499_v26 = vadd.f32 %v498_v24, %v454_v22 }
  0xcf   : > { %v627_v27 = vpop.f32.mrf.mxu3 }
  0xd0   : > { %v533_v28 = vpop.f32.mrf.mxu1  ;;  %v572_v29 = vpop.f32.mrf.mxu2 }
  0xd1   : > { %v534_v32 = vadd.f32 %v533_v28, %v499_v26  ;;  %v573_v6 = vadd.f32 %v572_v29, %v3551_v9 }
  0xd3   : > { %v800_v33 = vsub.f32 0.0, %v534_v32  ;;  %v628_v12 = vadd.f32 %v627_v27, %v573_v6 }
  0xd5   : > { %v808_v36 = vmul.f32 1.442695, %v800_v33  ;;  %v502_v37 = vpop.f32.mrf.mxu0 }
  0xd6   : > { %v503_v38 = vadd.f32 %v502_v37, %v460_v34 }
  0xd7   : > { %3229 = vpow2.f32 %v808_v36  ;;  %v631_v39 = vpop.f32.mrf.mxu3 }
  0xd8   : > { %v537_v40 = vpop.f32.mrf.mxu1  ;;  %v580_v41 = vpop.f32.mrf.mxu2 }
  0xd9   : > { %v538_v44 = vadd.f32 %v537_v40, %v503_v38  ;;  %v581_v23 = vadd.f32 %v580_v41, %v3549_v3 }
  0xdb   : > { %v802_v45 = vsub.f32 0.0, %v538_v44  ;;  %v632_v31 = vadd.f32 %v631_v39, %v581_v23 }
  0xdd   : > { %v3230_v46 = vpop.eup %3229  ;;  %v812_v49 = vmul.f32 1.442695, %v802_v45  ;;  %v506_v50 = vpop.f32.mrf.mxu0 }
  0xde   : > { %v3561_v51 = vadd.f32 1.0, %v3230_v46  ;;  %v507_v52 = vadd.f32 %v506_v50, %v466_v47 }
  0xdf   : > { %3231 = vpow2.f32 %v812_v49  ;;  %v3563_v53 = vpop.f32.mrf.mxu3 }
  0xe0   : > { %v541_v54 = vpop.f32.mrf.mxu1  ;;  %v588_v55 = vpop.f32.mrf.mxu2  ;;  %3233 = vrcp.f32 %v3561_v51  ;;  %v843_v28 = vand.u32 2147483648, %v3561_v51  ;;  %v841_v34 = vand.u32 2147483647, %v3561_v51  ;;  %vm837_vm1 = vweird.f32 %v3561_v51 }
  0xe1   : > { %v542_v57 = vadd.f32 %v541_v54, %v507_v52  ;;  %v589_v36 = vadd.f32 %v588_v55, %v3557_v25  ;;  %v952_v55 = vld [vmem:[%s5816_s2] sm:$0xff] }
  0xe2   : > { %v844_v43 = vor.u32 1.1754944e-38, %v843_v28  ;;  %vm3599_vm3 = vcmp.eq.f32.partialorder %v841_v34, 8.507059e+37 }
  0xe3   : > { %v804_v58 = vsub.f32 0.0, %v542_v57  ;;  %v636_v56 = vadd.f32 %v3563_v53, %v589_v36 }
  0xe5   : > { %v3232_v59 = vpop.eup %3231  ;;  %v816_v61 = vmul.f32 1.442695, %v804_v58  ;;  %v510_v62 = vpop.f32.mrf.mxu0 }
  0xe6   : > { %v3566_v63 = vadd.f32 1.0, %v3232_v59  ;;  %v511_v0 = vadd.f32 %v510_v62, %v472_v60  ;;  %v3573_v5 = vpop.eup %3233 }
  0xe7   : > { %3235 = vpow2.f32 %v816_v61  ;;  %v3568_v1 = vpop.f32.mrf.mxu3  ;;  %v833_v10 = vmul.f32 %v3573_v5, %v3561_v51  ;;  %vm838_vm2 = vweird.f32 %v3573_v5 }
  0xe8   : > { %3237 = vrcp.f32 %v3566_v63  ;;  %v545_v2 = vpop.f32.mrf.mxu1  ;;  %v3571_v4 = vpop.f32.mrf.mxu2  ;;  %v873_v45 = vand.u32 2147483648, %v3566_v63  ;;  %vm867_vm8 = vweird.f32 %v3566_v63  ;;  %v871_v59 = vand.u32 2147483647, %v3566_v63  ;;  %vm3618_vm9 = vmor %vm837_vm1, %vm838_vm2 }
  0xe9   : > { %v546_v7 = vadd.f32 %v545_v2, %v511_v0  ;;  %v834_v9 = vsub.f32 1.0, %v833_v10 }
  0xea   : > { %v874_v60 = vor.u32 1.1754944e-38, %v873_v45  ;;  %vm872_vm13 = vcmp.eq.f32.partialorder %v871_v59, 8.507059e+37 }
  0xeb   : > { %v806_v8 = vsub.f32 0.0, %v546_v7  ;;  %v835_v29 = vmul.f32 %v3573_v5, %v834_v9 }
  0xed   : > { %v3236_v11 = vpop.eup %3235  ;;  %v820_v13 = vmul.f32 1.442695, %v806_v8  ;;  %v665_v15 = vpop.f32.mrf.mxu0  ;;  %v836_v25 = vadd.f32 %v3573_v5, %v835_v29  ;;  %v953_v29 = vld [vmem:[%s5816_s2 + $0x8] sm:$0xff] }
  0xee   : > { %v3578_v16 = vpop.eup %3237  ;;  %v3580_v17 = vadd.f32 1.0, %v3236_v11  ;;  %v666_v19 = vadd.f32 %v665_v15, %v628_v12 }
  0xef   : > { %v863_v18 = vmul.f32 %v3578_v16, %v3566_v63  ;;  %3239 = vpow2.f32 %v820_v13  ;;  %v785_v20 = vpop.f32.mrf.mxu3  ;;  %vm868_vm5 = vweird.f32 %v3578_v16  ;;  %v968_v63 = vsel %vm966_vm4, %v952_v55, 0 }
  0xf0   : > { %3241 = vrcp.f32 %v3580_v17  ;;  %v705_v21 = vpop.f32.mrf.mxu1  ;;  %v750_v22 = vpop.f32.mrf.mxu2  ;;  %v901_v50 = vand.u32 2147483647, %v3580_v17  ;;  %v903_v52 = vand.u32 2147483648, %v3580_v17  ;;  %vm897_vm7 = vweird.f32 %v3580_v17  ;;  %vm3624_vm10 = vmor %vm867_vm8, %vm868_vm5 }
  0xf1   : > { %v706_v24 = vadd.f32 %v705_v21, %v666_v19  ;;  %v864_v26 = vsub.f32 1.0, %v863_v18  ;;  %v840_v8 = vsel %vm3618_vm9, %v3573_v5, %v836_v25  ;;  %v3638_v9 = vand.u32 4294901760, %v968_v63 }
  0xf2   : > { %vm902_vm12 = vcmp.eq.f32.partialorder %v901_v50, 8.507059e+37  ;;  %v904_v51 = vor.u32 1.1754944e-38, %v903_v52 }
  0xf3   : > { %v751_v27 = vadd.f32 %v750_v22, %v706_v24  ;;  %v865_v3 = vmul.f32 %v3578_v16, %v864_v26  ;;  %v845_v26 = vsel %vm3599_vm3, %v844_v43, %v840_v8 }
  0xf4   : > { %v3656_v36 = vand.u32 4294901760, %v845_v26 }
  0xf5   : > { %v3240_v30 = vpop.eup %3239  ;;  %v670_v32 = vpop.f32.mrf.mxu0  ;;  %v786_v33 = vadd.f32 %v785_v20, %v751_v27  ;;  %v866_v54 = vadd.f32 %v3578_v16, %v865_v3 }
  0xf6   : > { %v3242_v35 = vpop.eup %3241  ;;  %v3590_v37 = vadd.f32 1.0, %v3240_v30  ;;  %v671_v40 = vadd.f32 %v670_v32, %v632_v31  ;;  %v3653_v32 = vsub.f32 %v968_v63, %v3638_v9  ;;  %v1041_v55 = vsub.f32 %v845_v26, %v3656_v36 }
  0xf7   : > { %v893_v38 = vmul.f32 %v3242_v35, %v3580_v17  ;;  %v801_v41 = vsub.f32 0.0, %v786_v33  ;;  %v789_v42 = vpop.f32.mrf.mxu3  ;;  %vm898_vm6 = vweird.f32 %v3242_v35  ;;  %v870_v7 = vsel %vm3624_vm10, %v3578_v16, %v866_v54 }
  0xf8   : > { %3243 = vrcp.f32 %v3590_v37  ;;  %v711_v39 = vpop.f32.mrf.mxu1  ;;  %v754_v44 = vpop.f32.mrf.mxu2  ;;  %vm899_vm11 = vmor %vm897_vm7, %vm898_vm6  ;;  %v597_v17 = vadd.f32 %v3571_v4, %v3554_v14  ;;  %v875_v23 = vsel %vm872_vm13, %v874_v60, %v870_v7  ;;  %v931_v5 = vand.u32 2147483647, %v3590_v37 }
  0xf9   : > { %v894_v46 = vsub.f32 1.0, %v893_v38  ;;  %v810_v47 = vmul.f32 1.442695, %v801_v41  ;;  %v712_v48 = vadd.f32 %v711_v39, %v671_v40  ;;  %v933_v24 = vand.u32 2147483648, %v3590_v37 }
  0xfa   : > { %v640_v30 = vadd.f32 %v3568_v1, %v597_v17  ;;  %v3650_v31 = vand.u32 4294901760, %v875_v23  ;;  %vm927_vm15 = vweird.f32 %v3590_v37  ;;  %vm932_vm2 = vcmp.eq.f32.partialorder %v931_v5, 8.507059e+37 }
  0xfb   : > { %v755_v57 = vadd.f32 %v754_v44, %v712_v48  ;;  %v895_v58 = vmul.f32 %v3242_v35, %v894_v46  ;;  %3245 = vpow2.f32 %v810_v47  ;;  %v934_v38 = vor.u32 1.1754944e-38, %v933_v24 }
  0xfc   : > { %v971_v1 = vsel %vm966_vm4, %v953_v29, 0  ;;  %v3665_v25 = vand.u32 4294901760, %v3653_v32 }
  0xfd   : > { %v675_v53 = vpop.f32.mrf.mxu0  ;;  %v790_v62 = vadd.f32 %v789_v42, %v755_v57  ;;  %v896_v0 = vadd.f32 %v3242_v35, %v895_v58  ;;  %v3669_v50 = vand.u32 4294901760, %v971_v1 }
  0xfe   : > { %v3244_v6 = vpop.eup %3243  ;;  %v676_v11 = vadd.f32 %v675_v53, %v636_v56  ;;  %v996_v59 = vsub.f32 %v3653_v32, %v3665_v25 }
  0xff   : > { %v923_v10 = vmul.f32 %v3244_v6, %v3590_v37  ;;  %v803_v12 = vsub.f32 0.0, %v790_v62  ;;  %v793_v13 = vpop.f32.mrf.mxu3  ;;  %v900_v15 = vsel %vm899_vm11, %v3242_v35, %v896_v0  ;;  %vm928_vm14 = vweird.f32 %v3244_v6 }
 0x100   : > { %v717_v18 = vpop.f32.mrf.mxu1  ;;  %v758_v19 = vpop.f32.mrf.mxu2  ;;  %v905_v20 = vsel %vm902_vm12, %v904_v51, %v900_v15  ;;  %vm929_vm1 = vmor %vm927_vm15, %vm928_vm14  ;;  %v1035_v37 = vsub.f32 %v875_v23, %v3650_v31  ;;  %v3683_v62 = vsub.f32 %v971_v1, %v3669_v50  ;;  %v3690_v7 = vand.u32 4294901760, %v996_v59 }
 0x101   : > { %v924_v16 = vsub.f32 1.0, %v923_v10  ;;  %v814_v21 = vmul.f32 1.442695, %v803_v12  ;;  %v718_v22 = vadd.f32 %v717_v18, %v676_v11  ;;  %v3246_v27 = vpop.eup %3245  ;;  %v3644_v28 = vand.u32 4294901760, %v905_v20 }
 0x102   : > { %v3658_v3 = vadd.f32 1.0, %v3246_v27  ;;  %v1036_v53 = vand.u32 4294901760, %v1035_v37 }
 0x103   : > { %3247 = vpow2.f32 %v814_v21  ;;  %v759_v14 = vadd.f32 %v758_v19, %v718_v22  ;;  %v925_v4 = vmul.f32 %v3244_v6, %v924_v16  ;;  %v1029_v43 = vsub.f32 %v905_v20, %v3644_v28 }
 0x104   : > { %3249 = vrcp.f32 %v3658_v3  ;;  %v1037_v12 = vsub.f32 %v1035_v37, %v1036_v53  ;;  %vm852_vm10 = vweird.f32 %v3658_v3 }
 0x105   : > { %v680_v33 = vpop.f32.mrf.mxu0  ;;  %v794_v34 = vadd.f32 %v793_v13, %v759_v14  ;;  %v926_v35 = vadd.f32 %v3244_v6, %v925_v4  ;;  %v1030_v58 = vand.u32 4294901760, %v1029_v43  ;;  %v3694_v13 = vand.u32 4294901760, %v3683_v62 }
 0x106   : > { %v681_v40 = vadd.f32 %v680_v33, %v640_v30  ;;  %v1038_v21 = vand.u32 4294901760, %v1037_v12  ;;  %v955_v33 = vld [vmem:[%s5818_s4 + $0x28] sm:$0xff] }
 0x107   : > { %v805_v41 = vsub.f32 0.0, %v794_v34  ;;  %v930_v42 = vsel %vm929_vm1, %v3244_v6, %v926_v35  ;;  %v797_v54 = vpop.f32.mrf.mxu3  ;;  %v1031_v63 = vsub.f32 %v1029_v43, %v1030_v58  ;;  %v1042_v6 = vand.u32 4294901760, %v1041_v55  ;;  %963 = vperm.xlu2 %3228, %v955_v33  }
 0x108   : > { %v723_v39 = vpop.f32.mrf.mxu1  ;;  %v762_v44 = vpop.f32.mrf.mxu2  ;;  %v935_v45 = vsel %vm932_vm2, %v934_v38, %v930_v42  ;;  %v1004_v22 = vsub.f32 %v3683_v62, %v3694_v13 }
 0x109   : > { %v3248_v46 = vpop.eup %3247  ;;  %v818_v47 = vmul.f32 1.442695, %v805_v41  ;;  %v724_v48 = vadd.f32 %v723_v39, %v681_v40  ;;  %v3667_v49 = vand.u32 4294901760, %v935_v45  ;;  %v1032_v19 = vand.u32 4294901760, %v1031_v63 }
 0x10a   : > { %v3672_v52 = vadd.f32 1.0, %v3248_v46  ;;  %v3687_v51 = vpop.eup %3249  ;;  %v1043_v20 = vsub.f32 %v1041_v55, %v1042_v6  ;;  %v3711_v27 = vand.u32 4294901760, %v1004_v22 }
 0x10b   : > { %3251 = vpow2.f32 %v818_v47  ;;  %v763_v56 = vadd.f32 %v762_v44, %v724_v48  ;;  %986 = vmatpush.msrb.mxu0 %v3667_v49  ;;  %1103 = vmatpush.msrb.mxu3 %v3667_v49  ;;  %v1023_v57 = vsub.f32 %v935_v45, %v3667_v49  ;;  %v848_v16 = vmul.f32 %v3687_v51, %v3658_v3 }
 0x10c   : > { %3253 = vrcp.f32 %v3672_v52  ;;  %v1044_v5 = vand.u32 4294901760, %v1043_v20  ;;  %vm882_vm5 = vweird.f32 %v3672_v52  ;;  %v888_v42 = vand.u32 2147483648, %v3672_v52 }
 0x10d   : > { %v798_v60 = vadd.f32 %v797_v54, %v763_v56  ;;  %988 = vmatpush.msrb.mxu0 %v3644_v28  ;;  %1069 = vmatpush.msrb.mxu2 %v1023_v57  ;;  %v1024_v61 = vand.u32 4294901760, %v1023_v57  ;;  %v849_v26 = vsub.f32 1.0, %v848_v16  ;;  %vm853_vm8 = vweird.f32 %v3687_v51 }
 0x10e   : > { %1105 = vmatpush.msrb.mxu3 %v3644_v28  ;;  %v889_v54 = vor.u32 1.1754944e-38, %v888_v42  ;;  %vm854_vm12 = vmor %vm852_vm10, %vm853_vm8 }
 0x10f   : > { %v807_v0 = vsub.f32 0.0, %v798_v60  ;;  %990 = vmatpush.msrb.mxu0 %v3650_v31  ;;  %1072 = vmatpush.msrb.mxu2 %v1029_v43  ;;  %v1025_v2 = vsub.f32 %v1023_v57, %v1024_v61  ;;  %v850_v35 = vmul.f32 %v3687_v51, %v849_v26 }
 0x110   : > { %1107 = vmatpush.msrb.mxu3 %v3650_v31 }
 0x111   : > { %v3252_v8 = vpop.eup %3251  ;;  %v822_v10 = vmul.f32 1.442695, %v807_v0  ;;  %992 = vmatpush.msrb.mxu0 %v3656_v36  ;;  %1075 = vmatpush.msrb.mxu2 %v1035_v37  ;;  %v1026_v11 = vand.u32 4294901760, %v1025_v2  ;;  %v858_v37 = vand.u32 2147483648, %v3658_v3 }
 0x112   : > { %v3696_v15 = vpop.eup %3253  ;;  %v3698_v17 = vadd.f32 1.0, %v3252_v8  ;;  %1109 = vmatpush.msrb.mxu3 %v3656_v36  ;;  %998 = vmatmul.f32.vlgmr.msrb.gmra.mxu0 %v3690_v7 }
 0x113   : > { %1138 = vmatpush.msra.mxu0 %v1024_v61  ;;  %v878_v18 = vmul.f32 %v3696_v15, %v3672_v52  ;;  %3255 = vpow2.f32 %v822_v10  ;;  %1027 = vmatpush.msrb.mxu1 %v1026_v11  ;;  %vm883_vm3 = vweird.f32 %v3696_v15 }
 0x114   : > { %1078 = vmatpush.msrb.mxu2 %v1041_v55  ;;  %3257 = vrcp.f32 %v3698_v17  ;;  %1113 = vmatmul.f32.vlgmr.msrb.gmra.mxu3 %v3665_v25  ;;  %v918_v38 = vand.u32 2147483648, %v3698_v17  ;;  %v916_v40 = vand.u32 2147483647, %v3698_v17  ;;  %vm912_vm6 = vweird.f32 %v3698_v17  ;;  %vm3738_vm7 = vmor %vm882_vm5, %vm883_vm3 }
 0x115   : > { %1142 = vmatpush.msra.mxu0 %v1030_v58  ;;  %1081 = vmatmul.f32.vlgmr.msrb.gmra.mxu2 %v3653_v32  ;;  %v879_v23 = vsub.f32 1.0, %v878_v18  ;;  %v859_v58 = vor.u32 1.1754944e-38, %v858_v37 }
 0x116   : > { %1033 = vmatpush.msrb.mxu1 %v1032_v19  ;;  %v919_v45 = vor.u32 1.1754944e-38, %v918_v38  ;;  %vm917_vm11 = vcmp.eq.f32.partialorder %v916_v40, 8.507059e+37 }
 0x117   : > { %1146 = vmatpush.msra.mxu0 %v1036_v53  ;;  %v880_v30 = vmul.f32 %v3696_v15, %v879_v23 }
 0x118   : > { %1039 = vmatpush.msrb.mxu1 %v1038_v21 }
 0x119   : > { %1150 = vmatpush.msra.mxu0 %v1042_v6  ;;  %v3256_v24 = vpop.eup %3255  ;;  %v881_v41 = vadd.f32 %v3696_v15, %v880_v30 }
 0x11a   : > { %1045 = vmatpush.msrb.mxu1 %v1044_v5  ;;  %v3258_v14 = vpop.eup %3257  ;;  %v3713_v4 = vadd.f32 1.0, %v3256_v24  ;;  %1006 = vmatmul.f32.gmra.mxu0 %v3711_v27 }
 0x11b   : > { %1047 = vmatmul.f32.vlgmr.msrb.gmra.mxu1 %v3638_v9  ;;  %v908_v29 = vmul.f32 %v3258_v14, %v3698_v17  ;;  %vm913_vm4 = vweird.f32 %v3258_v14  ;;  %v885_v48 = vsel %vm3738_vm7, %v3696_v15, %v881_v41 }
 0x11c   : > { %1173 = vmatpush.msra.mxu1 %v3667_v49  ;;  %3259 = vrcp.f32 %v3713_v4  ;;  %1119 = vmatmul.f32.gmra.mxu3 %v3694_v13  ;;  %vm914_vm9 = vmor %vm912_vm6, %vm913_vm4  ;;  %v954_v49 = vld [vmem:[%s5818_s4 + $0x20] sm:$0xff]  ;;  %v948_v56 = vand.u32 2147483648, %v3713_v4  ;;  %v946_v60 = vand.u32 2147483647, %v3713_v4  ;;  %vm942_vm1 = vweird.f32 %v3713_v4 }
 0x11d   : > { %1086 = vmatmul.f32.gmra.mxu2 %v3683_v62  ;;  %v909_v34 = vsub.f32 1.0, %v908_v29  ;;  %958 = vperm.xlu2 %3228, %v954_v49  }
 0x11e   : > { %1175 = vmatpush.msra.mxu1 %v3644_v28  ;;  %v886_v28 = vand.u32 2147483647, %v3672_v52  ;;  %v949_v63 = vor.u32 1.1754944e-38, %v948_v56  ;;  %vm947_vm3 = vcmp.eq.f32.partialorder %v946_v60, 8.507059e+37  ;;  %v1481_v56 = vld [vmem:[%s5817_s3] sm:$0xff] }
 0x11f   : > { %v910_v1 = vmul.f32 %v3258_v14, %v909_v34 }
 0x120   : > { %1177 = vmatpush.msra.mxu1 %v3650_v31  ;;  %v851_v31 = vadd.f32 %v3687_v51, %v850_v35  ;;  %vm887_vm13 = vcmp.eq.f32.partialorder %v886_v28, 8.507059e+37 }
 0x121   : > { %v911_v43 = vadd.f32 %v3258_v14, %v910_v1  ;;  %v890_v57 = vsel %vm887_vm13, %v889_v54, %v885_v48 }
 0x122   : > { %1179 = vmatpush.msra.mxu1 %v3656_v36  ;;  %v3260_v44 = vpop.eup %3259  ;;  %v856_v36 = vand.u32 2147483647, %v3658_v3  ;;  %1152 = vmatmul.f32.vlgmr.msra.gmra.mxu0 %v3638_v9  ;;  %v855_v3 = vsel %vm854_vm12, %v3687_v51, %v851_v31  ;;  %v1205_v2 = vand.u32 4294901760, %v890_v57 }
 0x123   : > { %1051 = vmatmul.f32.gmra.mxu1 %v3669_v50  ;;  %v938_v46 = vmul.f32 %v3260_v44, %v3713_v4  ;;  %v915_v47 = vsel %vm914_vm9, %v3258_v14, %v911_v43  ;;  %vm943_vm15 = vweird.f32 %v3260_v44 }
 0x124   : > { %v920_v52 = vsel %vm917_vm11, %v919_v45, %v915_v47  ;;  %vm857_vm14 = vcmp.eq.f32.partialorder %v856_v36, 8.507059e+37  ;;  %vm944_vm2 = vmor %vm942_vm1, %vm943_vm15  ;;  %v1251_v12 = vsub.f32 %v890_v57, %v1205_v2 }
 0x125   : > { %v939_v55 = vsub.f32 1.0, %v938_v46  ;;  %v1203_v61 = vand.u32 4294901760, %v920_v52  ;;  %v860_v53 = vsel %vm857_vm14, %v859_v58, %v855_v3 }
 0x126   : > { %v1207_v8 = vand.u32 4294901760, %v860_v53  ;;  %v1252_v20 = vand.u32 4294901760, %v1251_v12 }
 0x127   : > { %v940_v59 = vmul.f32 %v3260_v44, %v939_v55  ;;  %v1245_v51 = vsub.f32 %v920_v52, %v1203_v61 }
 0x128   : > { %v1257_v17 = vsub.f32 %v860_v53, %v1207_v8  ;;  %v1253_v5 = vsub.f32 %v1251_v12, %v1252_v20 }
 0x129   : > { %v941_v0 = vadd.f32 %v3260_v44, %v940_v59  ;;  %v1246_v18 = vand.u32 4294901760, %v1245_v51 }
 0x12a   : > { %1156 = vmatmul.f32.gmra.mxu0 %v3669_v50  ;;  %v1258_v22 = vand.u32 4294901760, %v1257_v17  ;;  %v1254_v14 = vand.u32 4294901760, %v1253_v5 }
 0x12b   : > { %1181 = vmatmul.f32.vlgmr.msra.gmra.mxu1 %v3638_v9  ;;  %v945_v6 = vsel %vm944_vm2, %v3260_v44, %v941_v0  ;;  %v1247_v21 = vsub.f32 %v1245_v51, %v1246_v18 }
 0x12c   : > { %v950_v10 = vsel %vm947_vm3, %v949_v63, %v945_v6  ;;  %v1259_v26 = vsub.f32 %v1257_v17, %v1258_v22 }
 0x12d   : > { %v1201_v11 = vand.u32 4294901760, %v950_v10  ;;  %v1248_v24 = vand.u32 4294901760, %v1247_v21 }
 0x12e   : > { %v1260_v4 = vand.u32 4294901760, %v1259_v26 }
 0x12f   : > { %1202 = vmatpush.msra.mxu2 %v1201_v11  ;;  %1319 = vmatpush.msrb.mxu1 %v1201_v11  ;;  %v1239_v15 = vsub.f32 %v950_v10, %v1201_v11 }
 0x131   : > { %1204 = vmatpush.msra.mxu2 %v1203_v61  ;;  %1285 = vmatpush.msrb.mxu0 %v1239_v15  ;;  %v1240_v19 = vand.u32 4294901760, %v1239_v15 }
 0x132   : > { %1321 = vmatpush.msrb.mxu1 %v1203_v61 }
 0x133   : > { %1185 = vmatmul.f32.gmra.mxu1 %v3669_v50  ;;  %1206 = vmatpush.msra.mxu2 %v1205_v2  ;;  %v1241_v16 = vsub.f32 %v1239_v15, %v1240_v19 }
 0x134   : > { %1288 = vmatpush.msrb.mxu0 %v1245_v51  ;;  %1323 = vmatpush.msrb.mxu1 %v1205_v2 }
 0x135   : > { %1208 = vmatpush.msra.mxu2 %v1207_v8  ;;  %v1242_v23 = vand.u32 4294901760, %v1241_v16 }
 0x136   : > { %1291 = vmatpush.msrb.mxu0 %v1251_v12  ;;  %1325 = vmatpush.msrb.mxu1 %v1207_v8 }
 0x137   : > { %1214 = vmatmul.f32.vlgmr.msra.gmra.mxu2 %v3690_v7  ;;  %1243 = vmatpush.msra.mxu3 %v1242_v23 }
 0x138   : > { %1354 = vmatpush.msrb.mxu2 %v1240_v19  ;;  %1294 = vmatpush.msrb.mxu0 %v1257_v17  ;;  %v1482_v17 = vld [vmem:[%s5817_s3 + $0x8] sm:$0xff] }
 0x139   : > { %1249 = vmatpush.msra.mxu3 %v1248_v24  ;;  %1297 = vmatmul.f32.vlgmr.msrb.gmra.mxu0 %v3653_v32 }
 0x13a   : > { %1358 = vmatpush.msrb.mxu2 %v1246_v18 }
 0x13b   : > { %1255 = vmatpush.msra.mxu3 %v1254_v14  ;;  %1329 = vmatmul.f32.vlgmr.msrb.gmra.mxu1 %v3665_v25 }
 0x13c   : > { %1362 = vmatpush.msrb.mxu2 %v1252_v20 }
 0x13d   : > { %1261 = vmatpush.msra.mxu3 %v1260_v4 }
 0x13e   : > { %1366 = vmatpush.msrb.mxu2 %v1258_v22  ;;  %1263 = vmatmul.f32.vlgmr.msra.gmra.mxu3 %v3638_v9  ;;  %v1499_v22 = vsel %vm283_vm0, %v1482_v17, 0 }
 0x13f   : > { %1222 = vmatmul.f32.gmra.mxu2 %v3711_v27  ;;  %1389 = vmatpush.msrb.mxu3 %v1201_v11 }
 0x141   : > { %1391 = vmatpush.msrb.mxu3 %v1203_v61  ;;  %1302 = vmatmul.f32.gmra.mxu0 %v3683_v62  ;;  %v1496_v61 = vsel %vm283_vm0, %v1481_v56, 0 }
 0x143   : > { %1393 = vmatpush.msrb.mxu3 %v1205_v2  ;;  %1335 = vmatmul.f32.gmra.mxu1 %v3694_v13 }
 0x145   : > { %1395 = vmatpush.msrb.mxu3 %v1207_v8  ;;  %v3788_v8 = vand.u32 4294901760, %v1496_v61 }
 0x146   : > { %1267 = vmatmul.f32.gmra.mxu3 %v3669_v50 }
 0x147   : > { %1368 = vmatmul.f32.vlgmr.msrb.gmra.mxu2 %v3638_v9  ;;  %v3796_v16 = vsub.f32 %v1496_v61, %v3788_v8 }
 0x14e   : > { %1397 = vmatmul.f32.vlgmr.msrb.gmra.mxu3 %v3638_v9 }
 0x14f   : > { %1372 = vmatmul.f32.gmra.mxu2 %v3669_v50 }
 0x156   : > { %1401 = vmatmul.f32.gmra.mxu3 %v3669_v50 }
 0x161   : > { %v3777_v32 = vpop.permute.xlu2 %963 }
 0x177   : > { %v959_v25 = vpop.permute.xlu2 %958 }
 0x18f   : > { %v999_v7 = vpop.f32.mrf.mxu0 }
 0x190   : > { %v1000_v27 = vadd.f32 %v999_v7, %v959_v25 }
 0x197   : > { %v1007_v13 = vpop.f32.mrf.mxu0  ;;  %v1114_v34 = vpop.f32.mrf.mxu3 }
 0x198   : > { %v1048_v62 = vpop.f32.mrf.mxu1  ;;  %v1082_v30 = vpop.f32.mrf.mxu2  ;;  %v1008_v35 = vadd.f32 %v1007_v13, %v3777_v32 }
 0x199   : > { %v1049_v29 = vadd.f32 %v1048_v62, %v1000_v27  ;;  %v3800_v27 = vand.u32 4294901760, %v3796_v16  ;;  %v3802_v62 = vand.u32 4294901760, %v1499_v22 }
 0x19b   : > { %v1083_v33 = vadd.f32 %v1082_v30, %v1049_v29 }
 0x19d   : > { %v1115_v1 = vadd.f32 %v1114_v34, %v1083_v33 }
 0x19f   : > { %v1153_v40 = vpop.f32.mrf.mxu0  ;;  %v1120_v42 = vpop.f32.mrf.mxu3 }
 0x1a0   : > { %v1052_v38 = vpop.f32.mrf.mxu1  ;;  %v1087_v41 = vpop.f32.mrf.mxu2  ;;  %v1154_v28 = vadd.f32 %v1153_v40, %v1115_v1  ;;  %v3808_v40 = vsub.f32 %v1499_v22, %v3802_v62 }
 0x1a1   : > { %v1053_v9 = vadd.f32 %v1052_v38, %v1008_v35 }
 0x1a3   : > { %v1088_v50 = vadd.f32 %v1087_v41, %v1053_v9  ;;  %v1522_v9 = vsub.f32 %v3796_v16, %v3800_v27 }
 0x1a5   : > { %v1121_v31 = vadd.f32 %v1120_v42, %v1088_v50 }
 0x1a7   : > { %v1157_v45 = vpop.f32.mrf.mxu0 }
 0x1a8   : > { %v1182_v43 = vpop.f32.mrf.mxu1  ;;  %v1158_v37 = vadd.f32 %v1157_v45, %v1121_v31  ;;  %v3810_v45 = vand.u32 4294901760, %v1522_v9 }
 0x1a9   : > { %v1183_v39 = vadd.f32 %v1182_v43, %v1154_v28 }
 0x1ab   : > { %v1405_v44 = vsub.f32 0.0, %v1183_v39 }
 0x1ad   : > { %v1409_v36 = vmul.f32 1.442695, %v1405_v44 }
 0x1af   : > { %3261 = vpow2.f32 %v1409_v36  ;;  %v3813_v36 = vand.u32 4294901760, %v3808_v40 }
 0x1b0   : > { %v1186_v46 = vpop.f32.mrf.mxu1 }
 0x1b1   : > { %v1187_v47 = vadd.f32 %v1186_v46, %v1158_v37 }
 0x1b3   : > { %v1407_v48 = vsub.f32 0.0, %v1187_v47 }
 0x1b5   : > { %v3262_v49 = vpop.eup %3261  ;;  %v1413_v54 = vmul.f32 1.442695, %v1407_v48 }
 0x1b6   : > { %v1417_v52 = vadd.f32 1.0, %v3262_v49  ;;  %v1298_v12 = vpop.f32.mrf.mxu0 }
 0x1b8   : > { %3263 = vrcp.f32 %v1417_v52  ;;  %vm1426_vm4 = vweird.f32 %v1417_v52  ;;  %v1432_v0 = vand.u32 2147483648, %v1417_v52  ;;  %v1430_v6 = vand.u32 2147483647, %v1417_v52  ;;  %v1330_v23 = vpop.f32.mrf.mxu1 }
 0x1b9   : > { %3265 = vpow2.f32 %v1413_v54 }
 0x1ba   : > { %v1215_v55 = vpop.f32.mrf.mxu2  ;;  %v1433_v15 = vor.u32 1.1754944e-38, %v1432_v0  ;;  %vm1431_vm7 = vcmp.eq.f32.partialorder %v1430_v6, 8.507059e+37 }
 0x1bb   : > { %v1216_v10 = vadd.f32 %v1215_v55, %v959_v25  ;;  %v1530_v55 = vsub.f32 %v3808_v40, %v3813_v36 }
 0x1bd   : > { %v3820_v61 = vand.u32 4294901760, %v1530_v55 }
 0x1be   : > { %v3264_v3 = vpop.eup %3263  ;;  %v1303_v1 = vpop.f32.mrf.mxu0 }
 0x1bf   : > { %v3266_v57 = vpop.eup %3265  ;;  %v1422_v58 = vmul.f32 %v3264_v3, %v1417_v52  ;;  %vm1427_vm5 = vweird.f32 %v3264_v3 }
 0x1c0   : > { %v1419_v59 = vadd.f32 1.0, %v3266_v57  ;;  %vm3784_vm6 = vmor %vm1426_vm4, %vm1427_vm5  ;;  %v1336_v44 = vpop.f32.mrf.mxu1  ;;  %vm5826_vm4 = vcmask 1040384   ;;  %vm5825_vm5 = vcmask 1041409  }
 0x1c1   : > { %v1423_v60 = vsub.f32 1.0, %v1422_v58  ;;  %v1264_v53 = vpop.f32.mrf.mxu3 }
 0x1c2   : > { %3267 = vrcp.f32 %v1419_v59  ;;  %v1223_v2 = vpop.f32.mrf.mxu2  ;;  %v1265_v18 = vadd.f32 %v1264_v53, %v1216_v10  ;;  %vm1456_vm8 = vweird.f32 %v1419_v59  ;;  %v1462_v24 = vand.u32 2147483648, %v1419_v59 }
 0x1c3   : > { %v1424_v63 = vmul.f32 %v3264_v3, %v1423_v60  ;;  %v1460_v25 = vand.u32 2147483647, %v1419_v59  ;;  %v1224_v29 = vadd.f32 %v1223_v2, %v3777_v32 }
 0x1c4   : > { %v1299_v4 = vadd.f32 %v1298_v12, %v1265_v18  ;;  %v1463_v33 = vor.u32 1.1754944e-38, %v1462_v24 }
 0x1c5   : > { %v1425_v11 = vadd.f32 %v3264_v3, %v1424_v63  ;;  %vm1461_vm10 = vcmp.eq.f32.partialorder %v1460_v25, 8.507059e+37 }
 0x1c6   : > { %v1331_v34 = vadd.f32 %v1330_v23, %v1299_v4 }
 0x1c7   : > { %v1429_v19 = vsel %vm3784_vm6, %v3264_v3, %v1425_v11  ;;  %vm5824_vm6 = vcmask 1042434  }
 0x1c8   : > { %v3268_v20 = vpop.eup %3267  ;;  %v1434_v26 = vsel %vm1431_vm7, %v1433_v15, %v1429_v19  ;;  %vm5823_vm7 = vcmask 1043459  }
 0x1c9   : > { %v1452_v21 = vmul.f32 %v3268_v20, %v1419_v59  ;;  %v1268_v5 = vpop.f32.mrf.mxu3  ;;  %vm1457_vm9 = vweird.f32 %v3268_v20  ;;  %v1517_v13 = vand.u32 4294901760, %v1434_v26 }
 0x1ca   : > { %v1369_v7 = vpop.f32.mrf.mxu2  ;;  %vm1458_vm0 = vmor %vm1456_vm8, %vm1457_vm9  ;;  %v1269_v35 = vadd.f32 %v1268_v5, %v1224_v29  ;;  %vm5822_vm8 = vcmask 1044484   ;;  %vm5821_vm9 = vcmask 1045509  }
 0x1cb   : > { %v1453_v14 = vsub.f32 1.0, %v1452_v21  ;;  %v1370_v41 = vadd.f32 %v1369_v7, %v1331_v34  ;;  %v1557_v50 = vsub.f32 %v1434_v26, %v1517_v13 }
 0x1cc   : > { %v1304_v43 = vadd.f32 %v1303_v1, %v1269_v35 }
 0x1cd   : > { %v1454_v30 = vmul.f32 %v3268_v20, %v1453_v14  ;;  %v1558_v47 = vand.u32 4294901760, %v1557_v50 }
 0x1ce   : > { %v1337_v49 = vadd.f32 %v1336_v44, %v1304_v43 }
 0x1cf   : > { %v1455_v38 = vadd.f32 %v3268_v20, %v1454_v30  ;;  %v1559_v57 = vsub.f32 %v1557_v50, %v1558_v47 }
 0x1d1   : > { %v1459_v28 = vsel %vm1458_vm0, %v3268_v20, %v1455_v38  ;;  %v1398_v42 = vpop.f32.mrf.mxu3  ;;  %v1560_v0 = vand.u32 4294901760, %v1559_v57  ;;  %vm5820_vm0 = vcmask 1046534  }
 0x1d2   : > { %v1464_v32 = vsel %vm1461_vm10, %v1463_v33, %v1459_v28  ;;  %v1399_v39 = vadd.f32 %v1398_v42, %v1370_v41  ;;  %v1373_v48 = vpop.f32.mrf.mxu2  ;;  %vm1925_vm10 = vcmask 1046528  }
 0x1d3   : > { %v1515_v31 = vand.u32 4294901760, %v1464_v32  ;;  %v1374_v3 = vadd.f32 %v1373_v48, %v1337_v49  ;;  %v1488_v48 = vpop.permute.xlu0 %1487 }
 0x1d4   : > { %v1406_v37 = vsub.f32 0.0, %v1399_v39 }
 0x1d5   : > { %1516 = vmatpush.msra.mxu0 %v1515_v31  ;;  %1617 = vmatpush.msra.mxu3 %v1515_v31  ;;  %v1551_v46 = vsub.f32 %v1464_v32, %v1515_v31 }
 0x1d6   : > { %v1411_v52 = vmul.f32 1.442695, %v1406_v37 }
 0x1d7   : > { %1518 = vmatpush.msra.mxu0 %v1517_v13  ;;  %1587 = vmatpush.msra.mxu2 %v1551_v46  ;;  %v1552_v54 = vand.u32 4294901760, %v1551_v46 }
 0x1d8   : > { %1619 = vmatpush.msra.mxu3 %v1517_v13  ;;  %1524 = vmatmul.f32.vlgmr.msra.gmra.mxu0 %v3810_v45  ;;  %3269 = vpow2.f32 %v1411_v52 }
 0x1d9   : > { %1590 = vmatpush.msra.mxu2 %v1557_v50  ;;  %1650 = vmatpush.msrb.mxu0 %v1552_v54  ;;  %v1553_v56 = vsub.f32 %v1551_v46, %v1552_v54  ;;  %v1402_v58 = vpop.f32.mrf.mxu3  ;;  %v1493_v46 = vpop.permute.xlu1 %1492 }
 0x1da   : > { %1593 = vmatmul.f32.vlgmr.msra.gmra.mxu2 %v3796_v16  ;;  %1623 = vmatmul.f32.vlgmr.msra.gmra.mxu3 %v3800_v27  ;;  %v1403_v59 = vadd.f32 %v1402_v58, %v1374_v3 }
 0x1db   : > { %1654 = vmatpush.msrb.mxu0 %v1558_v47  ;;  %v1554_v60 = vand.u32 4294901760, %v1553_v56 }
 0x1dc   : > { %v1408_v53 = vsub.f32 0.0, %v1403_v59 }
 0x1dd   : > { %1555 = vmatpush.msra.mxu1 %v1554_v60 }
 0x1de   : > { %v3270_v2 = vpop.eup %3269  ;;  %v1415_v63 = vmul.f32 1.442695, %v1408_v53 }
 0x1df   : > { %1561 = vmatpush.msra.mxu1 %v1560_v0  ;;  %v1418_v6 = vadd.f32 1.0, %v3270_v2 }
 0x1e0   : > { %1532 = vmatmul.f32.gmra.mxu0 %v3820_v61  ;;  %1563 = vmatmul.f32.vlgmr.msra.gmra.mxu1 %v3788_v8  ;;  %3271 = vpow2.f32 %v1415_v63 }
 0x1e1   : > { %1679 = vmatpush.msrb.mxu1 %v1515_v31  ;;  %3273 = vrcp.f32 %v1418_v6  ;;  %v1447_v17 = vand.u32 2147483648, %v1418_v6  ;;  %v1445_v19 = vand.u32 2147483647, %v1418_v6  ;;  %vm1441_vm12 = vweird.f32 %v1418_v6 }
 0x1e2   : > { %1598 = vmatmul.f32.gmra.mxu2 %v3808_v40  ;;  %1629 = vmatmul.f32.gmra.mxu3 %v3813_v36 }
 0x1e3   : > { %1681 = vmatpush.msrb.mxu1 %v1517_v13  ;;  %v1448_v22 = vor.u32 1.1754944e-38, %v1447_v17  ;;  %vm1446_vm14 = vcmp.eq.f32.partialorder %v1445_v19, 8.507059e+37 }
 0x1e6   : > { %v3272_v51 = vpop.eup %3271 }
 0x1e7   : > { %v3274_v10 = vpop.eup %3273  ;;  %v1420_v11 = vadd.f32 1.0, %v3272_v51 }
 0x1e8   : > { %1567 = vmatmul.f32.gmra.mxu1 %v3802_v62  ;;  %1656 = vmatmul.f32.vlgmr.msrb.gmra.mxu0 %v3788_v8  ;;  %v1437_v12 = vmul.f32 %v3274_v10, %v1418_v6  ;;  %vm1442_vm11 = vweird.f32 %v3274_v10 }
 0x1e9   : > { %3275 = vrcp.f32 %v1420_v11  ;;  %vm1443_vm13 = vmor %vm1441_vm12, %vm1442_vm11  ;;  %v1477_v14 = vand.u32 2147483648, %v1420_v11  ;;  %v1475_v25 = vand.u32 2147483647, %v1420_v11  ;;  %vm1471_vm1 = vweird.f32 %v1420_v11 }
 0x1ea   : > { %v1438_v15 = vsub.f32 1.0, %v1437_v12 }
 0x1eb   : > { %v1478_v30 = vor.u32 1.1754944e-38, %v1477_v14  ;;  %vm1476_vm3 = vcmp.eq.f32.partialorder %v1475_v25, 8.507059e+37 }
 0x1ec   : > { %v1439_v18 = vmul.f32 %v3274_v10, %v1438_v15 }
 0x1ee   : > { %v1440_v20 = vadd.f32 %v3274_v10, %v1439_v18 }
 0x1ef   : > { %v3276_v21 = vpop.eup %3275 }
 0x1f0   : > { %1660 = vmatmul.f32.gmra.mxu0 %v3802_v62  ;;  %1683 = vmatmul.f32.vlgmr.msrb.gmra.mxu1 %v3788_v8  ;;  %v1467_v23 = vmul.f32 %v3276_v21, %v1420_v11  ;;  %v1444_v5 = vsel %vm1443_vm13, %v3274_v10, %v1440_v20  ;;  %vm1472_vm15 = vweird.f32 %v3276_v21 }
 0x1f1   : > { %v1449_v24 = vsel %vm1446_vm14, %v1448_v22, %v1444_v5  ;;  %vm1473_vm2 = vmor %vm1471_vm1, %vm1472_vm15 }
 0x1f2   : > { %v1468_v26 = vsub.f32 1.0, %v1467_v23  ;;  %v1707_v7 = vand.u32 4294901760, %v1449_v24 }
 0x1f4   : > { %v1469_v4 = vmul.f32 %v3276_v21, %v1468_v26  ;;  %v1747_v33 = vsub.f32 %v1449_v24, %v1707_v7 }
 0x1f6   : > { %v1470_v29 = vadd.f32 %v3276_v21, %v1469_v4  ;;  %v1748_v1 = vand.u32 4294901760, %v1747_v33 }
 0x1f8   : > { %1687 = vmatmul.f32.gmra.mxu1 %v3802_v62  ;;  %v1474_v13 = vsel %vm1473_vm2, %v3276_v21, %v1470_v29  ;;  %v1749_v28 = vsub.f32 %v1747_v33, %v1748_v1 }
 0x1f9   : > { %v1479_v34 = vsel %vm1476_vm3, %v1478_v30, %v1474_v13 }
 0x1fa   : > { %v1705_v35 = vand.u32 4294901760, %v1479_v34  ;;  %v1750_v42 = vand.u32 4294901760, %v1749_v28 }
 0x1fc   : > { %1706 = vmatpush.msrb.mxu2 %v1705_v35  ;;  %1807 = vmatpush.msra.mxu1 %v1705_v35  ;;  %v1741_v38 = vsub.f32 %v1479_v34, %v1705_v35 }
 0x1fe   : > { %1708 = vmatpush.msrb.mxu2 %v1707_v7  ;;  %1777 = vmatpush.msra.mxu0 %v1741_v38  ;;  %v1742_v9 = vand.u32 4294901760, %v1741_v38 }
 0x1ff   : > { %1809 = vmatpush.msra.mxu1 %v1707_v7  ;;  %1714 = vmatmul.f32.vlgmr.msrb.gmra.mxu2 %v3810_v45 }
 0x200   : > { %1780 = vmatpush.msra.mxu0 %v1747_v33  ;;  %1840 = vmatpush.msra.mxu2 %v1742_v9  ;;  %v1743_v41 = vsub.f32 %v1741_v38, %v1742_v9 }
 0x201   : > { %1783 = vmatmul.f32.vlgmr.msra.gmra.mxu0 %v3796_v16  ;;  %1813 = vmatmul.f32.vlgmr.msra.gmra.mxu1 %v3800_v27 }
 0x202   : > { %1844 = vmatpush.msra.mxu2 %v1748_v1  ;;  %v1744_v50 = vand.u32 4294901760, %v1743_v41 }
 0x204   : > { %1745 = vmatpush.msrb.mxu3 %v1744_v50 }
 0x206   : > { %1751 = vmatpush.msrb.mxu3 %v1750_v42 }
 0x207   : > { %1722 = vmatmul.f32.gmra.mxu2 %v3820_v61  ;;  %1753 = vmatmul.f32.vlgmr.msrb.gmra.mxu3 %v3788_v8 }
 0x208   : > { %1869 = vmatpush.msra.mxu3 %v1705_v35 }
 0x209   : > { %1788 = vmatmul.f32.gmra.mxu0 %v3808_v40  ;;  %1819 = vmatmul.f32.gmra.mxu1 %v3813_v36 }
 0x20a   : > { %1871 = vmatpush.msra.mxu3 %v1707_v7 }
 0x20f   : > { %1757 = vmatmul.f32.gmra.mxu3 %v3802_v62  ;;  %1846 = vmatmul.f32.vlgmr.msra.gmra.mxu2 %v3788_v8 }
 0x217   : > { %1850 = vmatmul.f32.gmra.mxu2 %v3802_v62  ;;  %1873 = vmatmul.f32.vlgmr.msra.gmra.mxu3 %v3788_v8 }
 0x21f   : > { %1877 = vmatmul.f32.gmra.mxu3 %v3802_v62 }
 0x255   : > { %v1525_v16 = vpop.f32.mrf.mxu0 }
 0x256   : > { %v1526_v52 = vadd.f32 %v1525_v16, %v1488_v48 }
 0x25d   : > { %v1564_v27 = vpop.f32.mrf.mxu1  ;;  %v1594_v32 = vpop.f32.mrf.mxu2 }
 0x25e   : > { %v1533_v43 = vpop.f32.mrf.mxu0  ;;  %v1624_v31 = vpop.f32.mrf.mxu3  ;;  %v1565_v8 = vadd.f32 %v1564_v27, %v1526_v52 }
 0x25f   : > { %v1534_v47 = vadd.f32 %v1533_v43, %v1493_v46 }
 0x260   : > { %v1595_v57 = vadd.f32 %v1594_v32, %v1565_v8 }
 0x262   : > { %v1625_v60 = vadd.f32 %v1624_v31, %v1595_v57 }
 0x265   : > { %v1568_v39 = vpop.f32.mrf.mxu1  ;;  %v1599_v40 = vpop.f32.mrf.mxu2 }
 0x266   : > { %v1657_v44 = vpop.f32.mrf.mxu0  ;;  %v1630_v36 = vpop.f32.mrf.mxu3  ;;  %v1569_v54 = vadd.f32 %v1568_v39, %v1534_v47 }
 0x267   : > { %v1658_v2 = vadd.f32 %v1657_v44, %v1625_v60 }
 0x268   : > { %v1600_v56 = vadd.f32 %v1599_v40, %v1569_v54 }
 0x26a   : > { %v1631_v59 = vadd.f32 %v1630_v36, %v1600_v56 }
 0x26d   : > { %v1684_v45 = vpop.f32.mrf.mxu1 }
 0x26e   : > { %v1661_v49 = vpop.f32.mrf.mxu0  ;;  %v1685_v51 = vadd.f32 %v1684_v45, %v1658_v2 }
 0x26f   : > { %v1662_v61 = vadd.f32 %v1661_v49, %v1631_v59 }
 0x275   : > { %v1688_v55 = vpop.f32.mrf.mxu1 }
 0x276   : > { %v1689_v63 = vadd.f32 %v1688_v55, %v1662_v61 }
 0x278   : > { %v1881_v12 = vmax.f32 %v1685_v51, %v1689_v63 }
 0x27a   : > { %v1882_v20 = vrot.slane %v1881_v12, 4 }
 0x27c   : > { %v1883_v24 = vmax.f32 %v1881_v12, %v1882_v20 }
 0x27e   : > { %v1784_v58 = vpop.f32.mrf.mxu0  ;;  %v1814_v53 = vpop.f32.mrf.mxu1  ;;  %v1884_v29 = vrot.slane %v1883_v24, 2 }
 0x280   : > { %v1885_v34 = vmax.f32 %v1883_v24, %v1884_v29 }
 0x282   : > { %v1715_v37 = vpop.f32.mrf.mxu2  ;;  %v1886_v1 = vrot.slane %v1885_v34, 1 }
 0x283   : > { %v1716_v10 = vadd.f32 %v1715_v37, %v1488_v48 }
 0x284   : > { %v1887_v28 = vmax.f32 %v1885_v34, %v1886_v1 }
 0x286   : > { %v1789_v18 = vpop.f32.mrf.mxu0  ;;  %v1820_v23 = vpop.f32.mrf.mxu1  ;;  %v3843_v16 = vsub.f32 %v1685_v51, %v1887_v28  ;;  %v3847_v32 = vsub.f32 %v1689_v63, %v1887_v28  ;;  %v6070_v51 = vmov 0 }
 0x288   : > { %6017 = vst [vmem:[#allocation6_spill] sm:$0xff] %v3843_v16 }
 0x289   : > { %6019 = vst [vmem:[#allocation8_spill] sm:$0xff] %v3847_v32 }
 0x28a   : > { %v1723_v62 = vpop.f32.mrf.mxu2  ;;  %v1754_v3 = vpop.f32.mrf.mxu3 }
 0x28b   : > { %v1724_v11 = vadd.f32 %v1723_v62, %v1493_v46  ;;  %v1755_v15 = vadd.f32 %v1754_v3, %v1716_v10 }
 0x28d   : > { %v1785_v21 = vadd.f32 %v1784_v58, %v1755_v15 }
 0x28f   : > { %v1815_v26 = vadd.f32 %v1814_v53, %v1785_v21 }
 0x292   : > { %v1758_v0 = vpop.f32.mrf.mxu3  ;;  %v1847_v6 = vpop.f32.mrf.mxu2 }
 0x293   : > { %v1759_v17 = vadd.f32 %v1758_v0, %v1724_v11  ;;  %v1848_v4 = vadd.f32 %v1847_v6, %v1815_v26 }
 0x295   : > { %v1790_v22 = vadd.f32 %v1789_v18, %v1759_v17 }
 0x297   : > { %v1821_v14 = vadd.f32 %v1820_v23, %v1790_v22 }
 0x29a   : > { %v1874_v19 = vpop.f32.mrf.mxu3  ;;  %v1851_v5 = vpop.f32.mrf.mxu2 }
 0x29b   : > { %v1852_v25 = vadd.f32 %v1851_v5, %v1821_v14  ;;  %v1875_v30 = vadd.f32 %v1874_v19, %v1848_v4 }
 0x2a2   : > { %v1878_v7 = vpop.f32.mrf.mxu3 }
 0x2a3   : > { %v1879_v13 = vadd.f32 %v1878_v7, %v1852_v25 }
 0x2a5   : > { %v1888_v33 = vmax.f32 %v1875_v30, %v1879_v13 }
 0x2a7   : > { %v1889_v35 = vrot.slane %v1888_v33, 4 }
 0x2a9   : > { %v1890_v38 = vmax.f32 %v1888_v33, %v1889_v35 }
 0x2ab   : > { %v1891_v9 = vrot.slane %v1890_v38, 2 }
 0x2ad   : > { %v1892_v41 = vmax.f32 %v1890_v38, %v1891_v9 }
 0x2af   : > { %v1893_v50 = vrot.slane %v1892_v41, 1 }
 0x2b1   : > { %v1894_v42 = vmax.f32 %v1892_v41, %v1893_v50 }
 0x2b3   : > { %v3845_v27 = vsub.f32 %v1875_v30, %v1894_v42  ;;  %v3851_v31 = vsub.f32 %v1879_v13, %v1894_v42 }
 0x2b5   : > { %6018 = vst [vmem:[#allocation7_spill] sm:$0xff] %v3845_v27  ;;  %v3857_v36 = vrot.slane %v3845_v27, 7  ;;  %v3869_v62 = vrot.slane %v3851_v31, 7 }
 0x2b6   : > { %6020 = vst [vmem:[#allocation9_spill] sm:$0xff] %v3851_v31 }
 0x2b7   : > { %6021 = vst [vmem:[#allocation10_spill] sm:$0xff] %v3857_v36  ;;  %v1908_v60 = vsel %vm5825_vm5, %v3843_v16, %v3857_v36  ;;  %v1911_v0 = vsel %vm5824_vm6, %v3843_v16, %v3857_v36  ;;  %v1914_v2 = vsel %vm5823_vm7, %v3843_v16, %v3857_v36  ;;  %v3895_v12 = vsel %vm5826_vm4, %v3843_v16, %v3857_v36 }
 0x2b8   : > { %6022 = vst [vmem:[#allocation11_spill] sm:$0xff] %v3869_v62  ;;  %v1909_v15 = vrot.slane %v1908_v60, 1  ;;  %v1917_v17 = vsel %vm5822_vm8, %v3843_v16, %v3857_v36  ;;  %v1912_v18 = vrot.slane %v1911_v0, 2  ;;  %v1915_v19 = vrot.slane %v1914_v2, 3 }
 0x2b9   : > { %v1920_v20 = vsel %vm5821_vm9, %v3843_v16, %v3857_v36  ;;  %v1923_v21 = vsel %vm5820_vm0, %v3843_v16, %v3857_v36  ;;  %v1926_v22 = vsel %vm1925_vm10, %v3857_v36, %v3843_v16  ;;  %v1929_v23 = vsel %vm5825_vm5, %v3847_v32, %v3869_v62 }
 0x2ba   : > { %v1931_v5 = vsel %vm5824_vm6, %v3847_v32, %v3869_v62  ;;  %v1933_v24 = vsel %vm5823_vm7, %v3847_v32, %v3869_v62  ;;  %v1918_v26 = vrot.slane %v1917_v17, 4  ;;  %v1935_v14 = vsel %vm5822_vm8, %v3847_v32, %v3869_v62 }
 0x2bb   : > { %v1937_v4 = vsel %vm5821_vm9, %v3847_v32, %v3869_v62  ;;  %v1939_v25 = vsel %vm5820_vm0, %v3847_v32, %v3869_v62  ;;  %v1921_v7 = vrot.slane %v1920_v20, 5  ;;  %v1924_v29 = vrot.slane %v1923_v21, 6 }
 0x2bc   : > { %v3930_v30 = vsel %vm5826_vm4, %v3847_v32, %v3869_v62  ;;  %v1941_v13 = vsel %vm1925_vm10, %v3869_v62, %v3847_v32  ;;  %v1927_v33 = vrot.slane %v1926_v22, 7  ;;  %v1930_v34 = vrot.slane %v1929_v23, 1 }
 0x2bd   : > { %v1932_v35 = vrot.slane %v1931_v5, 2  ;;  %v1934_v38 = vrot.slane %v1933_v24, 3  ;;  %v1936_v1 = vrot.slane %v1935_v14, 4  ;;  %v1938_v9 = vrot.slane %v1937_v4, 5 }
 0x2be   : > { %v1940_v41 = vrot.slane %v1939_v25, 6  ;;  %v1943_v28 = vperm.slane %v3895_v12, 0  ;;  %v1942_v50 = vrot.slane %v1941_v13, 7  ;;  %v1944_v42 = vperm.slane %v3895_v12, 1 }
 0x2bf   : > { %v3937_v60 = vperm.slane %v1909_v15, 0  ;;  %v3939_v0 = vperm.slane %v1909_v15, 1  ;;  %v3941_v2 = vperm.slane %v1912_v18, 0  ;;  %v3943_v17 = vperm.slane %v1912_v18, 1 }
 0x2c0   : > { %v3945_v20 = vperm.slane %v1915_v19, 0  ;;  %v3947_v21 = vperm.slane %v1915_v19, 1  ;;  %v3949_v22 = vperm.slane %v1918_v26, 0  ;;  %v3951_v23 = vperm.slane %v1918_v26, 1 }
 0x2c1   : > { %6023 = vst [vmem:[#allocation12_spill] sm:$0xff] %v3937_v60  ;;  %v3953_v5 = vperm.slane %v1921_v7, 0  ;;  %v3955_v24 = vperm.slane %v1921_v7, 1  ;;  %v3957_v12 = vperm.slane %v1924_v29, 0  ;;  %v3959_v15 = vperm.slane %v1924_v29, 1 }
 0x2c2   : > { %6024 = vst [vmem:[#allocation13_spill] sm:$0xff] %v3939_v0  ;;  %v3961_v14 = vperm.slane %v1927_v33, 0  ;;  %v3963_v18 = vperm.slane %v1927_v33, 1  ;;  %v1959_v4 = vperm.slane %v3930_v30, 0  ;;  %v1960_v19 = vperm.slane %v3930_v30, 1 }
 0x2c3   : > { %6025 = vst [vmem:[#allocation14_spill] sm:$0xff] %v3941_v2  ;;  %v3967_v25 = vperm.slane %v1930_v34, 0  ;;  %v3969_v26 = vperm.slane %v1930_v34, 1  ;;  %v3971_v13 = vperm.slane %v1932_v35, 0  ;;  %v3973_v7 = vperm.slane %v1932_v35, 1 }
 0x2c4   : > { %6026 = vst [vmem:[#allocation15_spill] sm:$0xff] %v3943_v17  ;;  %v3975_v55 = vperm.slane %v1934_v38, 0  ;;  %v3977_v29 = vperm.slane %v1934_v38, 1  ;;  %v3979_v11 = vperm.slane %v1936_v1, 0  ;;  %v3981_v33 = vperm.slane %v1936_v1, 1 }
 0x2c5   : > { %6027 = vst [vmem:[#allocation16_spill] sm:$0xff] %v3945_v20  ;;  %v3983_v8 = vperm.slane %v1938_v9, 0  ;;  %v3985_v10 = vperm.slane %v1938_v9, 1  ;;  %v3987_v30 = vperm.slane %v1940_v41, 0  ;;  %v3989_v34 = vperm.slane %v1940_v41, 1 }
 0x2c6   : > { %6028 = vst [vmem:[#allocation17_spill] sm:$0xff] %v3947_v21  ;;  %v3991_v54 = vperm.slane %v1942_v50, 0  ;;  %v3993_v35 = vperm.slane %v1942_v50, 1  ;;  %vm3996_vm11 = vcmp.ge.f32.partialorder %v3843_v16, %v1943_v28  ;;  %v6049_v38 = vmov 0 }
 0x2c7   : > { %6029 = vst [vmem:[#allocation18_spill] sm:$0xff] %v3949_v22  ;;  %v6050_v38 = vsel %vm3996_vm11, 4294967295, %v6049_v38  ;;  %vm4001_vm12 = vcmp.ge.f32.partialorder %v3845_v27, %v1944_v42  ;;  %v6052_v1 = vmov 0  ;;  %vm4006_vm13 = vcmp.ge.f32.partialorder %v3847_v32, %v1943_v28 }
 0x2c8   : > { %6030 = vst [vmem:[#allocation19_spill] sm:$0xff] %v3951_v23  ;;  %v6053_v1 = vsel %vm4001_vm12, 4294967295, %v6052_v1  ;;  %v6055_v9 = vmov 0  ;;  %vm4011_vm14 = vcmp.ge.f32.partialorder %v3851_v31, %v1944_v42  ;;  %v6058_v41 = vmov 0 }
 0x2c9   : > { %6031 = vst [vmem:[#allocation20_spill] sm:$0xff] %v3953_v5  ;;  %v6056_v9 = vsel %vm4006_vm13, 4294967295, %v6055_v9  ;;  %v6059_v41 = vsel %vm4011_vm14, 4294967295, %v6058_v41  ;;  %vm5827_vm15 = vcmp.ge.f32.partialorder %v3843_v16, %v3937_v60  ;;  %vm4072_vm8 = vcmp.ge.f32.partialorder %v3843_v16, %v1959_v4 }
 0x2ca   : > { %6032 = vst [vmem:[#allocation21_spill] sm:$0xff] %v3955_v24  ;;  %v6061_v28 = vmov 0  ;;  %vm4077_vm7 = vcmp.ge.f32.partialorder %v3845_v27, %v1960_v19  ;;  %v6064_v50 = vmov 0  ;;  %vm4082_vm5 = vcmp.ge.f32.partialorder %v3847_v32, %v1959_v4 }
 0x2cb   : > { %6033 = vst [vmem:[#allocation22_spill] sm:$0xff] %v3957_v12  ;;  %v6062_v28 = vsel %vm4072_vm8, 4294967295, %v6061_v28  ;;  %v6065_v50 = vsel %vm4077_vm7, 4294967295, %v6064_v50  ;;  %v6067_v42 = vmov 0  ;;  %vm4087_vm0 = vcmp.ge.f32.partialorder %v3851_v31, %v1960_v19 }
 0x2cc   : > { %6034 = vst [vmem:[#allocation23_spill] sm:$0xff] %v3959_v15  ;;  %v6068_v42 = vsel %vm4082_vm5, 4294967295, %v6067_v42  ;;  %v6071_v51 = vsel %vm4087_vm0, 4294967295, %v6070_v51  ;;  %vm2048_vm2 = vcmp.ge.f32.partialorder %v3845_v27, %v3973_v7  ;;  %vm2049_vm1 = vcmp.ge.f32.partialorder %v3847_v32, %v3971_v13 }
 0x2cd   : > { %6035 = vst [vmem:[#allocation24_spill] sm:$0xff] %v3961_v14  ;;  %v5897_v4 = vmov 0.0   ;;  %vm6073_vm9 = vcmp.ge.f32.partialorder %v3845_v27, %v3939_v0  ;;  %vm6074_vm10 = vcmp.ge.f32.partialorder %v3847_v32, %v3937_v60  ;;  %vm6075_vm4 = vcmp.ge.f32.partialorder %v3851_v31, %v3939_v0 }
 0x2ce   : > { %6036 = vst [vmem:[#allocation25_spill] sm:$0xff] %v3963_v18  ;;  %v4118_v19 = vsel %vm3996_vm11, 1.0, %v5897_v4  ;;  %v4123_v52 = vsel %vm4001_vm12, 1.0, %v5897_v4  ;;  %v4128_v6 = vsel %vm4006_vm13, 1.0, %v5897_v4  ;;  %v4133_v49 = vsel %vm4011_vm14, 1.0, %v5897_v4 }
 0x2cf   : > { %6037 = vst [vmem:[#allocation26_spill] sm:$0xff] %v3967_v25  ;;  %v4147_v63 = vsel %vm5827_vm15, 1.0, %v5897_v4  ;;  %v4153_v48 = vsel %vm6073_vm9, 1.0, %v5897_v4  ;;  %v4159_v53 = vsel %vm6074_vm10, 1.0, %v5897_v4  ;;  %v4165_v47 = vsel %vm6075_vm4, 1.0, %v5897_v4 }
 0x2d0   : > { %6038 = vst [vmem:[#allocation27_spill] sm:$0xff] %v3969_v26  ;;  %vm6076_vm10 = vcmp.ge.f32.partialorder %v3843_v16, %v3941_v2  ;;  %vm6077_vm4 = vcmp.ge.f32.partialorder %v3845_v27, %v3943_v17  ;;  %vm6078_vm6 = vcmp.ge.f32.partialorder %v3847_v32, %v3941_v2  ;;  %vm6079_vm3 = vcmp.ge.f32.partialorder %v3851_v31, %v3943_v17 }
 0x2d1   : > { %6039 = vst [vmem:[#allocation28_spill] sm:$0xff] %v3971_v13  ;;  %v4179_v46 = vsel %vm6076_vm10, 1.0, %v5897_v4  ;;  %v4185_v61 = vsel %vm6077_vm4, 1.0, %v5897_v4  ;;  %v2081_v37 = vsel %vm6078_vm6, 1.0, %v5897_v4  ;;  %v2082_v59 = vsel %vm6079_vm3, 1.0, %v5897_v4 }
 0x2d2   : > { %6040 = vst [vmem:[#allocation29_spill] sm:$0xff] %v3973_v7  ;;  %vm5892_vm10 = vcmp.ge.f32.partialorder %v3843_v16, %v3987_v30  ;;  %vm6080_vm6 = vcmp.ge.f32.partialorder %v3843_v16, %v3945_v20  ;;  %vm6081_vm3 = vcmp.ge.f32.partialorder %v3845_v27, %v3947_v21  ;;  %vm6082_vm9 = vcmp.ge.f32.partialorder %v3847_v32, %v3945_v20 }
 0x2d3   : > { %6041 = vst [vmem:[#allocation30_spill] sm:$0xff] %v3975_v55  ;;  %v2083_v45 = vsel %vm6080_vm6, 1.0, %v5897_v4  ;;  %v2084_v58 = vsel %vm6081_vm3, 1.0, %v5897_v4  ;;  %v2085_v44 = vsel %vm6082_vm9, 1.0, %v5897_v4  ;;  %vm6083_vm4 = vcmp.ge.f32.partialorder %v3851_v31, %v3947_v21 }
 0x2d4   : > { %6042 = vst [vmem:[#allocation31_spill] sm:$0xff] %v3977_v29  ;;  %v2086_v57 = vsel %vm6083_vm4, 1.0, %v5897_v4  ;;  %vm6084_vm15 = vcmp.ge.f32.partialorder %v3843_v16, %v3949_v22  ;;  %vm6085_vm6 = vcmp.ge.f32.partialorder %v3845_v27, %v3951_v23  ;;  %vm6086_vm9 = vcmp.ge.f32.partialorder %v3847_v32, %v3949_v22 }
 0x2d5   : > { %6043 = vst [vmem:[#allocation32_spill] sm:$0xff] %v3979_v11  ;;  %v4223_v40 = vsel %vm6084_vm15, 1.0, %v5897_v4  ;;  %v4229_v56 = vsel %vm6085_vm6, 1.0, %v5897_v4  ;;  %v4235_v39 = vsel %vm6086_vm9, 1.0, %v5897_v4  ;;  %vm6087_vm4 = vcmp.ge.f32.partialorder %v3851_v31, %v3951_v23 }
 0x2d6   : > { %6044 = vst [vmem:[#allocation33_spill] sm:$0xff] %v3981_v33  ;;  %v4241_v3 = vsel %vm6087_vm4, 1.0, %v5897_v4  ;;  %vm6088_vm15 = vcmp.ge.f32.partialorder %v3843_v16, %v3953_v5  ;;  %vm6089_vm3 = vcmp.ge.f32.partialorder %v3845_v27, %v3955_v24  ;;  %vm6090_vm6 = vcmp.ge.f32.partialorder %v3847_v32, %v3953_v5 }
 0x2d7   : > { %6045 = vst [vmem:[#allocation34_spill] sm:$0xff] %v3983_v8  ;;  %v4247_v43 = vsel %vm6088_vm15, 1.0, %v5897_v4  ;;  %v4253_v62 = vsel %vm6089_vm3, 1.0, %v5897_v4  ;;  %v4259_v36 = vsel %vm6090_vm6, 1.0, %v5897_v4  ;;  %vm6091_vm9 = vcmp.ge.f32.partialorder %v3851_v31, %v3955_v24 }
 0x2d8   : > { %6046 = vst [vmem:[#allocation35_spill] sm:$0xff] %v3985_v10  ;;  %v4265_v23 = vsel %vm6091_vm9, 1.0, %v5897_v4  ;;  %vm6092_vm4 = vcmp.ge.f32.partialorder %v3843_v16, %v3957_v12  ;;  %vm6093_vm15 = vcmp.ge.f32.partialorder %v3845_v27, %v3959_v15  ;;  %vm6094_vm3 = vcmp.ge.f32.partialorder %v3847_v32, %v3957_v12 }
 0x2d9   : > { %6047 = vst [vmem:[#allocation36_spill] sm:$0xff] %v3987_v30  ;;  %v4271_v22 = vsel %vm6092_vm4, 1.0, %v5897_v4  ;;  %v4277_v21 = vsel %vm6093_vm15, 1.0, %v5897_v4  ;;  %v4283_v5 = vsel %vm6094_vm3, 1.0, %v5897_v4  ;;  %vm6095_vm6 = vcmp.ge.f32.partialorder %v3851_v31, %v3959_v15 }
 0x2da   : > { %6048 = vst [vmem:[#allocation37_spill] sm:$0xff] %v3989_v34  ;;  %v4289_v24 = vsel %vm6095_vm6, 1.0, %v5897_v4  ;;  %vm6096_vm9 = vcmp.ge.f32.partialorder %v3843_v16, %v3961_v14  ;;  %vm6097_vm4 = vcmp.ge.f32.partialorder %v3845_v27, %v3963_v18  ;;  %vm6098_vm15 = vcmp.ge.f32.partialorder %v3847_v32, %v3961_v14 }
 0x2db   : > { %6051 = vst [vmem:[#allocation38_spill] sm:$0xff] %v6050_v38  ;;  %v4295_v20 = vsel %vm6096_vm9, 1.0, %v5897_v4  ;;  %v4301_v17 = vsel %vm6097_vm4, 1.0, %v5897_v4  ;;  %v4307_v12 = vsel %vm6098_vm15, 1.0, %v5897_v4  ;;  %vm6099_vm3 = vcmp.ge.f32.partialorder %v3851_v31, %v3963_v18 }
 0x2dc   : > { %6054 = vst [vmem:[#allocation39_spill] sm:$0xff] %v6053_v1  ;;  %v4313_v15 = vsel %vm6099_vm3, 1.0, %v5897_v4  ;;  %v4318_v2 = vsel %vm4072_vm8, 1.0, %v5897_v4  ;;  %v4323_v0 = vsel %vm4077_vm7, 1.0, %v5897_v4  ;;  %v4328_v14 = vsel %vm4082_vm5, 1.0, %v5897_v4 }
 0x2dd   : > { %6057 = vst [vmem:[#allocation40_spill] sm:$0xff] %v6056_v9  ;;  %v4333_v18 = vsel %vm4087_vm0, 1.0, %v5897_v4  ;;  %vm6100_vm6 = vcmp.ge.f32.partialorder %v3843_v16, %v3967_v25  ;;  %vm6101_vm9 = vcmp.ge.f32.partialorder %v3845_v27, %v3969_v26  ;;  %vm6103_vm4 = vcmp.ge.f32.partialorder %v3847_v32, %v3967_v25 }
 0x2de   : > { %6060 = vst [vmem:[#allocation41_spill] sm:$0xff] %v6059_v41  ;;  %vm6104_vm15 = vcmp.ge.f32.partialorder %v3851_v31, %v3969_v26  ;;  %vm6106_vm3 = vcmp.ge.f32.partialorder %v3843_v16, %v3971_v13  ;;  %v4369_v41 = vsel %vm2048_vm2, 1.0, %v5897_v4  ;;  %v4375_v25 = vsel %vm2049_vm1, 1.0, %v5897_v4 }
 0x2df   : > { %6063 = vst [vmem:[#allocation42_spill] sm:$0xff] %v6062_v28  ;;  %v4339_v28 = vsel %vm6100_vm6, 1.0, %v5897_v4  ;;  %v4363_v60 = vsel %vm6106_vm3, 1.0, %v5897_v4  ;;  %vm6110_vm6 = vcmp.ge.f32.partialorder %v3851_v31, %v3973_v7  ;;  %vm6118_vm3 = vcmp.ge.f32.partialorder %v3851_v31, %v3977_v29 }
 0x2e0   : > { %6066 = vst [vmem:[#allocation43_spill] sm:$0xff] %v6065_v50  ;;  %v4345_v50 = vsel %vm6101_vm9, 1.0, %v5897_v4  ;;  %v4381_v26 = vsel %vm6110_vm6, 1.0, %v5897_v4  ;;  %vm6112_vm9 = vcmp.ge.f32.partialorder %v3843_v16, %v3975_v55  ;;  %v4405_v7 = vsel %vm6118_vm3, 1.0, %v5897_v4 }
 0x2e1   : > { %6069 = vst [vmem:[#allocation44_spill] sm:$0xff] %v6068_v42  ;;  %v4351_v42 = vsel %vm6103_vm4, 1.0, %v5897_v4  ;;  %v4387_v9 = vsel %vm6112_vm9, 1.0, %v5897_v4  ;;  %vm6114_vm4 = vcmp.ge.f32.partialorder %v3845_v27, %v3977_v29  ;;  %vm6120_vm6 = vcmp.ge.f32.partialorder %v3843_v16, %v3979_v11 }
 0x2e2   : > { %6072 = vst [vmem:[#allocation45_spill] sm:$0xff] %v6071_v51  ;;  %v4357_v51 = vsel %vm6104_vm15, 1.0, %v5897_v4  ;;  %v4393_v1 = vsel %vm6114_vm4, 1.0, %v5897_v4  ;;  %vm6116_vm15 = vcmp.ge.f32.partialorder %v3847_v32, %v3975_v55  ;;  %v4411_v38 = vsel %vm6120_vm6, 1.0, %v5897_v4 }
 0x2e3   : > { %6102 = vst [vmem:[#allocation46_spill] sm:$0xff] %v4345_v50  ;;  %v4399_v13 = vsel %vm6116_vm15, 1.0, %v5897_v4  ;;  %vm6122_vm9 = vcmp.ge.f32.partialorder %v3845_v27, %v3981_v33  ;;  %vm6124_vm4 = vcmp.ge.f32.partialorder %v3847_v32, %v3979_v11  ;;  %vm6126_vm15 = vcmp.ge.f32.partialorder %v3851_v31, %v3981_v33 }
 0x2e4   : > { %6105 = vst [vmem:[#allocation47_spill] sm:$0xff] %v4357_v51  ;;  %v4423_v55 = vsel %vm6124_vm4, 1.0, %v5897_v4  ;;  %v4429_v29 = vsel %vm6126_vm15, 1.0, %v5897_v4  ;;  %vm6128_vm3 = vcmp.ge.f32.partialorder %v3843_v16, %v3983_v8  ;;  %vm6130_vm6 = vcmp.ge.f32.partialorder %v3845_v27, %v3985_v10 }
 0x2e5   : > { %6107 = vst [vmem:[#allocation48_spill] sm:$0xff] %v4363_v60  ;;  %vm6134_vm4 = vcmp.ge.f32.partialorder %v3851_v31, %v3985_v10  ;;  %vm6137_vm15 = vcmp.ge.f32.partialorder %v3845_v27, %v3989_v34 }
 0x2e6   : > { %6108 = vst [vmem:[#allocation49_spill] sm:$0xff] %v4369_v41  ;;  %v4453_v33 = vsel %vm6134_vm4, 1.0, %v5897_v4  ;;  %vm2068_vm4 = vcmp.ge.f32.partialorder %v3845_v27, %v3993_v35 }
 0x2e7   : > { %6109 = vst [vmem:[#allocation50_spill] sm:$0xff] %v4375_v25 }
 0x2e8   : > { %6111 = vst [vmem:[#allocation51_spill] sm:$0xff] %v4381_v26 }
 0x2e9   : > { %6113 = vst [vmem:[#allocation52_spill] sm:$0xff] %v4387_v9 }
 0x2ea   : > { %6115 = vst [vmem:[#allocation53_spill] sm:$0xff] %v4393_v1  ;;  %v4417_v1 = vsel %vm6122_vm9, 1.0, %v5897_v4  ;;  %vm6132_vm9 = vcmp.ge.f32.partialorder %v3847_v32, %v3983_v8 }
 0x2eb   : > { %6117 = vst [vmem:[#allocation54_spill] sm:$0xff] %v4399_v13  ;;  %v4447_v11 = vsel %vm6132_vm9, 1.0, %v5897_v4  ;;  %vm2067_vm9 = vcmp.ge.f32.partialorder %v3843_v16, %v3991_v54 }
 0x2ec   : > { %6119 = vst [vmem:[#allocation55_spill] sm:$0xff] %v4405_v7 }
 0x2ed   : > { %6121 = vst [vmem:[#allocation56_spill] sm:$0xff] %v4411_v38  ;;  %v4435_v38 = vsel %vm6128_vm3, 1.0, %v5897_v4  ;;  %vm6139_vm3 = vcmp.ge.f32.partialorder %v3847_v32, %v3987_v30  ;;  %v2135_v30 = vadd.f32 %v4128_v6, %v4118_v19 }
 0x2ee   : > { %6123 = vst [vmem:[#allocation57_spill] sm:$0xff] %v4417_v1  ;;  %v4441_v1 = vsel %vm6130_vm6, 1.0, %v5897_v4  ;;  %v4471_v8 = vsel %vm6139_vm3, 1.0, %v5897_v4  ;;  %vm6141_vm6 = vcmp.ge.f32.partialorder %v3851_v31, %v3989_v34  ;;  %v2142_v34 = vadd.f32 %v4133_v49, %v4123_v52 }
 0x2ef   : > { %6125 = vst [vmem:[#allocation58_spill] sm:$0xff] %v4423_v55  ;;  %v4477_v10 = vsel %vm6141_vm6, 1.0, %v5897_v4 }
 0x2f0   : > { %6127 = vst [vmem:[#allocation59_spill] sm:$0xff] %v4429_v29  ;;  %v2143_v29 = vrot.slane %v2142_v34, 4 }
 0x2f1   : > { %6129 = vst [vmem:[#allocation60_spill] sm:$0xff] %v4435_v38  ;;  %v4459_v38 = vsel %vm5892_vm10, 1.0, %v5897_v4  ;;  %vm2070_vm10 = vcmp.ge.f32.partialorder %v3851_v31, %v3993_v35 }
 0x2f2   : > { %6131 = vst [vmem:[#allocation61_spill] sm:$0xff] %v4441_v1  ;;  %v4465_v1 = vsel %vm6137_vm15, 1.0, %v5897_v4  ;;  %vm2069_vm15 = vcmp.ge.f32.partialorder %v3847_v32, %v3991_v54  ;;  %v2149_v4 = vadd.f32 %v4159_v53, %v4147_v63  ;;  %v2144_v9 = vadd.f32 %v2143_v29, %v2142_v34 }
 0x2f3   : > { %6133 = vst [vmem:[#allocation62_spill] sm:$0xff] %v4447_v11  ;;  %v2136_v11 = vrot.slane %v2135_v30, 4 }
 0x2f4   : > { %6135 = vst [vmem:[#allocation63_spill] sm:$0xff] %v4453_v33  ;;  %v2184_v33 = vadd.f32 %v2086_v57, %v2084_v58  ;;  %v2150_v55 = vrot.slane %v2149_v4, 4 }
 0x2f5   : > { %6136 = vst [vmem:[#allocation64_spill] sm:$0xff] %v4459_v38  ;;  %v2177_v38 = vadd.f32 %v2085_v44, %v2083_v45  ;;  %v2137_v52 = vadd.f32 %v2136_v11, %v2135_v30  ;;  %v6143_v30 = vmov 0.0  }
 0x2f6   : > { %6138 = vst [vmem:[#allocation65_spill] sm:$0xff] %v4465_v1  ;;  %v2163_v1 = vadd.f32 %v2081_v37, %v4179_v46  ;;  %v2185_v49 = vrot.slane %v2184_v33, 4  ;;  %v2151_v53 = vadd.f32 %v2150_v55, %v2149_v4  ;;  %v4509_v34 = vsel %vm2067_vm9, 1.0, %v6143_v30 }
 0x2f7   : > { %6140 = vst [vmem:[#allocation66_spill] sm:$0xff] %v4471_v8  ;;  %v2170_v8 = vadd.f32 %v2082_v59, %v4185_v61  ;;  %v2178_v13 = vrot.slane %v2177_v38, 4  ;;  %v2138_v46 = vrot.slane %v2137_v52, 2  ;;  %v2145_v59 = vrot.slane %v2144_v9, 2 }
 0x2f8   : > { %6142 = vst [vmem:[#allocation67_spill] sm:$0xff] %v4477_v10  ;;  %v2156_v10 = vadd.f32 %v4165_v47, %v4153_v48  ;;  %v2164_v6 = vrot.slane %v2163_v1, 4  ;;  %v2186_v37 = vadd.f32 %v2185_v49, %v2184_v33  ;;  %v2152_v44 = vrot.slane %v2151_v53, 2 }
 0x2f9   : > { %v2171_v19 = vrot.slane %v2170_v8, 4  ;;  %v2179_v48 = vadd.f32 %v2178_v13, %v2177_v38  ;;  %v2139_v25 = vadd.f32 %v2138_v46, %v2137_v52  ;;  %v2146_v60 = vadd.f32 %v2145_v59, %v2144_v9 }
 0x2fa   : > { %v2157_v7 = vrot.slane %v2156_v10, 4  ;;  %v2165_v26 = vadd.f32 %v2164_v6, %v2163_v1  ;;  %v2187_v41 = vrot.slane %v2186_v37, 2  ;;  %v2153_v51 = vadd.f32 %v2152_v44, %v2151_v53 }
 0x2fb   : > { %v2172_v47 = vadd.f32 %v2171_v19, %v2170_v8  ;;  %v2180_v61 = vrot.slane %v2179_v48, 2  ;;  %v2140_v13 = vrot.slane %v2139_v25, 1  ;;  %v4521_v38 = vsel %vm2069_vm15, 1.0, %v6143_v30 }
 0x2fc   : > { %v2158_v63 = vadd.f32 %v2157_v7, %v2156_v10  ;;  %v2166_v57 = vrot.slane %v2165_v26, 2  ;;  %v4503_v8 = vadd.f32 %v2187_v41, %v2186_v37  ;;  %v2147_v7 = vrot.slane %v2146_v60, 1 }
 0x2fd   : > { %v2173_v58 = vrot.slane %v2172_v47, 2  ;;  %v4501_v10 = vadd.f32 %v2180_v61, %v2179_v48  ;;  %v2154_v29 = vrot.slane %v2153_v51, 1  ;;  %v4527_v1 = vsel %vm2070_vm10, 1.0, %v6143_v30 }
 0x2fe   : > { %v2159_v45 = vrot.slane %v2158_v63, 2  ;;  %v4497_v11 = vadd.f32 %v2166_v57, %v2165_v26  ;;  %v4515_v26 = vsel %vm2068_vm4, 1.0, %v6143_v30  ;;  %v2189_v6 = vrot.slane %v4503_v8, 1 }
 0x2ff   : > { %v4499_v55 = vadd.f32 %v2173_v58, %v2172_v47  ;;  %v2182_v4 = vrot.slane %v4501_v10, 1  ;;  %v4533_v19 = vadd.f32 %v2140_v13, %v2139_v25  ;;  %v4535_v49 = vadd.f32 %v2147_v7, %v2146_v60 }
 0x300   : > { %v2160_v50 = vadd.f32 %v2159_v45, %v2158_v63  ;;  %v2168_v9 = vrot.slane %v4497_v11, 1  ;;  %v4537_v52 = vadd.f32 %v2154_v29, %v2153_v51  ;;  %v2191_v63 = vadd.f32 %v4235_v39, %v4223_v40 }
 0x301   : > { %v2175_v41 = vrot.slane %v4499_v55, 1  ;;  %6144 = vst [vmem:[#allocation68_spill] sm:$0xff] %v4533_v19  ;;  %v2198_v47 = vadd.f32 %v4241_v3, %v4229_v56  ;;  %v2205_v48 = vadd.f32 %v4259_v36, %v4247_v43  ;;  %v2212_v37 = vadd.f32 %v4265_v23, %v4253_v62 }
 0x302   : > { %v2161_v33 = vrot.slane %v2160_v50, 1  ;;  %6145 = vst [vmem:[#allocation69_spill] sm:$0xff] %v4535_v49  ;;  %v2219_v60 = vadd.f32 %v4283_v5, %v4271_v22  ;;  %v2226_v51 = vadd.f32 %v4289_v24, %v4277_v21  ;;  %v2233_v25 = vadd.f32 %v4307_v12, %v4295_v20  ;;  %v6287_v49 = vld [vmem:[#allocation35_spill] sm:$0xff] }
 0x303   : > { %6146 = vst [vmem:[#allocation70_spill] sm:$0xff] %v4537_v52  ;;  %v2240_v39 = vadd.f32 %v4313_v15, %v4301_v17  ;;  %v2192_v40 = vrot.slane %v2191_v63, 4  ;;  %v2199_v3 = vrot.slane %v2198_v47, 4  ;;  %v2206_v56 = vrot.slane %v2205_v48, 4 }
 0x304   : > { %v4539_v53 = vadd.f32 %v2161_v33, %v2160_v50  ;;  %v2213_v50 = vrot.slane %v2212_v37, 4  ;;  %v2220_v43 = vrot.slane %v2219_v60, 4  ;;  %v2227_v36 = vrot.slane %v2226_v51, 4 }
 0x305   : > { %v2234_v46 = vrot.slane %v2233_v25, 4  ;;  %v2241_v62 = vrot.slane %v2240_v39, 4  ;;  %v2193_v23 = vadd.f32 %v2192_v40, %v2191_v63  ;;  %v2200_v59 = vadd.f32 %v2199_v3, %v2198_v47 }
 0x306   : > { %6147 = vst [vmem:[#allocation71_spill] sm:$0xff] %v4539_v53  ;;  %v2207_v22 = vadd.f32 %v2206_v56, %v2205_v48  ;;  %v2214_v5 = vadd.f32 %v2213_v50, %v2212_v37  ;;  %v2221_v44 = vadd.f32 %v2220_v43, %v2219_v60  ;;  %v2228_v21 = vadd.f32 %v2227_v36, %v2226_v51  ;;  %v6284_v53 = vld [vmem:[#allocation34_spill] sm:$0xff] }
 0x307   : > { %v2235_v24 = vadd.f32 %v2234_v46, %v2233_v25  ;;  %v2242_v45 = vadd.f32 %v2241_v62, %v2240_v39  ;;  %v2194_v20 = vrot.slane %v2193_v23, 2  ;;  %v2201_v12 = vrot.slane %v2200_v59, 2 }
 0x308   : > { %v2208_v57 = vrot.slane %v2207_v22, 2  ;;  %v2215_v17 = vrot.slane %v2214_v5, 2  ;;  %v2222_v15 = vrot.slane %v2221_v44, 2  ;;  %v2229_v58 = vrot.slane %v2228_v21, 2 }
 0x309   : > { %v2236_v61 = vrot.slane %v2235_v24, 2  ;;  %v2243_v13 = vrot.slane %v2242_v45, 2  ;;  %v2195_v7 = vadd.f32 %v2194_v20, %v2193_v23  ;;  %v2202_v29 = vadd.f32 %v2201_v12, %v2200_v59  ;;  %v6162_v20 = vld [vmem:[#allocation52_spill] sm:$0xff]  ;;  %v6163_v12 = vld [vmem:[#allocation54_spill] sm:$0xff] }
 0x30a   : > { %v2209_v33 = vadd.f32 %v2208_v57, %v2207_v22  ;;  %v2216_v30 = vadd.f32 %v2215_v17, %v2214_v5  ;;  %v4557_v63 = vadd.f32 %v2222_v15, %v2221_v44  ;;  %v4559_v47 = vadd.f32 %v2229_v58, %v2228_v21  ;;  %v6158_v22 = vld [vmem:[#allocation48_spill] sm:$0xff]  ;;  %v6159_v5 = vld [vmem:[#allocation50_spill] sm:$0xff]  ;;  %v6160_v21 = vld [vmem:[#allocation49_spill] sm:$0xff] }
 0x30b   : > { %v4561_v48 = vadd.f32 %v2236_v61, %v2235_v24  ;;  %v4563_v37 = vadd.f32 %v2243_v13, %v2242_v45  ;;  %v2196_v60 = vrot.slane %v2195_v7, 1  ;;  %v2203_v51 = vrot.slane %v2202_v29, 1  ;;  %v6161_v24 = vld [vmem:[#allocation51_spill] sm:$0xff]  ;;  %v6164_v17 = vld [vmem:[#allocation53_spill] sm:$0xff] }
 0x30c   : > { %v2210_v25 = vrot.slane %v2209_v33, 1  ;;  %v2217_v39 = vrot.slane %v2216_v30, 1  ;;  %v4566_v40 = vadd.f32 %v2168_v9, %v4497_v11  ;;  %v4569_v3 = vadd.f32 %v2175_v41, %v4499_v55 }
 0x30d   : > { %v4572_v56 = vadd.f32 %v2182_v4, %v4501_v10  ;;  %v4575_v50 = vadd.f32 %v2189_v6, %v4503_v8  ;;  %v2224_v43 = vrot.slane %v4557_v63, 1  ;;  %v2231_v36 = vrot.slane %v4559_v47, 1  ;;  %v6156_v4 = vld [vmem:[#allocation46_spill] sm:$0xff]  ;;  %v6157_v6 = vld [vmem:[#allocation47_spill] sm:$0xff] }
 0x30e   : > { %6148 = vst [vmem:[#allocation72_spill] sm:$0xff] %v4566_v40  ;;  %v2238_v46 = vrot.slane %v4561_v48, 1  ;;  %v2245_v62 = vrot.slane %v4563_v37, 1  ;;  %v4581_v23 = vadd.f32 %v2196_v60, %v2195_v7  ;;  %v4583_v11 = vadd.f32 %v2203_v51, %v2202_v29 }
 0x30f   : > { %6149 = vst [vmem:[#allocation73_spill] sm:$0xff] %v4569_v3  ;;  %v4585_v55 = vadd.f32 %v2210_v25, %v2209_v33  ;;  %v4587_v9 = vadd.f32 %v2217_v39, %v2216_v30  ;;  %v2247_v10 = vadd.f32 %v4328_v14, %v4318_v2  ;;  %v2254_v8 = vadd.f32 %v4333_v18, %v4323_v0  ;;  %v6165_v2 = vld [vmem:[#allocation55_spill] sm:$0xff]  ;;  %v6277_v3 = vld [vmem:[#allocation33_spill] sm:$0xff] }
 0x310   : > { %6150 = vst [vmem:[#allocation74_spill] sm:$0xff] %v4572_v56  ;;  %v2261_v41 = vadd.f32 %v4351_v42, %v4339_v28  ;;  %v2268_v59 = vadd.f32 %v6157_v6, %v6156_v4  ;;  %v2275_v44 = vadd.f32 %v6159_v5, %v6158_v22  ;;  %v2282_v45 = vadd.f32 %v6161_v24, %v6160_v21 }
 0x311   : > { %6151 = vst [vmem:[#allocation75_spill] sm:$0xff] %v4575_v50  ;;  %v2289_v57 = vadd.f32 %v6163_v12, %v6162_v20  ;;  %v2296_v14 = vadd.f32 %v6165_v2, %v6164_v17  ;;  %v2248_v15 = vrot.slane %v2247_v10, 4  ;;  %v2255_v0 = vrot.slane %v2254_v8, 4  ;;  %v6274_v50 = vld [vmem:[#allocation32_spill] sm:$0xff] }
 0x312   : > { %6152 = vst [vmem:[#allocation76_spill] sm:$0xff] %v4581_v23  ;;  %v2262_v18 = vrot.slane %v2261_v41, 4  ;;  %v2269_v58 = vrot.slane %v2268_v59, 4  ;;  %v2276_v28 = vrot.slane %v2275_v44, 4  ;;  %v2283_v42 = vrot.slane %v2282_v45, 4 }
 0x313   : > { %6153 = vst [vmem:[#allocation77_spill] sm:$0xff] %v4583_v11  ;;  %v2290_v61 = vrot.slane %v2289_v57, 4  ;;  %v2297_v13 = vrot.slane %v2296_v14, 4  ;;  %v2249_v7 = vadd.f32 %v2248_v15, %v2247_v10  ;;  %v2256_v29 = vadd.f32 %v2255_v0, %v2254_v8  ;;  %v6267_v11 = vld [vmem:[#allocation31_spill] sm:$0xff] }
 0x314   : > { %6154 = vst [vmem:[#allocation78_spill] sm:$0xff] %v4585_v55  ;;  %v2263_v33 = vadd.f32 %v2262_v18, %v2261_v41  ;;  %v2270_v30 = vadd.f32 %v2269_v58, %v2268_v59  ;;  %v2277_v60 = vadd.f32 %v2276_v28, %v2275_v44  ;;  %v2284_v51 = vadd.f32 %v2283_v42, %v2282_v45 }
 0x315   : > { %6155 = vst [vmem:[#allocation79_spill] sm:$0xff] %v4587_v9  ;;  %v2291_v25 = vadd.f32 %v2290_v61, %v2289_v57  ;;  %v2298_v39 = vadd.f32 %v2297_v13, %v2296_v14  ;;  %v2250_v4 = vrot.slane %v2249_v7, 2  ;;  %v2257_v6 = vrot.slane %v2256_v29, 2 }
 0x316   : > { %v2264_v22 = vrot.slane %v2263_v33, 2  ;;  %v2271_v5 = vrot.slane %v2270_v30, 2  ;;  %v2278_v21 = vrot.slane %v2277_v60, 2  ;;  %v2285_v24 = vrot.slane %v2284_v51, 2 }
 0x317   : > { %v2292_v20 = vrot.slane %v2291_v25, 2  ;;  %v2299_v12 = vrot.slane %v2298_v39, 2  ;;  %v2251_v17 = vadd.f32 %v2250_v4, %v2249_v7  ;;  %v2258_v2 = vadd.f32 %v2257_v6, %v2256_v29  ;;  %v6182_v4 = vld [vmem:[#allocation64_spill] sm:$0xff]  ;;  %v6183_v6 = vld [vmem:[#allocation66_spill] sm:$0xff] }
 0x318   : > { %v2265_v9 = vadd.f32 %v2264_v22, %v2263_v33  ;;  %v2272_v55 = vadd.f32 %v2271_v5, %v2270_v30  ;;  %v4605_v10 = vadd.f32 %v2278_v21, %v2277_v60  ;;  %v4607_v8 = vadd.f32 %v2285_v24, %v2284_v51  ;;  %v6178_v33 = vld [vmem:[#allocation60_spill] sm:$0xff]  ;;  %v6179_v30 = vld [vmem:[#allocation62_spill] sm:$0xff]  ;;  %v6180_v51 = vld [vmem:[#allocation61_spill] sm:$0xff] }
 0x319   : > { %v4609_v41 = vadd.f32 %v2292_v20, %v2291_v25  ;;  %v4611_v59 = vadd.f32 %v2299_v12, %v2298_v39  ;;  %v2252_v44 = vrot.slane %v2251_v17, 1  ;;  %v2259_v45 = vrot.slane %v2258_v2, 1  ;;  %v6181_v25 = vld [vmem:[#allocation63_spill] sm:$0xff]  ;;  %v6184_v5 = vld [vmem:[#allocation65_spill] sm:$0xff] }
 0x31a   : > { %v2266_v57 = vrot.slane %v2265_v9, 1  ;;  %v2273_v14 = vrot.slane %v2272_v55, 1  ;;  %v4614_v15 = vadd.f32 %v2224_v43, %v4557_v63  ;;  %v4617_v0 = vadd.f32 %v2231_v36, %v4559_v47  ;;  %v6175_v36 = vld [vmem:[#allocation58_spill] sm:$0xff] }
 0x31b   : > { %v4620_v18 = vadd.f32 %v2238_v46, %v4561_v48  ;;  %v4623_v58 = vadd.f32 %v2245_v62, %v4563_v37  ;;  %v2280_v28 = vrot.slane %v4605_v10, 1  ;;  %v2287_v42 = vrot.slane %v4607_v8, 1  ;;  %v6174_v48 = vld [vmem:[#allocation56_spill] sm:$0xff]  ;;  %v6176_v46 = vld [vmem:[#allocation57_spill] sm:$0xff]  ;;  %v6177_v62 = vld [vmem:[#allocation59_spill] sm:$0xff] }
 0x31c   : > { %6166 = vst [vmem:[#allocation46_spill] sm:$0xff] %v4614_v15  ;;  %v2294_v61 = vrot.slane %v4609_v41, 1  ;;  %v2301_v13 = vrot.slane %v4611_v59, 1  ;;  %v4629_v7 = vadd.f32 %v2252_v44, %v2251_v17  ;;  %v4631_v63 = vadd.f32 %v2259_v45, %v2258_v2 }
 0x31d   : > { %6167 = vst [vmem:[#allocation47_spill] sm:$0xff] %v4617_v0  ;;  %v4633_v47 = vadd.f32 %v2266_v57, %v2265_v9  ;;  %v4635_v43 = vadd.f32 %v2273_v14, %v2272_v55  ;;  %v2303_v37 = vadd.f32 %v6175_v36, %v6174_v48  ;;  %v2310_v29 = vadd.f32 %v6177_v62, %v6176_v46  ;;  %v6185_v9 = vld [vmem:[#allocation67_spill] sm:$0xff]  ;;  %v6264_v0 = vld [vmem:[#allocation30_spill] sm:$0xff] }
 0x31e   : > { %6168 = vst [vmem:[#allocation48_spill] sm:$0xff] %v4620_v18  ;;  %v2317_v60 = vadd.f32 %v6179_v30, %v6178_v33  ;;  %v2324_v39 = vadd.f32 %v6181_v25, %v6180_v51  ;;  %v2331_v22 = vadd.f32 %v6183_v6, %v6182_v4  ;;  %v2338_v21 = vadd.f32 %v6185_v9, %v6184_v5 }
 0x31f   : > { %6169 = vst [vmem:[#allocation50_spill] sm:$0xff] %v4623_v58  ;;  %v2345_v55 = vadd.f32 %v4521_v38, %v4509_v34  ;;  %v2352_v24 = vadd.f32 %v4527_v1, %v4515_v26  ;;  %v2304_v20 = vrot.slane %v2303_v37, 4  ;;  %v2311_v12 = vrot.slane %v2310_v29, 4  ;;  %v6259_v58 = vld [vmem:[#allocation29_spill] sm:$0xff] }
 0x320   : > { %6170 = vst [vmem:[#allocation49_spill] sm:$0xff] %v4629_v7  ;;  %v2318_v17 = vrot.slane %v2317_v60, 4  ;;  %v2325_v2 = vrot.slane %v2324_v39, 4  ;;  %v2332_v44 = vrot.slane %v2331_v22, 4  ;;  %v2339_v45 = vrot.slane %v2338_v21, 4 }
 0x321   : > { %6171 = vst [vmem:[#allocation51_spill] sm:$0xff] %v4631_v63  ;;  %v2346_v57 = vrot.slane %v2345_v55, 4  ;;  %v2353_v14 = vrot.slane %v2352_v24, 4  ;;  %v2305_v48 = vadd.f32 %v2304_v20, %v2303_v37  ;;  %v2312_v36 = vadd.f32 %v2311_v12, %v2310_v29 }
 0x322   : > { %6172 = vst [vmem:[#allocation52_spill] sm:$0xff] %v4633_v47  ;;  %v2319_v46 = vadd.f32 %v2318_v17, %v2317_v60  ;;  %v2326_v62 = vadd.f32 %v2325_v2, %v2324_v39  ;;  %v2333_v33 = vadd.f32 %v2332_v44, %v2331_v22  ;;  %v2340_v30 = vadd.f32 %v2339_v45, %v2338_v21 }
 0x323   : > { %6173 = vst [vmem:[#allocation54_spill] sm:$0xff] %v4635_v43  ;;  %v2347_v51 = vadd.f32 %v2346_v57, %v2345_v55  ;;  %v2354_v25 = vadd.f32 %v2353_v14, %v2352_v24  ;;  %v2306_v34 = vrot.slane %v2305_v48, 2  ;;  %v2313_v38 = vrot.slane %v2312_v36, 2 }
 0x324   : > { %v2320_v4 = vrot.slane %v2319_v46, 2  ;;  %v2327_v26 = vrot.slane %v2326_v62, 2  ;;  %v2334_v1 = vrot.slane %v2333_v33, 2  ;;  %v2341_v6 = vrot.slane %v2340_v30, 2 }
 0x325   : > { %v2348_v5 = vrot.slane %v2347_v51, 2  ;;  %v2355_v9 = vrot.slane %v2354_v25, 2  ;;  %v2307_v43 = vadd.f32 %v2306_v34, %v2305_v48  ;;  %v2314_v47 = vadd.f32 %v2313_v38, %v2312_v36 }
 0x326   : > { %v2321_v63 = vadd.f32 %v2320_v4, %v2319_v46  ;;  %v2328_v7 = vadd.f32 %v2327_v26, %v2326_v62  ;;  %v2335_v37 = vadd.f32 %v2334_v1, %v2333_v33  ;;  %v2342_v29 = vadd.f32 %v2341_v6, %v2340_v30  ;;  %v6208_v4 = vld [vmem:[#allocation14_spill] sm:$0xff]  ;;  %v6210_v1 = vld [vmem:[#allocation15_spill] sm:$0xff] }
 0x327   : > { %v2349_v60 = vadd.f32 %v2348_v5, %v2347_v51  ;;  %v2356_v39 = vadd.f32 %v2355_v9, %v2354_v25  ;;  %v2308_v22 = vrot.slane %v2307_v43, 1  ;;  %v2315_v21 = vrot.slane %v2314_v47, 1  ;;  %v6204_v51 = vld [vmem:[#allocation13_spill] sm:$0xff] }
 0x328   : > { %v2322_v55 = vrot.slane %v2321_v63, 1  ;;  %v2329_v24 = vrot.slane %v2328_v7, 1  ;;  %v2336_v20 = vrot.slane %v2335_v37, 1  ;;  %v2343_v12 = vrot.slane %v2342_v29, 1 }
 0x329   : > { %v2350_v17 = vrot.slane %v2349_v60, 1  ;;  %v2357_v2 = vrot.slane %v2356_v39, 1  ;;  %v4654_v44 = vadd.f32 %v2280_v28, %v4605_v10  ;;  %v4657_v45 = vadd.f32 %v2287_v42, %v4607_v8 }
 0x32a   : > { %v4660_v57 = vadd.f32 %v2294_v61, %v4609_v41  ;;  %v4663_v14 = vadd.f32 %v2301_v13, %v4611_v59  ;;  %v4665_v48 = vadd.f32 %v2308_v22, %v2307_v43  ;;  %v4667_v36 = vadd.f32 %v2315_v21, %v2314_v47  ;;  %v6202_v43 = vld [vmem:[#allocation12_spill] sm:$0xff]  ;;  %v6228_v13 = vld [vmem:[#allocation21_spill] sm:$0xff] }
 0x32b   : > { %6186 = vst [vmem:[#allocation53_spill] sm:$0xff] %v4654_v44  ;;  %v4669_v46 = vadd.f32 %v2322_v55, %v2321_v63  ;;  %v4671_v62 = vadd.f32 %v2329_v24, %v2328_v7  ;;  %v4673_v33 = vadd.f32 %v2336_v20, %v2335_v37  ;;  %v4675_v10 = vadd.f32 %v2343_v12, %v2342_v29  ;;  %v6214_v37 = vld [vmem:[#allocation16_spill] sm:$0xff]  ;;  %v6220_v55 = vld [vmem:[#allocation18_spill] sm:$0xff]  ;;  %v6222_v20 = vld [vmem:[#allocation19_spill] sm:$0xff] }
 0x32c   : > { %6187 = vst [vmem:[#allocation55_spill] sm:$0xff] %v4657_v45  ;;  %v4677_v8 = vadd.f32 %v2350_v17, %v2349_v60  ;;  %v4679_v28 = vadd.f32 %v2357_v2, %v2356_v39  ;;  %v2359_v59 = vsel %vm3996_vm11, %v3843_v16, 0.0  ;;  %v2360_v61 = vsel %vm4001_vm12, %v3845_v27, 0.0  ;;  %v6216_v60 = vld [vmem:[#allocation17_spill] sm:$0xff]  ;;  %v6226_v41 = vld [vmem:[#allocation20_spill] sm:$0xff] }
 0x32d   : > { %6188 = vst [vmem:[#allocation56_spill] sm:$0xff] %v4660_v57  ;;  %v2361_v7 = vsel %vm4006_vm13, %v3847_v32, 0.0  ;;  %v2362_v47 = vsel %vm4011_vm14, %v3851_v31, 0.0  ;;  %vm6203_vm3 = vcmp.ge.f32.partialorder %v3843_v16, %v6202_v43  ;;  %vm6205_vm11 = vcmp.ge.f32.partialorder %v3845_v27, %v6204_v51 }
 0x32e   : > { %6189 = vst [vmem:[#allocation58_spill] sm:$0xff] %v4663_v14  ;;  %v2363_v30 = vsel %vm6203_vm3, %v3843_v16, 0.0  ;;  %v2364_v25 = vsel %vm6205_vm11, %v3845_v27, 0.0  ;;  %vm6206_vm12 = vcmp.ge.f32.partialorder %v3847_v32, %v6202_v43  ;;  %vm6207_vm13 = vcmp.ge.f32.partialorder %v3851_v31, %v6204_v51 }
 0x32f   : > { %6190 = vst [vmem:[#allocation57_spill] sm:$0xff] %v4665_v48  ;;  %v2365_v34 = vsel %vm6206_vm12, %v3847_v32, 0.0  ;;  %v2366_v38 = vsel %vm6207_vm13, %v3851_v31, 0.0  ;;  %vm6209_vm14 = vcmp.ge.f32.partialorder %v3843_v16, %v6208_v4  ;;  %vm6211_vm6 = vcmp.ge.f32.partialorder %v3845_v27, %v6210_v1 }
 0x330   : > { %6191 = vst [vmem:[#allocation59_spill] sm:$0xff] %v4667_v36  ;;  %v2367_v26 = vsel %vm6209_vm14, %v3843_v16, 0.0  ;;  %v2368_v6 = vsel %vm6211_vm6, %v3845_v27, 0.0  ;;  %vm6212_vm3 = vcmp.ge.f32.partialorder %v3847_v32, %v6208_v4  ;;  %vm6213_vm11 = vcmp.ge.f32.partialorder %v3851_v31, %v6210_v1  ;;  %v6232_v4 = vld [vmem:[#allocation22_spill] sm:$0xff] }
 0x331   : > { %6192 = vst [vmem:[#allocation60_spill] sm:$0xff] %v4669_v46  ;;  %v2369_v5 = vsel %vm6212_vm3, %v3847_v32, 0.0  ;;  %v2370_v9 = vsel %vm6213_vm11, %v3851_v31, 0.0  ;;  %vm6215_vm12 = vcmp.ge.f32.partialorder %v3843_v16, %v6214_v37  ;;  %vm6217_vm13 = vcmp.ge.f32.partialorder %v3845_v27, %v6216_v60 }
 0x332   : > { %6193 = vst [vmem:[#allocation62_spill] sm:$0xff] %v4671_v62  ;;  %v2371_v29 = vsel %vm6215_vm12, %v3843_v16, 0.0  ;;  %v2372_v39 = vsel %vm6217_vm13, %v3845_v27, 0.0  ;;  %vm6218_vm14 = vcmp.ge.f32.partialorder %v3847_v32, %v6214_v37  ;;  %vm6219_vm6 = vcmp.ge.f32.partialorder %v3851_v31, %v6216_v60  ;;  %v6234_v37 = vld [vmem:[#allocation23_spill] sm:$0xff] }
 0x333   : > { %6194 = vst [vmem:[#allocation61_spill] sm:$0xff] %v4673_v33  ;;  %v2373_v22 = vsel %vm6218_vm14, %v3847_v32, 0.0  ;;  %v2374_v21 = vsel %vm6219_vm6, %v3851_v31, 0.0  ;;  %vm6221_vm3 = vcmp.ge.f32.partialorder %v3843_v16, %v6220_v55  ;;  %vm6223_vm11 = vcmp.ge.f32.partialorder %v3845_v27, %v6222_v20  ;;  %v6250_v33 = vld [vmem:[#allocation27_spill] sm:$0xff] }
 0x334   : > { %6195 = vst [vmem:[#allocation63_spill] sm:$0xff] %v4675_v10  ;;  %v4745_v24 = vsel %vm6221_vm3, %v3843_v16, 0.0  ;;  %v4751_v12 = vsel %vm6223_vm11, %v3845_v27, 0.0  ;;  %vm6224_vm12 = vcmp.ge.f32.partialorder %v3847_v32, %v6220_v55  ;;  %vm6225_vm13 = vcmp.ge.f32.partialorder %v3851_v31, %v6222_v20 }
 0x335   : > { %6196 = vst [vmem:[#allocation64_spill] sm:$0xff] %v4677_v8  ;;  %v4757_v17 = vsel %vm6224_vm12, %v3847_v32, 0.0  ;;  %v4763_v2 = vsel %vm6225_vm13, %v3851_v31, 0.0  ;;  %vm6227_vm14 = vcmp.ge.f32.partialorder %v3843_v16, %v6226_v41  ;;  %vm6229_vm6 = vcmp.ge.f32.partialorder %v3845_v27, %v6228_v13 }
 0x336   : > { %6197 = vst [vmem:[#allocation66_spill] sm:$0xff] %v4679_v28  ;;  %v4769_v42 = vsel %vm6227_vm14, %v3843_v16, 0.0  ;;  %v4775_v63 = vsel %vm6229_vm6, %v3845_v27, 0.0  ;;  %vm6230_vm3 = vcmp.ge.f32.partialorder %v3847_v32, %v6226_v41  ;;  %vm6231_vm11 = vcmp.ge.f32.partialorder %v3851_v31, %v6228_v13  ;;  %v6238_v41 = vld [vmem:[#allocation24_spill] sm:$0xff]  ;;  %v6240_v28 = vld [vmem:[#allocation25_spill] sm:$0xff] }
 0x337   : > { %v4781_v43 = vsel %vm6230_vm3, %v3847_v32, 0.0  ;;  %v4787_v51 = vsel %vm6231_vm11, %v3851_v31, 0.0  ;;  %vm6233_vm12 = vcmp.ge.f32.partialorder %v3843_v16, %v6232_v4  ;;  %vm6235_vm13 = vcmp.ge.f32.partialorder %v3845_v27, %v6234_v37 }
 0x338   : > { %v4793_v1 = vsel %vm6233_vm12, %v3843_v16, 0.0  ;;  %v4799_v60 = vsel %vm6235_vm13, %v3845_v27, 0.0  ;;  %vm6236_vm14 = vcmp.ge.f32.partialorder %v3847_v32, %v6232_v4  ;;  %vm6237_vm6 = vcmp.ge.f32.partialorder %v3851_v31, %v6234_v37 }
 0x339   : > { %v4805_v55 = vsel %vm6236_vm14, %v3847_v32, 0.0  ;;  %v4811_v20 = vsel %vm6237_vm6, %v3851_v31, 0.0  ;;  %vm6239_vm3 = vcmp.ge.f32.partialorder %v3843_v16, %v6238_v41  ;;  %vm6241_vm11 = vcmp.ge.f32.partialorder %v3845_v27, %v6240_v28 }
 0x33a   : > { %v4817_v13 = vsel %vm6239_vm3, %v3843_v16, 0.0  ;;  %v4823_v8 = vsel %vm6241_vm11, %v3845_v27, 0.0  ;;  %vm6242_vm12 = vcmp.ge.f32.partialorder %v3847_v32, %v6238_v41  ;;  %vm6243_vm13 = vcmp.ge.f32.partialorder %v3851_v31, %v6240_v28  ;;  %v6248_v28 = vld [vmem:[#allocation26_spill] sm:$0xff]  ;;  %v6256_v41 = vld [vmem:[#allocation28_spill] sm:$0xff] }
 0x33b   : > { %v4829_v4 = vsel %vm6242_vm12, %v3847_v32, 0.0  ;;  %v4835_v37 = vsel %vm6243_vm13, %v3851_v31, 0.0  ;;  %vm6249_vm14 = vcmp.ge.f32.partialorder %v3843_v16, %v6248_v28  ;;  %vm6251_vm6 = vcmp.ge.f32.partialorder %v3845_v27, %v6250_v33 }
 0x33c   : > { %v4853_v57 = vsel %vm6249_vm14, %v3843_v16, 0.0  ;;  %v4859_v45 = vsel %vm6251_vm6, %v3845_v27, 0.0  ;;  %vm6253_vm3 = vcmp.ge.f32.partialorder %v3847_v32, %v6248_v28  ;;  %vm6254_vm11 = vcmp.ge.f32.partialorder %v3851_v31, %v6250_v33 }
 0x33d   : > { %6252 = vst [vmem:[#allocation65_spill] sm:$0xff] %v4859_v45  ;;  %v4865_v46 = vsel %vm6253_vm3, %v3847_v32, 0.0  ;;  %v4871_v14 = vsel %vm6254_vm11, %v3851_v31, 0.0  ;;  %vm6257_vm12 = vcmp.ge.f32.partialorder %v3843_v16, %v6256_v41  ;;  %v4883_v18 = vsel %vm2048_vm2, %v3845_v27, 0.0 }
 0x33e   : > { %6255 = vst [vmem:[#allocation67_spill] sm:$0xff] %v4871_v14  ;;  %v4877_v44 = vsel %vm6257_vm12, %v3843_v16, 0.0  ;;  %v4889_v28 = vsel %vm2049_vm1, %v3847_v32, 0.0  ;;  %vm6262_vm13 = vcmp.ge.f32.partialorder %v3851_v31, %v6259_v58  ;;  %vm6265_vm14 = vcmp.ge.f32.partialorder %v3843_v16, %v6264_v0 }
 0x33f   : > { %6258 = vst [vmem:[#allocation38_spill] sm:$0xff] %v4877_v44  ;;  %v4895_v33 = vsel %vm6262_vm13, %v3851_v31, 0.0  ;;  %v4901_v15 = vsel %vm6265_vm14, %v3843_v16, 0.0  ;;  %vm6268_vm2 = vcmp.ge.f32.partialorder %v3845_v27, %v6267_v11  ;;  %vm6270_vm1 = vcmp.ge.f32.partialorder %v3847_v32, %v6264_v0 }
 0x340   : > { %6260 = vst [vmem:[#allocation39_spill] sm:$0xff] %v4883_v18  ;;  %v4907_v23 = vsel %vm6268_vm2, %v3845_v27, 0.0  ;;  %v4913_v41 = vsel %vm6270_vm1, %v3847_v32, 0.0  ;;  %vm6272_vm6 = vcmp.ge.f32.partialorder %v3851_v31, %v6267_v11  ;;  %vm6275_vm3 = vcmp.ge.f32.partialorder %v3843_v16, %v6274_v50 }
 0x341   : > { %6261 = vst [vmem:[#allocation40_spill] sm:$0xff] %v4889_v28  ;;  %v4919_v58 = vsel %vm6272_vm6, %v3851_v31, 0.0  ;;  %v4925_v56 = vsel %vm6275_vm3, %v3843_v16, 0.0  ;;  %vm6278_vm11 = vcmp.ge.f32.partialorder %v3845_v27, %v6277_v3  ;;  %vm6280_vm12 = vcmp.ge.f32.partialorder %v3847_v32, %v6274_v50 }
 0x342   : > { %6263 = vst [vmem:[#allocation41_spill] sm:$0xff] %v4895_v33  ;;  %v4931_v40 = vsel %vm6278_vm11, %v3845_v27, 0.0  ;;  %v4937_v0 = vsel %vm6280_vm12, %v3847_v32, 0.0  ;;  %vm6282_vm13 = vcmp.ge.f32.partialorder %v3851_v31, %v6277_v3  ;;  %vm6285_vm14 = vcmp.ge.f32.partialorder %v3843_v16, %v6284_v53 }
 0x343   : > { %6266 = vst [vmem:[#allocation12_spill] sm:$0xff] %v4901_v15  ;;  %v4943_v11 = vsel %vm6282_vm13, %v3851_v31, 0.0  ;;  %v4949_v52 = vsel %vm6285_vm14, %v3843_v16, 0.0  ;;  %vm6288_vm2 = vcmp.ge.f32.partialorder %v3845_v27, %v6287_v49  ;;  %vm6290_vm1 = vcmp.ge.f32.partialorder %v3847_v32, %v6284_v53 }
 0x344   : > { %6269 = vst [vmem:[#allocation13_spill] sm:$0xff] %v4907_v23  ;;  %v4955_v19 = vsel %vm6288_vm2, %v3845_v27, 0.0  ;;  %v4961_v50 = vsel %vm6290_vm1, %v3847_v32, 0.0  ;;  %vm6292_vm6 = vcmp.ge.f32.partialorder %v3851_v31, %v6287_v49  ;;  %v2465_v23 = vadd.f32 %v2373_v22, %v2371_v29  ;;  %v6320_v10 = vld [vmem:[#allocation65_spill] sm:$0xff] }
 0x345   : > { %6271 = vst [vmem:[#allocation14_spill] sm:$0xff] %v4913_v41  ;;  %v4967_v3 = vsel %vm6292_vm6, %v3851_v31, 0.0  ;;  %v2479_v35 = vadd.f32 %v4757_v17, %v4745_v24  ;;  %v2528_v24 = vadd.f32 %v4835_v37, %v4823_v8 }
 0x346   : > { %6273 = vst [vmem:[#allocation15_spill] sm:$0xff] %v4919_v58  ;;  %v2458_v58 = vadd.f32 %v2370_v9, %v2368_v6  ;;  %v2466_v28 = vrot.slane %v2465_v23, 4 }
 0x347   : > { %6276 = vst [vmem:[#allocation16_spill] sm:$0xff] %v4925_v56  ;;  %v2451_v56 = vadd.f32 %v2369_v5, %v2367_v26  ;;  %v2480_v17 = vrot.slane %v2479_v35, 4 }
 0x348   : > { %6279 = vst [vmem:[#allocation17_spill] sm:$0xff] %v4931_v40  ;;  %v6323_v36 = vld [vmem:[#allocation40_spill] sm:$0xff] }
 0x349   : > { %6281 = vst [vmem:[#allocation18_spill] sm:$0xff] %v4937_v0  ;;  %v2444_v0 = vadd.f32 %v2366_v38, %v2364_v25  ;;  %v2452_v18 = vrot.slane %v2451_v56, 4 }
 0x34a   : > { %6283 = vst [vmem:[#allocation19_spill] sm:$0xff] %v4943_v11  ;;  %v6326_v62 = vld [vmem:[#allocation12_spill] sm:$0xff] }
 0x34b   : > { %6286 = vst [vmem:[#allocation20_spill] sm:$0xff] %v4949_v52  ;;  %v6294_v52 = vld [vmem:[#allocation36_spill] sm:$0xff] }
 0x34c   : > { %6289 = vst [vmem:[#allocation21_spill] sm:$0xff] %v4955_v19  ;;  %vm6295_vm3 = vcmp.ge.f32.partialorder %v3843_v16, %v6294_v52  ;;  %v6297_v19 = vld [vmem:[#allocation37_spill] sm:$0xff]  ;;  %vm6300_vm12 = vcmp.ge.f32.partialorder %v3847_v32, %v6294_v52  ;;  %v2445_v52 = vrot.slane %v2444_v0, 4 }
 0x34d   : > { %6291 = vst [vmem:[#allocation22_spill] sm:$0xff] %v4961_v50  ;;  %v4973_v11 = vsel %vm6295_vm3, %v3843_v16, 0.0  ;;  %vm6298_vm11 = vcmp.ge.f32.partialorder %v3845_v27, %v6297_v19  ;;  %v4985_v53 = vsel %vm6300_vm12, %v3847_v32, 0.0  ;;  %vm6302_vm13 = vcmp.ge.f32.partialorder %v3851_v31, %v6297_v19  ;;  %v6329_v48 = vld [vmem:[#allocation15_spill] sm:$0xff] }
 0x34e   : > { %6293 = vst [vmem:[#allocation23_spill] sm:$0xff] %v4967_v3  ;;  %v4979_v40 = vsel %vm6298_vm11, %v3845_v27, 0.0  ;;  %v4991_v49 = vsel %vm6302_vm13, %v3851_v31, 0.0  ;;  %v2423_v3 = vadd.f32 %v2361_v7, %v2359_v59  ;;  %v2437_v50 = vadd.f32 %v2365_v34, %v2363_v30 }
 0x34f   : > { %6296 = vst [vmem:[#allocation24_spill] sm:$0xff] %v4973_v11  ;;  %v2430_v11 = vadd.f32 %v2362_v47, %v2360_v61  ;;  %v2453_v59 = vadd.f32 %v2452_v18, %v2451_v56  ;;  %v2467_v7 = vadd.f32 %v2466_v28, %v2465_v23 }
 0x350   : > { %6299 = vst [vmem:[#allocation25_spill] sm:$0xff] %v4979_v40  ;;  %v2472_v40 = vadd.f32 %v2374_v21, %v2372_v39  ;;  %v2424_v41 = vrot.slane %v2423_v3, 4  ;;  %v2438_v33 = vrot.slane %v2437_v50, 4 }
 0x351   : > { %6301 = vst [vmem:[#allocation42_spill] sm:$0xff] %v4985_v53  ;;  %v2431_v15 = vrot.slane %v2430_v11, 4  ;;  %v2459_v53 = vrot.slane %v2458_v58, 4  ;;  %v2454_v26 = vrot.slane %v2453_v59, 2  ;;  %v2468_v5 = vrot.slane %v2467_v7, 2 }
 0x352   : > { %6303 = vst [vmem:[#allocation43_spill] sm:$0xff] %v4991_v49  ;;  %v2473_v44 = vrot.slane %v2472_v40, 4  ;;  %v2425_v14 = vadd.f32 %v2424_v41, %v2423_v3  ;;  %v2439_v45 = vadd.f32 %v2438_v33, %v2437_v50  ;;  %v2446_v49 = vadd.f32 %v2445_v52, %v2444_v0 }
 0x353   : > { %v2432_v19 = vadd.f32 %v2431_v15, %v2430_v11  ;;  %v2460_v61 = vadd.f32 %v2459_v53, %v2458_v58  ;;  %v4993_v41 = vadd.f32 %v2454_v26, %v2453_v59  ;;  %v4997_v56 = vadd.f32 %v2468_v5, %v2467_v7 }
 0x354   : > { %v2474_v47 = vadd.f32 %v2473_v44, %v2472_v40  ;;  %v2426_v30 = vrot.slane %v2425_v14, 2  ;;  %v2440_v34 = vrot.slane %v2439_v45, 2  ;;  %v2447_v38 = vrot.slane %v2446_v49, 2 }
 0x355   : > { %v2433_v25 = vrot.slane %v2432_v19, 2  ;;  %v2461_v6 = vrot.slane %v2460_v61, 2  ;;  %v5017_v33 = vsel %vm2069_vm15, %v3847_v32, 0.0  ;;  %v5023_v58 = vsel %vm2070_vm10, %v3851_v31, 0.0 }
 0x356   : > { %v2475_v9 = vrot.slane %v2474_v47, 2  ;;  %v2427_v29 = vadd.f32 %v2426_v30, %v2425_v14  ;;  %v2441_v22 = vadd.f32 %v2440_v34, %v2439_v45  ;;  %v2448_v21 = vadd.f32 %v2447_v38, %v2446_v49 }
 0x357   : > { %v2434_v39 = vadd.f32 %v2433_v25, %v2432_v19  ;;  %v4995_v15 = vadd.f32 %v2461_v6, %v2460_v61  ;;  %v5005_v14 = vsel %vm2067_vm9, %v3843_v16, 0.0  ;;  %v5011_v45 = vsel %vm2068_vm4, %v3845_v27, 0.0 }
 0x358   : > { %v4999_v23 = vadd.f32 %v2475_v9, %v2474_v47  ;;  %v2428_v40 = vrot.slane %v2427_v29, 1  ;;  %v2442_v44 = vrot.slane %v2441_v22, 1  ;;  %v2449_v28 = vrot.slane %v2448_v21, 1 }
 0x359   : > { %v2435_v18 = vrot.slane %v2434_v39, 1  ;;  %v2456_v0 = vrot.slane %v4993_v41, 1  ;;  %v2463_v11 = vrot.slane %v4995_v15, 1  ;;  %v2470_v50 = vrot.slane %v4997_v56, 1 }
 0x35a   : > { %v2477_v3 = vrot.slane %v4999_v23, 1  ;;  %v5029_v53 = vadd.f32 %v2428_v40, %v2427_v29  ;;  %v5033_v54 = vadd.f32 %v2442_v44, %v2441_v22  ;;  %v5035_v52 = vadd.f32 %v2449_v28, %v2448_v21 }
 0x35b   : > { %v5031_v49 = vadd.f32 %v2435_v18, %v2434_v39  ;;  %v2486_v19 = vadd.f32 %v4763_v2, %v4751_v12  ;;  %v2493_v59 = vadd.f32 %v4781_v43, %v4769_v42  ;;  %v2500_v61 = vadd.f32 %v4787_v51, %v4775_v63 }
 0x35c   : > { %6304 = vst [vmem:[#allocation44_spill] sm:$0xff] %v5029_v53  ;;  %v2507_v7 = vadd.f32 %v4805_v55, %v4793_v1  ;;  %v2514_v47 = vadd.f32 %v4811_v20, %v4799_v60  ;;  %v2521_v30 = vadd.f32 %v4829_v4, %v4817_v13  ;;  %v2529_v63 = vrot.slane %v2528_v24, 4 }
 0x35d   : > { %6305 = vst [vmem:[#allocation45_spill] sm:$0xff] %v5031_v49  ;;  %v2487_v12 = vrot.slane %v2486_v19, 4  ;;  %v2494_v2 = vrot.slane %v2493_v59, 4  ;;  %v2501_v25 = vrot.slane %v2500_v61, 4  ;;  %v2481_v51 = vadd.f32 %v2480_v17, %v2479_v35 }
 0x35e   : > { %6306 = vst [vmem:[#allocation26_spill] sm:$0xff] %v5033_v54  ;;  %v2508_v42 = vrot.slane %v2507_v7, 4  ;;  %v2515_v43 = vrot.slane %v2514_v47, 4  ;;  %v2522_v34 = vrot.slane %v2521_v30, 4  ;;  %v2530_v6 = vadd.f32 %v2529_v63, %v2528_v24 }
 0x35f   : > { %6307 = vst [vmem:[#allocation27_spill] sm:$0xff] %v5035_v52  ;;  %v2488_v38 = vadd.f32 %v2487_v12, %v2486_v19  ;;  %v2495_v1 = vadd.f32 %v2494_v2, %v2493_v59  ;;  %v2502_v55 = vadd.f32 %v2501_v25, %v2500_v61  ;;  %v2482_v13 = vrot.slane %v2481_v51, 2 }
 0x360   : > { %v2509_v26 = vadd.f32 %v2508_v42, %v2507_v7  ;;  %v2516_v60 = vadd.f32 %v2515_v43, %v2514_v47  ;;  %v2523_v20 = vadd.f32 %v2522_v34, %v2521_v30  ;;  %v2531_v39 = vrot.slane %v2530_v6, 2 }
 0x361   : > { %v2489_v4 = vrot.slane %v2488_v38, 2  ;;  %v2496_v5 = vrot.slane %v2495_v1, 2  ;;  %v2503_v8 = vrot.slane %v2502_v55, 2  ;;  %v2483_v22 = vadd.f32 %v2482_v13, %v2481_v51  ;;  %v6327_v13 = vld [vmem:[#allocation14_spill] sm:$0xff] }
 0x362   : > { %v2510_v37 = vrot.slane %v2509_v26, 2  ;;  %v2517_v9 = vrot.slane %v2516_v60, 2  ;;  %v2524_v29 = vrot.slane %v2523_v20, 2  ;;  %v5059_v19 = vadd.f32 %v2531_v39, %v2530_v6 }
 0x363   : > { %v2490_v21 = vadd.f32 %v2489_v4, %v2488_v38  ;;  %v2497_v40 = vadd.f32 %v2496_v5, %v2495_v1  ;;  %v2504_v18 = vadd.f32 %v2503_v8, %v2502_v55  ;;  %v2484_v59 = vrot.slane %v2483_v22, 1  ;;  %v6321_v38 = vld [vmem:[#allocation67_spill] sm:$0xff]  ;;  %v6322_v55 = vld [vmem:[#allocation38_spill] sm:$0xff]  ;;  %v6328_v5 = vld [vmem:[#allocation13_spill] sm:$0xff] }
 0x364   : > { %v5053_v44 = vadd.f32 %v2510_v37, %v2509_v26  ;;  %v5055_v28 = vadd.f32 %v2517_v9, %v2516_v60  ;;  %v5057_v35 = vadd.f32 %v2524_v29, %v2523_v20  ;;  %v5062_v30 = vadd.f32 %v2456_v0, %v4993_v41  ;;  %v6324_v60 = vld [vmem:[#allocation39_spill] sm:$0xff]  ;;  %v6325_v20 = vld [vmem:[#allocation41_spill] sm:$0xff] }
 0x365   : > { %v2491_v61 = vrot.slane %v2490_v21, 1  ;;  %v2498_v7 = vrot.slane %v2497_v40, 1  ;;  %v2505_v47 = vrot.slane %v2504_v18, 1  ;;  %v5065_v24 = vadd.f32 %v2463_v11, %v4995_v15 }
 0x366   : > { %6308 = vst [vmem:[#allocation28_spill] sm:$0xff] %v5062_v30  ;;  %v5068_v17 = vadd.f32 %v2470_v50, %v4997_v56  ;;  %v5071_v12 = vadd.f32 %v2477_v3, %v4999_v23  ;;  %v2512_v2 = vrot.slane %v5053_v44, 1  ;;  %v2519_v25 = vrot.slane %v5055_v28, 1 }
 0x367   : > { %6309 = vst [vmem:[#allocation29_spill] sm:$0xff] %v5065_v24  ;;  %v2526_v42 = vrot.slane %v5057_v35, 1  ;;  %v2533_v43 = vrot.slane %v5059_v19, 1  ;;  %v5077_v34 = vadd.f32 %v2484_v59, %v2483_v22  ;;  %v5079_v41 = vadd.f32 %v2491_v61, %v2490_v21 }
 0x368   : > { %6310 = vst [vmem:[#allocation30_spill] sm:$0xff] %v5068_v17  ;;  %v5081_v15 = vadd.f32 %v2498_v7, %v2497_v40  ;;  %v5083_v0 = vadd.f32 %v2505_v47, %v2504_v18  ;;  %v6316_v56 = vsel %vm4072_vm8, %v3843_v16, 0.0  ;;  %v6317_v23 = vsel %vm4082_vm5, %v3847_v32, 0.0 }
 0x369   : > { %6311 = vst [vmem:[#allocation31_spill] sm:$0xff] %v5071_v12  ;;  %v2535_v11 = vadd.f32 %v6317_v23, %v6316_v56  ;;  %v6318_v50 = vsel %vm4077_vm7, %v3845_v27, 0.0  ;;  %v6319_v3 = vsel %vm4087_vm0, %v3851_v31, 0.0  ;;  %v2549_v51 = vadd.f32 %v4865_v46, %v4853_v57 }
 0x36a   : > { %6312 = vst [vmem:[#allocation32_spill] sm:$0xff] %v5077_v34  ;;  %v2542_v63 = vadd.f32 %v6319_v3, %v6318_v50  ;;  %v2556_v1 = vadd.f32 %v6321_v38, %v6320_v10  ;;  %v2563_v26 = vadd.f32 %v6323_v36, %v6322_v55  ;;  %v2570_v6 = vadd.f32 %v6325_v20, %v6324_v60 }
 0x36b   : > { %6313 = vst [vmem:[#allocation33_spill] sm:$0xff] %v5079_v41  ;;  %v2577_v4 = vadd.f32 %v6327_v13, %v6326_v62  ;;  %v2584_v8 = vadd.f32 %v6329_v48, %v6328_v5  ;;  %v2536_v37 = vrot.slane %v2535_v11, 4  ;;  %v2550_v29 = vrot.slane %v2549_v51, 4 }
 0x36c   : > { %6314 = vst [vmem:[#allocation34_spill] sm:$0xff] %v5081_v15  ;;  %v2543_v9 = vrot.slane %v2542_v63, 4  ;;  %v2557_v39 = vrot.slane %v2556_v1, 4  ;;  %v2564_v57 = vrot.slane %v2563_v26, 4  ;;  %v2571_v46 = vrot.slane %v2570_v6, 4 }
 0x36d   : > { %6315 = vst [vmem:[#allocation35_spill] sm:$0xff] %v5083_v0  ;;  %v2578_v22 = vrot.slane %v2577_v4, 4  ;;  %v2585_v21 = vrot.slane %v2584_v8, 4  ;;  %v2537_v40 = vadd.f32 %v2536_v37, %v2535_v11  ;;  %v2551_v59 = vadd.f32 %v2550_v29, %v2549_v51 }
 0x36e   : > { %v2544_v18 = vadd.f32 %v2543_v9, %v2542_v63  ;;  %v2558_v61 = vadd.f32 %v2557_v39, %v2556_v1  ;;  %v2565_v7 = vadd.f32 %v2564_v57, %v2563_v26  ;;  %v2572_v47 = vadd.f32 %v2571_v46, %v2570_v6 }
 0x36f   : > { %v2579_v56 = vadd.f32 %v2578_v22, %v2577_v4  ;;  %v2586_v23 = vadd.f32 %v2585_v21, %v2584_v8  ;;  %v2538_v50 = vrot.slane %v2537_v40, 2  ;;  %v2552_v10 = vrot.slane %v2551_v59, 2 }
 0x370   : > { %v2545_v3 = vrot.slane %v2544_v18, 2  ;;  %v2559_v38 = vrot.slane %v2558_v61, 2  ;;  %v2566_v55 = vrot.slane %v2565_v7, 2  ;;  %v2573_v36 = vrot.slane %v2572_v47, 2 }
 0x371   : > { %v2580_v60 = vrot.slane %v2579_v56, 2  ;;  %v2587_v20 = vrot.slane %v2586_v23, 2  ;;  %v2539_v62 = vadd.f32 %v2538_v50, %v2537_v40  ;;  %v2553_v5 = vadd.f32 %v2552_v10, %v2551_v59  ;;  %v6342_v59 = vld [vmem:[#allocation20_spill] sm:$0xff] }
 0x372   : > { %v2546_v13 = vadd.f32 %v2545_v3, %v2544_v18  ;;  %v2560_v48 = vadd.f32 %v2559_v38, %v2558_v61  ;;  %v5113_v11 = vadd.f32 %v2566_v55, %v2565_v7  ;;  %v5115_v63 = vadd.f32 %v2573_v36, %v2572_v47  ;;  %v6343_v61 = vld [vmem:[#allocation22_spill] sm:$0xff]  ;;  %v6344_v47 = vld [vmem:[#allocation21_spill] sm:$0xff]  ;;  %v6346_v50 = vld [vmem:[#allocation24_spill] sm:$0xff] }
 0x373   : > { %v5117_v51 = vadd.f32 %v2580_v60, %v2579_v56  ;;  %v5119_v1 = vadd.f32 %v2587_v20, %v2586_v23  ;;  %v2540_v26 = vrot.slane %v2539_v62, 1  ;;  %v2554_v4 = vrot.slane %v2553_v5, 1  ;;  %v6345_v56 = vld [vmem:[#allocation23_spill] sm:$0xff]  ;;  %v6347_v3 = vld [vmem:[#allocation42_spill] sm:$0xff]  ;;  %v6348_v38 = vld [vmem:[#allocation25_spill] sm:$0xff] }
 0x374   : > { %v2547_v6 = vrot.slane %v2546_v13, 1  ;;  %v2561_v8 = vrot.slane %v2560_v48, 1  ;;  %v5122_v37 = vadd.f32 %v2512_v2, %v5053_v44  ;;  %v5125_v9 = vadd.f32 %v2519_v25, %v5055_v28  ;;  %v6339_v25 = vld [vmem:[#allocation18_spill] sm:$0xff]  ;;  %v6349_v55 = vld [vmem:[#allocation43_spill] sm:$0xff] }
 0x375   : > { %v5128_v29 = vadd.f32 %v2526_v42, %v5057_v35  ;;  %v5131_v39 = vadd.f32 %v2533_v43, %v5059_v19  ;;  %v2568_v57 = vrot.slane %v5113_v11, 1  ;;  %v2575_v46 = vrot.slane %v5115_v63, 1  ;;  %v6338_v35 = vld [vmem:[#allocation16_spill] sm:$0xff]  ;;  %v6340_v42 = vld [vmem:[#allocation17_spill] sm:$0xff]  ;;  %v6341_v43 = vld [vmem:[#allocation19_spill] sm:$0xff] }
 0x376   : > { %6330 = vst [vmem:[#allocation36_spill] sm:$0xff] %v5122_v37  ;;  %v2582_v22 = vrot.slane %v5117_v51, 1  ;;  %v2589_v21 = vrot.slane %v5119_v1, 1  ;;  %v5137_v40 = vadd.f32 %v2540_v26, %v2539_v62  ;;  %v5139_v44 = vadd.f32 %v2547_v6, %v2546_v13 }
 0x377   : > { %6331 = vst [vmem:[#allocation37_spill] sm:$0xff] %v5125_v9  ;;  %v5141_v28 = vadd.f32 %v2554_v4, %v2553_v5  ;;  %v5143_v2 = vadd.f32 %v2561_v8, %v2560_v48  ;;  %v2591_v19 = vadd.f32 %v6339_v25, %v6338_v35  ;;  %v2598_v18 = vadd.f32 %v6341_v43, %v6340_v42 }
 0x378   : > { %6332 = vst [vmem:[#allocation65_spill] sm:$0xff] %v5128_v29  ;;  %v2605_v7 = vadd.f32 %v6343_v61, %v6342_v59  ;;  %v2612_v23 = vadd.f32 %v6345_v56, %v6344_v47  ;;  %v2619_v10 = vadd.f32 %v6347_v3, %v6346_v50  ;;  %v2626_v36 = vadd.f32 %v6349_v55, %v6348_v38 }
 0x379   : > { %6333 = vst [vmem:[#allocation67_spill] sm:$0xff] %v5131_v39  ;;  %v2633_v60 = vadd.f32 %v5017_v33, %v5005_v14  ;;  %v2640_v20 = vadd.f32 %v5023_v58, %v5011_v45  ;;  %v2592_v62 = vrot.slane %v2591_v19, 4  ;;  %v2599_v13 = vrot.slane %v2598_v18, 4 }
 0x37a   : > { %6334 = vst [vmem:[#allocation38_spill] sm:$0xff] %v5137_v40  ;;  %v2606_v5 = vrot.slane %v2605_v7, 4  ;;  %v2613_v48 = vrot.slane %v2612_v23, 4  ;;  %v2620_v26 = vrot.slane %v2619_v10, 4  ;;  %v2627_v6 = vrot.slane %v2626_v36, 4 }
 0x37b   : > { %6335 = vst [vmem:[#allocation40_spill] sm:$0xff] %v5139_v44  ;;  %v2634_v4 = vrot.slane %v2633_v60, 4  ;;  %v2641_v8 = vrot.slane %v2640_v20, 4  ;;  %v2593_v35 = vadd.f32 %v2592_v62, %v2591_v19  ;;  %v2600_v25 = vadd.f32 %v2599_v13, %v2598_v18 }
 0x37c   : > { %6336 = vst [vmem:[#allocation39_spill] sm:$0xff] %v5141_v28  ;;  %v2607_v42 = vadd.f32 %v2606_v5, %v2605_v7  ;;  %v2614_v43 = vadd.f32 %v2613_v48, %v2612_v23  ;;  %v2621_v59 = vadd.f32 %v2620_v26, %v2619_v10  ;;  %v2628_v61 = vadd.f32 %v2627_v6, %v2626_v36 }
 0x37d   : > { %6337 = vst [vmem:[#allocation41_spill] sm:$0xff] %v5143_v2  ;;  %v2635_v47 = vadd.f32 %v2634_v4, %v2633_v60  ;;  %v2642_v56 = vadd.f32 %v2641_v8, %v2640_v20  ;;  %v2594_v14 = vrot.slane %v2593_v35, 2  ;;  %v2601_v33 = vrot.slane %v2600_v25, 2 }
 0x37e   : > { %v2608_v50 = vrot.slane %v2607_v42, 2  ;;  %v2615_v45 = vrot.slane %v2614_v43, 2  ;;  %v2622_v58 = vrot.slane %v2621_v59, 2  ;;  %v2629_v3 = vrot.slane %v2628_v61, 2 }
 0x37f   : > { %v2636_v38 = vrot.slane %v2635_v47, 2  ;;  %v2643_v55 = vrot.slane %v2642_v56, 2  ;;  %v2595_v2 = vadd.f32 %v2594_v14, %v2593_v35  ;;  %v2602_v28 = vadd.f32 %v2601_v33, %v2600_v25  ;;  %v6370_v33 = vld [vmem:[#allocation73_spill] sm:$0xff] }
 0x380   : > { %v2609_v44 = vadd.f32 %v2608_v50, %v2607_v42  ;;  %v2616_v40 = vadd.f32 %v2615_v45, %v2614_v43  ;;  %v2623_v19 = vadd.f32 %v2622_v58, %v2621_v59  ;;  %v2630_v18 = vadd.f32 %v2629_v3, %v2628_v61  ;;  %v6372_v58 = vld [vmem:[#allocation74_spill] sm:$0xff] }
 0x381   : > { %v2637_v7 = vadd.f32 %v2636_v38, %v2635_v47  ;;  %v2644_v23 = vadd.f32 %v2643_v55, %v2642_v56  ;;  %v2596_v10 = vrot.slane %v2595_v2, 1  ;;  %v2603_v36 = vrot.slane %v2602_v28, 1  ;;  %v6368_v47 = vld [vmem:[#allocation72_spill] sm:$0xff]  ;;  %v6374_v55 = vld [vmem:[#allocation75_spill] sm:$0xff] }
 0x382   : > { %v2610_v60 = vrot.slane %v2609_v44, 1  ;;  %v2617_v20 = vrot.slane %v2616_v40, 1  ;;  %v2624_v62 = vrot.slane %v2623_v19, 1  ;;  %v2631_v13 = vrot.slane %v2630_v18, 1 }
 0x383   : > { %v2638_v5 = vrot.slane %v2637_v7, 1  ;;  %v2645_v48 = vrot.slane %v2644_v23, 1  ;;  %v5162_v26 = vadd.f32 %v2568_v57, %v5113_v11  ;;  %v5165_v6 = vadd.f32 %v2575_v46, %v5115_v63  ;;  %v6363_v46 = vld [vmem:[#allocation69_spill] sm:$0xff] }
 0x384   : > { %v5168_v4 = vadd.f32 %v2582_v22, %v5117_v51  ;;  %v5171_v8 = vadd.f32 %v2589_v21, %v5119_v1  ;;  %v5173_v35 = vadd.f32 %v2596_v10, %v2595_v2  ;;  %v5175_v25 = vadd.f32 %v2603_v36, %v2602_v28  ;;  %v6362_v51 = vld [vmem:[#allocation68_spill] sm:$0xff]  ;;  %v6364_v21 = vld [vmem:[#allocation70_spill] sm:$0xff]  ;;  %v6378_v36 = vld [vmem:[#allocation77_spill] sm:$0xff] }
 0x385   : > { %6350 = vst [vmem:[#allocation12_spill] sm:$0xff] %v5162_v26  ;;  %v5177_v42 = vadd.f32 %v2610_v60, %v2609_v44  ;;  %v5179_v43 = vadd.f32 %v2617_v20, %v2616_v40  ;;  %v5181_v59 = vadd.f32 %v2624_v62, %v2623_v19  ;;  %v5183_v11 = vadd.f32 %v2631_v13, %v2630_v18  ;;  %v6366_v40 = vld [vmem:[#allocation71_spill] sm:$0xff]  ;;  %v6380_v62 = vld [vmem:[#allocation78_spill] sm:$0xff] }
 0x386   : > { %6351 = vst [vmem:[#allocation14_spill] sm:$0xff] %v5165_v6  ;;  %v5185_v63 = vadd.f32 %v2638_v5, %v2637_v7  ;;  %v5187_v57 = vadd.f32 %v2645_v48, %v2644_v23  ;;  %v2705_v1 = vmul.f32 %v6362_v51, %v3843_v16  ;;  %v2706_v22 = vmul.f32 %v6363_v46, %v3845_v27  ;;  %v6376_v7 = vld [vmem:[#allocation76_spill] sm:$0xff]  ;;  %v6382_v48 = vld [vmem:[#allocation79_spill] sm:$0xff]  ;;  %v6404_v51 = vld [vmem:[#allocation58_spill] sm:$0xff] }
 0x387   : > { %6352 = vst [vmem:[#allocation13_spill] sm:$0xff] %v5168_v4  ;;  %v6365_v44 = vrot.slane %v3843_v16, 1  ;;  %v6367_v2 = vrot.slane %v3845_v27, 1  ;;  %v6369_v56 = vrot.slane %v3843_v16, 2  ;;  %v6371_v50 = vrot.slane %v3845_v27, 2 }
 0x388   : > { %6353 = vst [vmem:[#allocation15_spill] sm:$0xff] %v5171_v8  ;;  %v6373_v3 = vrot.slane %v3843_v16, 3  ;;  %v6375_v19 = vrot.slane %v3845_v27, 3  ;;  %v6377_v23 = vrot.slane %v3843_v16, 4  ;;  %v6379_v60 = vrot.slane %v3845_v27, 4  ;;  %v6421_v8 = vld [vmem:[#allocation66_spill] sm:$0xff] }
 0x389   : > { %6354 = vst [vmem:[#allocation16_spill] sm:$0xff] %v5173_v35  ;;  %v2707_v28 = vmul.f32 %v6365_v44, %v6364_v21  ;;  %v2708_v61 = vmul.f32 %v6367_v2, %v6366_v40  ;;  %v2709_v14 = vmul.f32 %v6369_v56, %v6368_v47  ;;  %v2710_v45 = vmul.f32 %v6371_v50, %v6370_v33  ;;  %v6384_v56 = vld [vmem:[#allocation46_spill] sm:$0xff]  ;;  %v6394_v40 = vld [vmem:[#allocation52_spill] sm:$0xff] }
 0x38a   : > { %6355 = vst [vmem:[#allocation18_spill] sm:$0xff] %v5175_v25  ;;  %v2711_v38 = vmul.f32 %v6373_v3, %v6372_v58  ;;  %v2712_v18 = vmul.f32 %v6375_v19, %v6374_v55  ;;  %v2713_v10 = vmul.f32 %v6377_v23, %v6376_v7  ;;  %v2714_v20 = vmul.f32 %v6379_v60, %v6378_v36  ;;  %v6386_v19 = vld [vmem:[#allocation47_spill] sm:$0xff]  ;;  %v6388_v7 = vld [vmem:[#allocation48_spill] sm:$0xff]  ;;  %v6390_v36 = vld [vmem:[#allocation10_spill] sm:$0xff] }
 0x38b   : > { %6356 = vst [vmem:[#allocation17_spill] sm:$0xff] %v5177_v42  ;;  %v6381_v13 = vrot.slane %v3843_v16, 5  ;;  %v6383_v44 = vrot.slane %v3845_v27, 5  ;;  %v6385_v50 = vrot.slane %v3843_v16, 6  ;;  %v6387_v55 = vrot.slane %v3845_v27, 6  ;;  %v6391_v33 = vld [vmem:[#allocation50_spill] sm:$0xff] }
 0x38c   : > { %6357 = vst [vmem:[#allocation19_spill] sm:$0xff] %v5179_v43  ;;  %v6389_v58 = vrot.slane %v3843_v16, 7  ;;  %v2720_v47 = vmul.f32 %v6391_v33, %v6390_v36  ;;  %v6396_v21 = vld [vmem:[#allocation54_spill] sm:$0xff]  ;;  %v6401_v36 = vrot.slane %v3851_v31, 2  ;;  %v6403_v46 = vrot.slane %v3847_v32, 3 }
 0x38d   : > { %6358 = vst [vmem:[#allocation20_spill] sm:$0xff] %v5181_v59  ;;  %v2715_v5 = vmul.f32 %v6381_v13, %v6380_v62  ;;  %v2716_v2 = vmul.f32 %v6383_v44, %v6382_v48  ;;  %v2717_v3 = vmul.f32 %v6385_v50, %v6384_v56  ;;  %v2718_v23 = vmul.f32 %v6387_v55, %v6386_v19  ;;  %v6392_v13 = vld [vmem:[#allocation49_spill] sm:$0xff]  ;;  %v6393_v44 = vld [vmem:[#allocation51_spill] sm:$0xff] }
 0x38e   : > { %6359 = vst [vmem:[#allocation22_spill] sm:$0xff] %v5183_v11  ;;  %v2719_v60 = vmul.f32 %v6389_v58, %v6388_v7  ;;  %v2721_v62 = vmul.f32 %v6392_v13, %v3847_v32  ;;  %v2722_v48 = vmul.f32 %v6393_v44, %v3851_v31  ;;  %v6395_v50 = vrot.slane %v3847_v32, 1  ;;  %v6398_v19 = vld [vmem:[#allocation53_spill] sm:$0xff]  ;;  %v6400_v7 = vld [vmem:[#allocation55_spill] sm:$0xff]  ;;  %v6402_v13 = vld [vmem:[#allocation56_spill] sm:$0xff] }
 0x38f   : > { %6360 = vst [vmem:[#allocation21_spill] sm:$0xff] %v5185_v63  ;;  %v6397_v55 = vrot.slane %v3851_v31, 1  ;;  %v6399_v58 = vrot.slane %v3847_v32, 2  ;;  %v2726_v33 = vmul.f32 %v6401_v36, %v6400_v7  ;;  %v2727_v44 = vmul.f32 %v6403_v46, %v6402_v13  ;;  %v6412_v7 = vld [vmem:[#allocation62_spill] sm:$0xff]  ;;  %v6414_v13 = vld [vmem:[#allocation61_spill] sm:$0xff] }
 0x390   : > { %6361 = vst [vmem:[#allocation23_spill] sm:$0xff] %v5187_v57  ;;  %v2723_v56 = vmul.f32 %v6395_v50, %v6394_v40  ;;  %v6405_v57 = vrot.slane %v3851_v31, 3  ;;  %v6406_v40 = vld [vmem:[#allocation57_spill] sm:$0xff]  ;;  %v6407_v63 = vrot.slane %v3847_v32, 4  ;;  %v6409_v11 = vrot.slane %v3851_v31, 4 }
 0x391   : > { %v2724_v27 = vmul.f32 %v6397_v55, %v6396_v21  ;;  %v2725_v16 = vmul.f32 %v6399_v58, %v6398_v19  ;;  %v6408_v21 = vld [vmem:[#allocation59_spill] sm:$0xff]  ;;  %v6410_v19 = vld [vmem:[#allocation60_spill] sm:$0xff]  ;;  %v6411_v59 = vrot.slane %v3847_v32, 5  ;;  %v6413_v43 = vrot.slane %v3851_v31, 5 }
 0x392   : > { %v2728_v50 = vmul.f32 %v6405_v57, %v6404_v51  ;;  %v2729_v55 = vmul.f32 %v6407_v63, %v6406_v40  ;;  %v2730_v58 = vmul.f32 %v6409_v11, %v6408_v21  ;;  %v6415_v42 = vrot.slane %v3847_v32, 6  ;;  %v6416_v51 = vld [vmem:[#allocation63_spill] sm:$0xff]  ;;  %v6418_v40 = vld [vmem:[#allocation64_spill] sm:$0xff] }
 0x393   : > { %v2731_v36 = vmul.f32 %v6411_v59, %v6410_v19  ;;  %v2732_v46 = vmul.f32 %v6413_v43, %v6412_v7  ;;  %v6417_v25 = vrot.slane %v3851_v31, 6  ;;  %v6419_v35 = vrot.slane %v3847_v32, 7  ;;  %v6420_v21 = vld [vmem:[#allocation11_spill] sm:$0xff] }
 0x394   : > { %v2733_v57 = vmul.f32 %v6415_v42, %v6414_v13  ;;  %v2736_v4 = vmul.f32 %v6421_v8, %v6420_v21  ;;  %v5279_v59 = vadd.f32 1.0, %v2705_v1  ;;  %v5281_v19 = vadd.f32 1.0, %v2706_v22  ;;  %v6446_v21 = vld [vmem:[#allocation20_spill] sm:$0xff] }
 0x395   : > { %v2734_v63 = vmul.f32 %v6417_v25, %v6416_v51  ;;  %v2735_v11 = vmul.f32 %v6419_v35, %v6418_v40  ;;  %v5283_v43 = vadd.f32 1.0, %v2707_v28  ;;  %v5285_v7 = vadd.f32 1.0, %v2708_v61  ;;  %v6447_v8 = vld [vmem:[#allocation22_spill] sm:$0xff] }
 0x396   : > { %v5287_v42 = vadd.f32 1.0, %v2709_v14  ;;  %v5289_v13 = vadd.f32 1.0, %v2710_v45  ;;  %v5291_v25 = vadd.f32 1.0, %v2711_v38  ;;  %v5293_v31 = vadd.f32 1.0, %v2712_v18  ;;  %v6448_v40 = vld [vmem:[#allocation21_spill] sm:$0xff] }
 0x397   : > { %v5295_v35 = vadd.f32 1.0, %v2713_v10  ;;  %v5297_v32 = vadd.f32 1.0, %v2714_v20  ;;  %v5299_v1 = vadd.f32 1.0, %v2715_v5  ;;  %v5301_v22 = vadd.f32 1.0, %v2716_v2  ;;  %v6449_v51 = vld [vmem:[#allocation23_spill] sm:$0xff] }
 0x398   : > { %v5303_v28 = vadd.f32 1.0, %v2717_v3  ;;  %v5305_v61 = vadd.f32 1.0, %v2718_v23  ;;  %v5307_v14 = vadd.f32 1.0, %v2719_v60  ;;  %v5309_v45 = vadd.f32 1.0, %v2720_v47 }
 0x399   : > { %v5311_v38 = vadd.f32 1.0, %v2721_v62  ;;  %v5313_v18 = vadd.f32 1.0, %v2722_v48  ;;  %v5315_v10 = vadd.f32 1.0, %v2723_v56  ;;  %v5317_v20 = vadd.f32 1.0, %v2724_v27 }
 0x39a   : > { %v5319_v5 = vadd.f32 1.0, %v2725_v16  ;;  %v5321_v2 = vadd.f32 1.0, %v2726_v33  ;;  %v5323_v3 = vadd.f32 1.0, %v2727_v44  ;;  %v5325_v23 = vadd.f32 1.0, %v2728_v50  ;;  %v6437_v44 = vld [vmem:[#allocation40_spill] sm:$0xff]  ;;  %v6438_v50 = vld [vmem:[#allocation39_spill] sm:$0xff] }
 0x39b   : > { %6422 = vst [vmem:[#allocation24_spill] sm:$0xff] %v5313_v18  ;;  %v5327_v60 = vadd.f32 1.0, %v2729_v55  ;;  %v5329_v47 = vadd.f32 1.0, %v2730_v58  ;;  %v5331_v62 = vadd.f32 1.0, %v2731_v36  ;;  %v5333_v48 = vadd.f32 1.0, %v2732_v46  ;;  %v6439_v55 = vld [vmem:[#allocation41_spill] sm:$0xff] }
 0x39c   : > { %6423 = vst [vmem:[#allocation42_spill] sm:$0xff] %v5315_v10  ;;  %v5335_v56 = vadd.f32 1.0, %v2733_v57  ;;  %v5337_v27 = vadd.f32 1.0, %v2734_v63  ;;  %v5339_v16 = vadd.f32 1.0, %v2735_v11  ;;  %v5341_v33 = vadd.f32 1.0, %v2736_v4  ;;  %v6436_v4 = vld [vmem:[#allocation38_spill] sm:$0xff] }
 0x39d   : > { %6424 = vst [vmem:[#allocation25_spill] sm:$0xff] %v5317_v20  ;;  %vm2769_vm5 = vcmp.gt.f32.partialorder %v5279_v59, %v5029_v53  ;;  %vm2770_vm7 = vcmp.gt.f32.partialorder %v5281_v19, %v5031_v49  ;;  %vm2771_vm8 = vcmp.gt.f32.partialorder %v5283_v43, %v5033_v54  ;;  %vm2772_vm0 = vcmp.gt.f32.partialorder %v5285_v7, %v5035_v52  ;;  %v6440_v58 = vld [vmem:[#allocation13_spill] sm:$0xff]  ;;  %v6441_v36 = vld [vmem:[#allocation15_spill] sm:$0xff]  ;;  %v6443_v57 = vld [vmem:[#allocation18_spill] sm:$0xff] }
 0x39e   : > { %6425 = vst [vmem:[#allocation43_spill] sm:$0xff] %v5319_v5  ;;  %vm5964_vm10 = vcmp.gt.f32.partialorder %v5287_v42, %v5062_v30  ;;  %vm5966_vm9 = vcmp.gt.f32.partialorder %v5289_v13, %v5065_v24  ;;  %vm5968_vm4 = vcmp.gt.f32.partialorder %v5291_v25, %v5068_v17  ;;  %vm5970_vm15 = vcmp.gt.f32.partialorder %v5293_v31, %v5071_v12  ;;  %v6444_v63 = vld [vmem:[#allocation17_spill] sm:$0xff]  ;;  %v6445_v11 = vld [vmem:[#allocation19_spill] sm:$0xff]  ;;  %v6450_v46 = vld [vmem:[#allocation68_spill] sm:$0xff] }
 0x39f   : > { %6426 = vst [vmem:[#allocation80_spill] sm:$0xff] %v5321_v2  ;;  %vm5972_vm14 = vcmp.gt.f32.partialorder %v5295_v35, %v5077_v34  ;;  %vm2794_vm6 = vcmp.gt.f32.partialorder %v5329_v47, %v6443_v57  ;;  %vm2795_vm3 = vcmp.gt.f32.partialorder %v5331_v62, %v6444_v63  ;;  %vm6004_vm11 = vcmp.gt.f32.partialorder %v5333_v48, %v6445_v11  ;;  %v6455_v53 = vld [vmem:[#allocation73_spill] sm:$0xff]  ;;  %v6456_v49 = vld [vmem:[#allocation74_spill] sm:$0xff]  ;;  %v6457_v54 = vld [vmem:[#allocation75_spill] sm:$0xff] }
 0x3a0   : > { %6427 = vst [vmem:[#allocation81_spill] sm:$0xff] %v5323_v3  ;;  %vm6002_vm12 = vcmp.gt.f32.partialorder %v5335_v56, %v6446_v21  ;;  %vm6000_vm13 = vcmp.gt.f32.partialorder %v5337_v27, %v6447_v8  ;;  %vm6001_vm2 = vcmp.gt.f32.partialorder %v5339_v16, %v6448_v40  ;;  %vm6003_vm1 = vcmp.gt.f32.partialorder %v5341_v33, %v6449_v51  ;;  %v6452_v21 = vld [vmem:[#allocation70_spill] sm:$0xff]  ;;  %v6458_v52 = vld [vmem:[#allocation76_spill] sm:$0xff]  ;;  %v6459_v30 = vld [vmem:[#allocation77_spill] sm:$0xff] }
 0x3a1   : > { %6428 = vst [vmem:[#allocation82_spill] sm:$0xff] %v5325_v23  ;;  %v2801_v63 = vsel %vm2769_vm5, %v6450_v46, 0.0  ;;  %v2803_v8 = vsel %vm2771_vm8, %v6452_v21, 0.0  ;;  %v2807_v21 = vsel %vm5968_vm4, %v6456_v49, 0.0  ;;  %v6461_v24 = vld [vmem:[#allocation78_spill] sm:$0xff]  ;;  %v6463_v17 = vld [vmem:[#allocation79_spill] sm:$0xff]  ;;  %vm6464_vm4 = vcmp.gt.f32.partialorder %v5301_v22, %v5083_v0 }
 0x3a2   : > { %6429 = vst [vmem:[#allocation83_spill] sm:$0xff] %v5327_v60  ;;  %v6465_v12 = vld [vmem:[#allocation46_spill] sm:$0xff]  ;;  %v6467_v34 = vld [vmem:[#allocation47_spill] sm:$0xff]  ;;  %v6473_v0 = vld [vmem:[#allocation49_spill] sm:$0xff] }
 0x3a3   : > { %6430 = vst [vmem:[#allocation84_spill] sm:$0xff] %v5329_v47  ;;  %v6502_v57 = vld [vmem:[#allocation61_spill] sm:$0xff]  ;;  %v6545_v19 = vld [vmem:[#allocation28_spill] sm:$0xff] }
 0x3a4   : > { %6431 = vst [vmem:[#allocation85_spill] sm:$0xff] %v5331_v62  ;;  %v6451_v62 = vld [vmem:[#allocation69_spill] sm:$0xff]  ;;  %v2829_v47 = vsel %vm6002_vm12, %v6502_v57, 0.0 }
 0x3a5   : > { %6432 = vst [vmem:[#allocation86_spill] sm:$0xff] %v5333_v48  ;;  %v2802_v11 = vsel %vm2770_vm7, %v6451_v62, 0.0  ;;  %v2806_v62 = vsel %vm5966_vm9, %v6455_v53, 0.0  ;;  %vm6462_vm9 = vcmp.gt.f32.partialorder %v5299_v1, %v5081_v15  ;;  %v6471_v15 = vld [vmem:[#allocation50_spill] sm:$0xff]  ;;  %v6507_v48 = vld [vmem:[#allocation64_spill] sm:$0xff] }
 0x3a6   : > { %6433 = vst [vmem:[#allocation87_spill] sm:$0xff] %v5335_v56  ;;  %v2811_v49 = vsel %vm6462_vm9, %v6461_v24, 0.0  ;;  %vm6472_vm9 = vcmp.gt.f32.partialorder %v5309_v45, %v5131_v39  ;;  %v6481_v39 = vld [vmem:[#allocation53_spill] sm:$0xff] }
 0x3a7   : > { %6434 = vst [vmem:[#allocation88_spill] sm:$0xff] %v5337_v27  ;;  %v6453_v27 = vld [vmem:[#allocation71_spill] sm:$0xff] }
 0x3a8   : > { %6435 = vst [vmem:[#allocation89_spill] sm:$0xff] %v5341_v33  ;;  %v2804_v51 = vsel %vm2772_vm0, %v6453_v27, 0.0  ;;  %v6454_v33 = vld [vmem:[#allocation72_spill] sm:$0xff]  ;;  %v2808_v27 = vsel %vm5970_vm15, %v6457_v54, 0.0  ;;  %v2812_v54 = vsel %vm6464_vm4, %v6463_v17, 0.0  ;;  %vm6466_vm15 = vcmp.gt.f32.partialorder %v5303_v28, %v5122_v37  ;;  %v6475_v37 = vld [vmem:[#allocation51_spill] sm:$0xff] }
 0x3a9   : > { %v2805_v46 = vsel %vm5964_vm10, %v6454_v33, 0.0  ;;  %v2809_v33 = vsel %vm5972_vm14, %v6458_v52, 0.0  ;;  %vm6460_vm10 = vcmp.gt.f32.partialorder %v5297_v32, %v5079_v41  ;;  %v2813_v52 = vsel %vm6466_vm15, %v6465_v12, 0.0  ;;  %v6469_v41 = vld [vmem:[#allocation48_spill] sm:$0xff] }
 0x3aa   : > { %v2810_v53 = vsel %vm6460_vm10, %v6459_v30, 0.0  ;;  %vm6468_vm14 = vcmp.gt.f32.partialorder %v5305_v61, %v5125_v9  ;;  %vm6470_vm10 = vcmp.gt.f32.partialorder %v5307_v14, %v5128_v29  ;;  %v2816_v17 = vsel %vm6472_vm9, %v6471_v15, 0.0  ;;  %v6477_v9 = vld [vmem:[#allocation52_spill] sm:$0xff]  ;;  %v6479_v29 = vld [vmem:[#allocation54_spill] sm:$0xff] }
 0x3ab   : > { %v2814_v30 = vsel %vm6468_vm14, %v6467_v34, 0.0  ;;  %v2815_v24 = vsel %vm6470_vm10, %v6469_v41, 0.0  ;;  %vm6474_vm4 = vcmp.gt.f32.partialorder %v5311_v38, %v6436_v4  ;;  %vm6476_vm15 = vcmp.gt.f32.partialorder %v5313_v18, %v6437_v44  ;;  %v6483_v4 = vld [vmem:[#allocation55_spill] sm:$0xff]  ;;  %v6485_v44 = vld [vmem:[#allocation56_spill] sm:$0xff] }
 0x3ac   : > { %v2817_v12 = vsel %vm6474_vm4, %v6473_v0, 0.0  ;;  %v2818_v34 = vsel %vm6476_vm15, %v6475_v37, 0.0  ;;  %vm6478_vm14 = vcmp.gt.f32.partialorder %v5315_v10, %v6438_v50  ;;  %vm6480_vm10 = vcmp.gt.f32.partialorder %v5317_v20, %v6439_v55  ;;  %v6487_v50 = vld [vmem:[#allocation58_spill] sm:$0xff]  ;;  %v6489_v55 = vld [vmem:[#allocation57_spill] sm:$0xff]  ;;  %v6490_v20 = vld [vmem:[#allocation16_spill] sm:$0xff] }
 0x3ad   : > { %v2819_v41 = vsel %vm6478_vm14, %v6477_v9, 0.0  ;;  %v2820_v15 = vsel %vm6480_vm10, %v6479_v29, 0.0  ;;  %vm6482_vm9 = vcmp.gt.f32.partialorder %v5319_v5, %v5162_v26  ;;  %vm6484_vm4 = vcmp.gt.f32.partialorder %v5321_v2, %v5165_v6  ;;  %v6492_v26 = vld [vmem:[#allocation59_spill] sm:$0xff]  ;;  %v6493_v6 = vld [vmem:[#allocation60_spill] sm:$0xff]  ;;  %v6506_v2 = vld [vmem:[#allocation22_spill] sm:$0xff] }
 0x3ae   : > { %v2821_v0 = vsel %vm6482_vm9, %v6481_v39, 0.0  ;;  %v2822_v37 = vsel %vm6484_vm4, %v6483_v4, 0.0  ;;  %vm6486_vm15 = vcmp.gt.f32.partialorder %v5323_v3, %v6440_v58  ;;  %vm6488_vm14 = vcmp.gt.f32.partialorder %v5325_v23, %v6441_v36  ;;  %v6496_v58 = vld [vmem:[#allocation62_spill] sm:$0xff]  ;;  %v6504_v5 = vld [vmem:[#allocation63_spill] sm:$0xff] }
 0x3af   : > { %v2823_v9 = vsel %vm6486_vm15, %v6485_v44, 0.0  ;;  %v2824_v29 = vsel %vm6488_vm14, %v6487_v50, 0.0  ;;  %vm6491_vm10 = vcmp.gt.f32.partialorder %v5327_v60, %v6490_v20  ;;  %v2826_v4 = vsel %vm2794_vm6, %v6492_v26, 0.0 }
 0x3b0   : > { %v2825_v39 = vsel %vm6491_vm10, %v6489_v55, 0.0  ;;  %v2827_v44 = vsel %vm2795_vm3, %v6493_v6, 0.0  ;;  %v2828_v50 = vsel %vm6004_vm11, %v6496_v58, 0.0  ;;  %vm6498_vm9 = vcmask 1040384   ;;  %v6505_v6 = vld [vmem:[#allocation88_spill] sm:$0xff] }
 0x3b1   : > { %v2833_v36 = vsel %vm6498_vm9, %v2801_v63, -inf  ;;  %vm6499_vm4 = vmmov %vm6498_vm9  ;;  %v2830_v23 = vsel %vm6000_vm13, %v6504_v5, 0.0  ;;  %v6508_v63 = vld [vmem:[#allocation66_spill] sm:$0xff] }
 0x3b2   : > { %v2834_v20 = vsel %vm6499_vm4, %v2803_v8, -inf  ;;  %vm6500_vm15 = vmmov %vm6499_vm4  ;;  %v2831_v8 = vsel %vm6001_vm2, %v6507_v48, 0.0  ;;  %v2832_v10 = vsel %vm6003_vm1, %v6508_v63, 0.0  ;;  %v2843_v5 = vsel %vm6499_vm4, %v2813_v52, -inf }
 0x3b3   : > { %v2835_v55 = vsel %vm6500_vm15, %v2805_v46, -inf  ;;  %vm6501_vm14 = vmmov %vm6499_vm4  ;;  %v6509_v46 = vld [vmem:[#allocation89_spill] sm:$0xff] }
 0x3b4   : > { %v2837_v60 = vsel %vm6501_vm14, %v2807_v21, -inf  ;;  %v2836_v3 = vmax.f32 %v2833_v36, %v2835_v55  ;;  %vm6511_vm10 = vmmov %vm6499_vm4 }
 0x3b5   : > { %v2838_v58 = vmax.f32 %v2834_v20, %v2837_v60  ;;  %v2839_v26 = vsel %vm6511_vm10, %v2809_v33, -inf  ;;  %vm6512_vm9 = vmmov %vm6499_vm4 }
 0x3b6   : > { %v2841_v57 = vsel %vm6512_vm9, %v2811_v49, -inf  ;;  %v2840_v56 = vmax.f32 %v2836_v3, %v2839_v26  ;;  %vm6513_vm15 = vmmov %vm6499_vm4 }
 0x3b7   : > { %v2842_v18 = vmax.f32 %v2838_v58, %v2841_v57  ;;  %v2845_v20 = vsel %vm6513_vm15, %v2815_v24, -inf  ;;  %vm6514_vm14 = vmmov %vm6499_vm4 }
 0x3b8   : > { %v2847_v60 = vsel %vm6514_vm14, %v2817_v12, -inf  ;;  %vm6515_vm13 = vmmov %vm6499_vm4  ;;  %v2844_v21 = vmax.f32 %v2840_v56, %v2843_v5 }
 0x3b9   : > { %v2849_v36 = vsel %vm6515_vm13, %v2819_v41, -inf  ;;  %vm6516_vm2 = vmmov %vm6499_vm4  ;;  %v2846_v63 = vmax.f32 %v2842_v18, %v2845_v20 }
 0x3ba   : > { %v2851_v48 = vsel %vm6516_vm2, %v2821_v0, -inf  ;;  %vm6517_vm12 = vmmov %vm6516_vm2  ;;  %v2848_v26 = vmax.f32 %v2844_v21, %v2847_v60 }
 0x3bb   : > { %v2853_v55 = vsel %vm6517_vm12, %v2823_v9, -inf  ;;  %vm6518_vm1 = vmmov %vm6516_vm2  ;;  %v2850_v41 = vmax.f32 %v2846_v63, %v2849_v36 }
 0x3bc   : > { %v2855_v33 = vsel %vm6518_vm1, %v2825_v39, -inf  ;;  %vm6519_vm10 = vmmov %vm6518_vm1  ;;  %v2852_v39 = vmax.f32 %v2848_v26, %v2851_v48  ;;  %v6589_v26 = vld [vmem:[#allocation39_spill] sm:$0xff] }
 0x3bd   : > { %v2865_v49 = vsel %vm6519_vm10, %v2804_v51, -inf  ;;  %vm6520_vm9 = vmmov %vm6518_vm1  ;;  %v2872_v51 = vsel %vm6518_vm1, %v2812_v54, -inf }
 0x3be   : > { %v2857_v3 = vsel %vm6520_vm9, %v2827_v44, -inf  ;;  %vm6521_vm11 = vmmov %vm6518_vm1  ;;  %v2854_v44 = vmax.f32 %v2850_v41, %v2853_v55  ;;  %v2856_v20 = vmax.f32 %v2852_v39, %v2855_v33  ;;  %v6536_v33 = vld [vmem:[#allocation6_spill] sm:$0xff] }
 0x3bf   : > { %v2864_v52 = vsel %vm6521_vm11, %v2802_v11, -inf  ;;  %vm6522_vm4 = vmmov %vm6518_vm1 }
 0x3c0   : > { %v2866_v24 = vsel %vm6522_vm4, %v2806_v62, -inf  ;;  %vm6523_vm15 = vmmov %vm6518_vm1 }
 0x3c1   : > { %v2868_v12 = vsel %vm6523_vm15, %v2808_v27, -inf  ;;  %v2867_v58 = vmax.f32 %v2864_v52, %v2866_v24  ;;  %vm6524_vm2 = vmmov %vm6518_vm1  ;;  %v6540_v24 = vrot.slane %v6536_v33, 1 }
 0x3c2   : > { %v2869_v0 = vmax.f32 %v2865_v49, %v2868_v12  ;;  %v2859_v9 = vsel %vm6524_vm2, %v2829_v47, -inf  ;;  %vm6525_vm12 = vmmov %vm6518_vm1  ;;  %v2858_v47 = vmax.f32 %v2854_v44, %v2857_v3  ;;  %v2895_v3 = vsel %vm2769_vm5, %v6536_v33, 0.0  ;;  %v6577_v49 = vld [vmem:[#allocation10_spill] sm:$0xff] }
 0x3c3   : > { %v2861_v18 = vsel %vm6525_vm12, %v2831_v8, -inf  ;;  %vm6526_vm13 = vmmov %vm6518_vm1  ;;  %v2860_v55 = vmax.f32 %v2856_v20, %v2859_v9  ;;  %vm6546_vm5 = vcmp.gt.f32.partialorder %v5287_v42, %v6545_v19  ;;  %v6562_v20 = vrot.slane %v6536_v33, 5  ;;  %v6592_v19 = vld [vmem:[#allocation25_spill] sm:$0xff] }
 0x3c4   : > { %v2870_v56 = vsel %vm6526_vm13, %v2810_v53, -inf  ;;  %v2873_v11 = vmax.f32 %v2869_v0, %v2872_v51  ;;  %vm6527_vm11 = vmmov %vm6518_vm1  ;;  %v6551_v51 = vld [vmem:[#allocation30_spill] sm:$0xff] }
 0x3c5   : > { %v2871_v57 = vmax.f32 %v2867_v58, %v2870_v56  ;;  %v2874_v62 = vsel %vm6527_vm11, %v2814_v30, -inf  ;;  %vm6528_vm14 = vmmov %vm6518_vm1  ;;  %v2862_v30 = vmax.f32 %v2858_v47, %v2861_v18  ;;  %v6544_v58 = vrot.slane %v6536_v33, 2  ;;  %v6548_v18 = vld [vmem:[#allocation29_spill] sm:$0xff]  ;;  %v6563_v47 = vld [vmem:[#allocation34_spill] sm:$0xff] }
 0x3c6   : > { %v2876_v27 = vsel %vm6528_vm14, %v2816_v17, -inf  ;;  %vm6529_vm10 = vmmov %vm6518_vm1  ;;  %v6550_v56 = vrot.slane %v6536_v33, 3 }
 0x3c7   : > { %v2878_v21 = vsel %vm6529_vm10, %v2818_v34, -inf  ;;  %vm6530_vm9 = vmmov %vm6518_vm1  ;;  %v2875_v60 = vmax.f32 %v2871_v57, %v2874_v62  ;;  %v2877_v8 = vmax.f32 %v2873_v11, %v2876_v27  ;;  %v5585_v41 = vmax.f32 %v2860_v55, %v2862_v30  ;;  %v6554_v11 = vld [vmem:[#allocation31_spill] sm:$0xff]  ;;  %v6557_v27 = vld [vmem:[#allocation32_spill] sm:$0xff] }
 0x3c8   : > { %v2880_v5 = vsel %vm6530_vm9, %v2820_v15, -inf  ;;  %vm6531_vm4 = vmmov %vm6518_vm1  ;;  %v2892_v15 = vsel %vm6518_vm1, %v2832_v10, -inf  ;;  %v2899_v0 = vsel %vm6546_vm5, %v6544_v58, 0.0  ;;  %v6556_v62 = vrot.slane %v6536_v33, 4  ;;  %v6572_v30 = vld [vmem:[#allocation37_spill] sm:$0xff] }
 0x3c9   : > { %v2882_v53 = vsel %vm6531_vm4, %v2822_v37, -inf  ;;  %vm6532_vm15 = vmmov %vm6518_vm1  ;;  %v2879_v63 = vmax.f32 %v2875_v60, %v2878_v21  ;;  %v2881_v17 = vmax.f32 %v2877_v8, %v2880_v5  ;;  %v6538_v37 = vld [vmem:[#allocation7_spill] sm:$0xff]  ;;  %vm6558_vm11 = vcmp.gt.f32.partialorder %v5295_v35, %v6557_v27  ;;  %v6560_v5 = vld [vmem:[#allocation33_spill] sm:$0xff] }
 0x3ca   : > { %v2884_v54 = vsel %vm6532_vm15, %v2824_v29, -inf  ;;  %vm6533_vm2 = vmmov %vm6518_vm1  ;;  %v6542_v10 = vrot.slane %v6538_v37, 1  ;;  %v6547_v9 = vrot.slane %v6538_v37, 2  ;;  %v6553_v57 = vrot.slane %v6538_v37, 3  ;;  %v6566_v8 = vld [vmem:[#allocation35_spill] sm:$0xff] }
 0x3cb   : > { %v2886_v36 = vsel %vm6533_vm2, %v2826_v4, -inf  ;;  %vm6534_vm12 = vmmov %vm6518_vm1  ;;  %v2896_v4 = vsel %vm2770_vm7, %v6538_v37, 0.0  ;;  %v2883_v52 = vmax.f32 %v2879_v63, %v2882_v53  ;;  %vm6549_vm7 = vcmp.gt.f32.partialorder %v5289_v13, %v6548_v18  ;;  %v6578_v29 = vld [vmem:[#allocation67_spill] sm:$0xff] }
 0x3cc   : > { %v2888_v48 = vsel %vm6534_vm12, %v2828_v50, -inf  ;;  %vm6535_vm13 = vmmov %vm6518_vm1  ;;  %v2885_v50 = vmax.f32 %v2881_v17, %v2884_v54  ;;  %v2898_v59 = vsel %vm2772_vm0, %v6542_v10, 0.0  ;;  %v2900_v43 = vsel %vm6549_vm7, %v6547_v9, 0.0  ;;  %v6569_v54 = vld [vmem:[#allocation36_spill] sm:$0xff]  ;;  %v6593_v9 = vld [vmem:[#allocation41_spill] sm:$0xff] }
 0x3cd   : > { %v2890_v34 = vsel %vm6535_vm13, %v2830_v23, -inf  ;;  %v2897_v23 = vsel %vm2771_vm8, %v6540_v24, 0.0  ;;  %vm6552_vm8 = vcmp.gt.f32.partialorder %v5291_v25, %v6551_v51  ;;  %v2887_v39 = vmax.f32 %v2883_v52, %v2886_v36  ;;  %v6585_v24 = vld [vmem:[#allocation40_spill] sm:$0xff] }
 0x3ce   : > { %v2901_v7 = vsel %vm6552_vm8, %v6550_v56, 0.0  ;;  %v2889_v44 = vmax.f32 %v2885_v50, %v2888_v48  ;;  %vm6555_vm0 = vcmp.gt.f32.partialorder %v5293_v31, %v6554_v11  ;;  %v2903_v13 = vsel %vm6558_vm11, %v6556_v62, 0.0  ;;  %v6584_v50 = vld [vmem:[#allocation24_spill] sm:$0xff]  ;;  %v6596_v56 = vld [vmem:[#allocation43_spill] sm:$0xff]  ;;  %v6601_v11 = vld [vmem:[#allocation14_spill] sm:$0xff] }
 0x3cf   : > { %v2902_v42 = vsel %vm6555_vm0, %v6553_v57, 0.0  ;;  %v6559_v21 = vrot.slane %v6538_v37, 4  ;;  %vm6561_vm14 = vcmp.gt.f32.partialorder %v5297_v32, %v6560_v5  ;;  %vm6564_vm10 = vcmp.gt.f32.partialorder %v5299_v1, %v6563_v47  ;;  %v6597_v51 = vld [vmem:[#allocation12_spill] sm:$0xff]  ;;  %v6605_v5 = vld [vmem:[#allocation13_spill] sm:$0xff] }
 0x3d0   : > { %v2905_v60 = vsel %vm6564_vm10, %v6562_v20, 0.0  ;;  %v6565_v31 = vrot.slane %v6538_v37, 5  ;;  %vm6567_vm9 = vcmp.gt.f32.partialorder %v5301_v22, %v6566_v8  ;;  %v6568_v35 = vrot.slane %v6536_v33, 6  ;;  %v6575_v22 = vld [vmem:[#allocation65_spill] sm:$0xff]  ;;  %v6600_v57 = vld [vmem:[#allocation80_spill] sm:$0xff]  ;;  %v6608_v8 = vld [vmem:[#allocation82_spill] sm:$0xff] }
 0x3d1   : > { %v2904_v25 = vsel %vm6561_vm14, %v6559_v21, 0.0  ;;  %vm6570_vm4 = vcmp.gt.f32.partialorder %v5303_v28, %v6569_v54  ;;  %v2891_v32 = vmax.f32 %v2887_v39, %v2890_v34  ;;  %v2893_v48 = vmax.f32 %v2889_v44, %v2892_v15  ;;  %v6580_v34 = vld [vmem:[#allocation8_spill] sm:$0xff]  ;;  %v6581_v15 = vld [vmem:[#allocation38_spill] sm:$0xff]  ;;  %v6604_v21 = vld [vmem:[#allocation81_spill] sm:$0xff] }
 0x3d2   : > { %v2906_v53 = vsel %vm6567_vm9, %v6565_v31, 0.0  ;;  %v2907_v36 = vsel %vm6570_vm4, %v6568_v35, 0.0  ;;  %v6571_v55 = vrot.slane %v6538_v37, 6  ;;  %vm6573_vm15 = vcmp.gt.f32.partialorder %v5305_v61, %v6572_v30  ;;  %v6583_v61 = vld [vmem:[#allocation9_spill] sm:$0xff]  ;;  %v6609_v35 = vld [vmem:[#allocation15_spill] sm:$0xff] }
 0x3d3   : > { %v6574_v63 = vrot.slane %v6536_v33, 7  ;;  %vm6576_vm2 = vcmp.gt.f32.partialorder %v5307_v14, %v6575_v22  ;;  %vm6579_vm12 = vcmp.gt.f32.partialorder %v5309_v45, %v6578_v29  ;;  %vm6582_vm13 = vcmp.gt.f32.partialorder %v5311_v38, %v6581_v15  ;;  %v6588_v14 = vld [vmem:[#allocation42_spill] sm:$0xff]  ;;  %v6612_v30 = vld [vmem:[#allocation83_spill] sm:$0xff] }
 0x3d4   : > { %v5637_v1 = vsel %vm6573_vm15, %v6571_v55, 0.0  ;;  %v5648_v28 = vsel %vm6579_vm12, %v6577_v49, 0.0  ;;  %v2911_v52 = vsel %vm6582_vm13, %v6580_v34, 0.0  ;;  %vm6586_vm1 = vcmp.gt.f32.partialorder %v6584_v50, %v6585_v24 }
 0x3d5   : > { %v2909_v17 = vsel %vm6576_vm2, %v6574_v63, 0.0  ;;  %v2912_v12 = vsel %vm6586_vm1, %v6583_v61, 0.0  ;;  %v6587_v10 = vrot.slane %v6580_v34, 1  ;;  %vm6590_vm5 = vcmp.gt.f32.partialorder %v6588_v14, %v6589_v26  ;;  %v6613_v63 = vld [vmem:[#allocation16_spill] sm:$0xff]  ;;  %v6622_v26 = vld [vmem:[#allocation86_spill] sm:$0xff] }
 0x3d6   : > { %v6591_v45 = vrot.slane %v6583_v61, 1  ;;  %vm6594_vm7 = vcmp.gt.f32.partialorder %v6592_v19, %v6593_v9  ;;  %v6595_v38 = vrot.slane %v6580_v34, 2  ;;  %vm6598_vm8 = vcmp.gt.f32.partialorder %v6596_v56, %v6597_v51  ;;  %v6626_v51 = vld [vmem:[#allocation87_spill] sm:$0xff] }
 0x3d7   : > { %v2913_v58 = vsel %vm6590_vm5, %v6587_v10, 0.0  ;;  %v6599_v44 = vrot.slane %v6583_v61, 2  ;;  %vm6602_vm0 = vcmp.gt.f32.partialorder %v6600_v57, %v6601_v11  ;;  %v6603_v27 = vrot.slane %v6580_v34, 3 }
 0x3d8   : > { %v2914_v18 = vsel %vm6594_vm7, %v6591_v45, 0.0  ;;  %v2915_v39 = vsel %vm6598_vm8, %v6595_v38, 0.0  ;;  %vm6606_vm11 = vcmp.gt.f32.partialorder %v6604_v21, %v6605_v5  ;;  %vm2972_vm14 = vcmask 1047559   ;;  %v6623_v45 = vld [vmem:[#allocation19_spill] sm:$0xff] }
 0x3d9   : > { %v2916_v62 = vsel %vm6602_vm0, %v6599_v44, 0.0  ;;  %v2917_v20 = vsel %vm6606_vm11, %v6603_v27, 0.0  ;;  %v5683_v47 = vmax.f32 %v2891_v32, %v2893_v48  ;;  %v6607_v31 = vrot.slane %v6583_v61, 3  ;;  %v6627_v44 = vld [vmem:[#allocation20_spill] sm:$0xff] }
 0x3da   : > { %vm6610_vm10 = vcmp.gt.f32.partialorder %v6608_v8, %v6609_v35  ;;  %v6611_v55 = vrot.slane %v6580_v34, 4  ;;  %vm6614_vm9 = vcmp.gt.f32.partialorder %v6612_v30, %v6613_v63  ;;  %v6615_v49 = vrot.slane %v6583_v61, 4 }
 0x3db   : > { %v2918_v54 = vsel %vm6610_vm10, %v6607_v31, 0.0  ;;  %v6618_v32 = vrot.slane %v6580_v34, 5  ;;  %v6621_v14 = vrot.slane %v6583_v61, 5  ;;  %vm6624_vm4 = vcmp.gt.f32.partialorder %v6622_v26, %v6623_v45 }
 0x3dc   : > { %v2919_v22 = vsel %vm6614_vm9, %v6611_v55, 0.0  ;;  %v2920_v50 = vsel %vm2794_vm6, %v6615_v49, 0.0  ;;  %v2959_v9 = vrot.slane %v2897_v23, 7  ;;  %v2961_v38 = vrot.slane %v2899_v0, 6  ;;  %v6633_v23 = vld [vmem:[#allocation11_spill] sm:$0xff] }
 0x3dd   : > { %v2921_v10 = vsel %vm2795_vm3, %v6618_v32, 0.0  ;;  %v2922_v19 = vsel %vm6624_vm4, %v6621_v14, 0.0  ;;  %v6625_v56 = vrot.slane %v6580_v34, 6  ;;  %vm6628_vm15 = vcmp.gt.f32.partialorder %v6626_v51, %v6627_v44  ;;  %v6634_v0 = vld [vmem:[#allocation23_spill] sm:$0xff] }
 0x3de   : > { %v6629_v11 = vrot.slane %v6583_v61, 6  ;;  %vm6630_vm6 = vcmp.gt.f32.partialorder %v6505_v6, %v6506_v2  ;;  %v6631_v21 = vrot.slane %v6580_v34, 7  ;;  %vm6632_vm3 = vcmp.gt.f32.partialorder %v5339_v16, %v6448_v40 }
 0x3df   : > { %v2923_v57 = vsel %vm6628_vm15, %v6625_v56, 0.0  ;;  %vm6635_vm2 = vcmp.gt.f32.partialorder %v6509_v46, %v6634_v0  ;;  %vm6636_vm12 = vcmask 1041409   ;;  %v2963_v35 = vrot.slane %v2901_v7, 5 }
 0x3e0   : > { %v2924_v27 = vsel %vm6630_vm6, %v6629_v11, 0.0  ;;  %v2925_v5 = vsel %vm6632_vm3, %v6631_v21, 0.0  ;;  %v2926_v31 = vsel %vm6635_vm2, %v6633_v23, 0.0  ;;  %v2960_v8 = vsel %vm6636_vm12, %v2959_v9, %v2895_v3  ;;  %vm6639_vm5 = vmmov %vm6636_vm12 }
 0x3e1   : > { %v2974_v55 = vrot.slane %v2898_v59, 7  ;;  %v2976_v30 = vrot.slane %v2900_v43, 6  ;;  %vm6637_vm13 = vcmask 1042434   ;;  %v2965_v2 = vrot.slane %v2903_v13, 4  ;;  %vm6646_vm4 = vmmov %vm6639_vm5 }
 0x3e2   : > { %v2962_v63 = vsel %vm6637_vm13, %v2961_v38, %v2960_v8  ;;  %v2967_v6 = vrot.slane %v2905_v60, 3  ;;  %v2969_v49 = vrot.slane %v2907_v36, 2  ;;  %vm6638_vm1 = vcmask 1043459   ;;  %vm6641_vm8 = vmmov %vm6637_vm13 }
 0x3e3   : > { %v2964_v29 = vsel %vm6638_vm1, %v2963_v35, %v2962_v63  ;;  %v2975_v40 = vsel %vm6639_vm5, %v2974_v55, %v2896_v4  ;;  %v2978_v16 = vrot.slane %v2902_v42, 5  ;;  %v2980_v15 = vrot.slane %v2904_v25, 4  ;;  %vm6643_vm11 = vmmov %vm6638_vm1 }
 0x3e4   : > { %vm6640_vm7 = vcmask 1044484   ;;  %v2977_v46 = vsel %vm6641_vm8, %v2976_v30, %v2975_v40  ;;  %v2988_v48 = vrot.slane %v2913_v58, 7  ;;  %v2990_v3 = vrot.slane %v2915_v39, 6  ;;  %vm6647_vm15 = vmmov %vm6641_vm8 }
 0x3e5   : > { %v2966_v32 = vsel %vm6640_vm7, %v2965_v2, %v2964_v29  ;;  %vm6642_vm0 = vcmask 1045509   ;;  %v2971_v43 = vrot.slane %v2909_v17, 1  ;;  %v2979_v7 = vsel %vm6643_vm11, %v2978_v16, %v2977_v46  ;;  %vm6645_vm9 = vmmov %vm6640_vm7 }
 0x3e6   : > { %v2968_v59 = vsel %vm6642_vm0, %v2967_v6, %v2966_v32  ;;  %v2982_v13 = vrot.slane %v2906_v53, 3  ;;  %vm6644_vm10 = vcmask 1046534   ;;  %v2981_v36 = vsel %vm6645_vm9, %v2980_v15, %v2979_v7  ;;  %vm6648_vm6 = vmmov %vm6642_vm0 }
 0x3e7   : > { %v2970_v60 = vsel %vm6644_vm10, %v2969_v49, %v2968_v59  ;;  %v2989_v4 = vsel %vm6646_vm4, %v2988_v48, %v2911_v52  ;;  %v2992_v42 = vrot.slane %v2917_v20, 5  ;;  %v2984_v25 = vrot.slane %v5637_v1, 2  ;;  %vm6649_vm3 = vmmov %vm6638_vm1 }
 0x3e8   : > { %v2986_v24 = vrot.slane %v5648_v28, 1  ;;  %v2991_v58 = vsel %vm6647_vm15, %v2990_v3, %v2989_v4  ;;  %v2994_v39 = vrot.slane %v2919_v22, 4  ;;  %v2983_v14 = vsel %vm6648_vm6, %v2982_v13, %v2981_v36  ;;  %vm6650_vm2 = vmmov %vm6640_vm7 }
 0x3e9   : > { %v2993_v17 = vsel %vm6649_vm3, %v2992_v42, %v2991_v58  ;;  %v2996_v26 = vrot.slane %v2921_v10, 3  ;;  %v3002_v53 = vrot.slane %v2914_v18, 7  ;;  %v2973_v45 = vsel %vm2972_vm14, %v2971_v43, %v2970_v60  ;;  %vm6651_vm12 = vmmov %vm6642_vm0 }
 0x3ea   : > { %v2995_v9 = vsel %vm6650_vm2, %v2994_v39, %v2993_v17  ;;  %v2998_v38 = vrot.slane %v2923_v57, 2  ;;  %v3004_v52 = vrot.slane %v2916_v62, 6  ;;  %v3000_v1 = vrot.slane %v2925_v5, 1  ;;  %vm6652_vm13 = vmmov %vm6646_vm4 }
 0x3eb   : > { %v2997_v20 = vsel %vm6651_vm12, %v2996_v26, %v2995_v9  ;;  %v3003_v28 = vsel %vm6652_vm13, %v3002_v53, %v2912_v12  ;;  %v3006_v56 = vrot.slane %v2918_v54, 5  ;;  %vm6653_vm1 = vmmov %vm6644_vm10  ;;  %v3008_v10 = vrot.slane %v2920_v50, 4 }
 0x3ec   : > { %v2985_v22 = vsel %vm6653_vm1, %v2984_v25, %v2983_v14  ;;  %vm6654_vm5 = vmmov %vm6653_vm1  ;;  %v3010_v21 = vrot.slane %v2922_v19, 3  ;;  %3277 = vrcp.f32 %v5585_v41  ;;  %v3012_v57 = vrot.slane %v2924_v27, 2 }
 0x3ed   : > { %v2999_v51 = vsel %vm6654_vm5, %v2998_v38, %v2997_v20  ;;  %vm6655_vm7 = vmmov %vm6641_vm8  ;;  %v2987_v12 = vsel %vm2972_vm14, %v2986_v24, %v2985_v22  ;;  %v3014_v23 = vrot.slane %v2926_v31, 1  ;;  %3279 = vrcp.f32 %v5683_v47 }
 0x3ee   : > { %v3005_v44 = vsel %vm6655_vm7, %v3004_v52, %v3003_v28  ;;  %v3001_v18 = vsel %vm2972_vm14, %v3000_v1, %v2999_v51  ;;  %vm6656_vm8 = vmmov %vm6649_vm3  ;;  %v3045_v40 = vand.u32 2147483647, %v5585_v41  ;;  %v3047_v16 = vand.u32 2147483648, %v5585_v41 }
 0x3ef   : > { %v3007_v11 = vsel %vm6656_vm8, %v3006_v56, %v3005_v44  ;;  %vm6657_vm0 = vmmov %vm6650_vm2  ;;  %v3020_v5 = vadd.f32 %v3001_v18, %v2973_v45  ;;  %v3060_v3 = vand.u32 2147483647, %v5683_v47  ;;  %v3062_v59 = vand.u32 2147483648, %v5683_v47 }
 0x3f0   : > { %v3009_v62 = vsel %vm6657_vm0, %v3008_v10, %v3007_v11  ;;  %vm6658_vm11 = vmmov %vm6648_vm6  ;;  %vm3046_vm6 = vcmp.eq.f32.partialorder %v3045_v40, 8.507059e+37  ;;  %v3048_v36 = vor.u32 1.1754944e-38, %v3047_v16  ;;  %vm3056_vm3 = vweird.f32 %v5683_v47 }
 0x3f1   : > { %v3011_v54 = vsel %vm6658_vm11, %v3010_v21, %v3009_v62  ;;  %vm6659_vm10 = vmmov %vm6653_vm1  ;;  %v3021_v0 = vrot.slane %v3020_v5, 4  ;;  %v3063_v58 = vor.u32 1.1754944e-38, %v3062_v59  ;;  %vm3061_vm12 = vcmp.eq.f32.partialorder %v3060_v3, 8.507059e+37 }
 0x3f2   : > { %v3013_v50 = vsel %vm6659_vm10, %v3012_v57, %v3011_v54  ;;  %v3278_v55 = vpop.eup %3277 }
 0x3f3   : > { %v3015_v8 = vsel %vm2972_vm14, %v3014_v23, %v3013_v50  ;;  %v3022_v35 = vadd.f32 %v3021_v0, %v3020_v5  ;;  %v3037_v27 = vmul.f32 %v3278_v55, %v5585_v41  ;;  %v3280_v2 = vpop.eup %3279  ;;  %vm3042_vm9 = vweird.f32 %v3278_v55 }
 0x3f4   : > { %v3027_v19 = vadd.f32 %v3015_v8, %v2987_v12  ;;  %v3052_v31 = vmul.f32 %v3280_v2, %v5683_v47  ;;  %vm3041_vm14 = vweird.f32 %v5585_v41  ;;  %vm3057_vm4 = vweird.f32 %v3280_v2 }
 0x3f5   : > { %v3023_v30 = vrot.slane %v3022_v35, 2  ;;  %v3038_v29 = vsub.f32 1.0, %v3037_v27  ;;  %vm3043_vm15 = vmor %vm3041_vm14, %vm3042_vm9 }
 0x3f6   : > { %v3028_v63 = vrot.slane %v3027_v19, 4  ;;  %v3053_v48 = vsub.f32 1.0, %v3052_v31  ;;  %vm3058_vm2 = vmor %vm3056_vm3, %vm3057_vm4 }
 0x3f7   : > { %v3024_v6 = vadd.f32 %v3023_v30, %v3022_v35  ;;  %v3039_v46 = vmul.f32 %v3278_v55, %v3038_v29 }
 0x3f8   : > { %v3029_v49 = vadd.f32 %v3028_v63, %v3027_v19  ;;  %v3054_v60 = vmul.f32 %v3280_v2, %v3053_v48 }
 0x3f9   : > { %v3025_v15 = vrot.slane %v3024_v6, 1  ;;  %v3040_v13 = vadd.f32 %v3278_v55, %v3039_v46 }
 0x3fa   : > { %v3030_v32 = vrot.slane %v3029_v49, 2  ;;  %v3055_v41 = vadd.f32 %v3280_v2, %v3054_v60 }
 0x3fb   : > { %v3026_v43 = vadd.f32 %v3025_v15, %v3024_v6  ;;  %v3044_v25 = vsel %vm3043_vm15, %v3278_v55, %v3040_v13 }
 0x3fc   : > { %v3031_v7 = vadd.f32 %v3030_v32, %v3029_v49  ;;  %v3049_v24 = vsel %vm3046_vm6, %v3048_v36, %v3044_v25  ;;  %v3059_v17 = vsel %vm3058_vm2, %v3280_v2, %v3055_v41 }
 0x3fd   : > { %v3173_v42 = vadd.f32 -1.0, %v3026_v43  ;;  %v3064_v26 = vsel %vm3061_vm12, %v3063_v58, %v3059_v17 }
 0x3fe   : > { %v3032_v4 = vrot.slane %v3031_v7, 1 }
 0x3ff   : > { %v3050_v14 = vmul.f32 %v3173_v42, %v3049_v24 }
 0x400   : > { %v3033_v39 = vadd.f32 %v3032_v4, %v3031_v7 }
 0x401   : > { %v3066_v45 = vperm.slane %v3050_v14, 0 }
 0x402   : > { %v3174_v53 = vadd.f32 -1.0, %v3033_v39 }
 0x403   : > { %v3068_v47 = vsub.f32 %v6536_v33, %v3066_v45  ;;  %v3070_v38 = vsub.f32 %v6580_v34, %v3066_v45 }
 0x404   : > { %v3065_v9 = vmul.f32 %v3174_v53, %v3064_v26 }
 0x405   : > { %v3072_v20 = vmax.f32 %v3068_v47, 0.0  ;;  %v3074_v1 = vmax.f32 %v3070_v38, 0.0 }
 0x406   : > { %v3067_v52 = vperm.slane %v3065_v9, 0 }
 0x407   : > { %3076 = vst [vmem:[%s248_s7] sm:$0xff] %v3072_v20 }
 0x408   : > { %v3069_v28 = vsub.f32 %v6538_v37, %v3067_v52  ;;  %v3071_v56 = vsub.f32 %v6583_v61, %v3067_v52  ;;  %3078 = vst [vmem:[%s248_s7 + $0x10] sm:$0xff] %v3074_v1 }
 0x40a   : > { %v3073_v33 = vmax.f32 %v3069_v28, 0.0  ;;  %v3075_v34 = vmax.f32 %v3071_v56, 0.0 }
 0x40c   : > { %3077 = vst [vmem:[%s248_s7 + $0x8] sm:$0xff] %v3073_v33 }
 0x40d   : > { %3079 = vst [vmem:[%s248_s7 + $0x18] sm:$0xff] %v3075_v34 }
 0x40e   : > { %3308 = shalt.err (!%p3305_p5)
}
 0x40f   : > { %s3347_s12 = smov 256   ;;  %s3348_s23 = smov 512  }
 0x410   : > { %s3349_s25 = smov 16  }
 0x411   : > { %3182 = dma.vmem_to_hbm [thread:$0]  (%p3418_p6), %s3094_s8, 512, %s3096_s22, %s3081_s15, %s3347_s12, %s3348_s23, %s3349_s25  }
 0x412 PF: > { %s3110_s26 = sand.u32 1, %s3331_s18   ;;  %p3185_p7 = pnand %p3166_p9, %p3422_p8 }
 0x413   : > { %s3111_s30 = scalar_lea.sflag [#allocation4], %s3110_s26 }
 0x414   : > { %p3186_p10 = pneg %p3185_p7 }
 0x416   : > { %3326 = dma.done.wait (%p3186_p10), %s3111_s30, 512  }
 0x417   : > { %3328 = vsyncadd (%p3186_p10), %s3111_s30, 4294966784  ;;  %p15_p11 = scmp.ge.s32.totalorder %s3403_s24, 4   ;;  %s6660_s18 = smov %s3335_s19 }
 0x418   : > { %s6661_s19 = smov %s3339_s20  ;;  %s6662_s20 = smov %s3416_s27 }
 0x419   : > { %s6663_s21 = smov %s3403_s24  ;;  %17 = sbr.rel (!%p15_p11) target bundleno = 3 (0x3), region = 103 }
 0x41e   :  { %3117 = vsyncpa [#allocation4], 1 }
 0x41f   :  { %3119 = vsyncpa [#allocation4 + $0x1], 1 }

</bundles_post_ra>
